<compile_context>
chip_gen: v7x
topology: tpu7x:2x2x1
jax: 0.10.0
libtpu: 0.0.40
codegen_flags: <defaults>
</compile_context>

<pallas_src>
import jax
import jax.numpy as jnp
from jax import lax
from jax.experimental import pallas as pl
from jax.experimental.pallas import tpu as pltpu

# ---- small, TPU-friendly shapes consistent with the module's forward ----
BATCH = 64                 # total rows fed per call (grid over batch tiles)
TILE_B = 32                # rows per grid step; multiple of 16 for packed bf16 vregs
IN_DIM = 3 * 16 * 16       # module default is 3*32*32; scaled down ("C*H*W")
HIDDEN = 256               # module default is 1000; scaled down, lane-aligned
OUT_DIM = 10
OUT_PAD = 128              # lane-dense padded output width (slice to 10 in wrapper)
N_INNER = 20               # the `for _ in range(20)` loop in forward()


def simplenet_kernel(x_ref, w1_ref, b1_ref, wi_ref, bi_ref, w2_ref, b2_ref, o_ref):
    tb = x_ref.shape[0]

    # Hoist ALL bias broadcasts out of the serial chain (JAX does not CSE
    # broadcast_in_dim, so doing this inside the loop re-emits it 20x).
    b1 = jnp.broadcast_to(b1_ref[...], (tb, HIDDEN))
    bi = jnp.broadcast_to(bi_ref[...], (tb, HIDDEN))
    b2 = jnp.broadcast_to(b2_ref[...], (tb, OUT_PAD))

    # fc1 + relu : bf16 MXU operands, f32 accumulation, f32 bias/relu on the VPU.
    x_bf = x_ref[...].astype(jnp.bfloat16)
    h = jnp.dot(x_bf, w1_ref[...], preferred_element_type=jnp.float32)
    h = jnp.maximum(h + b1, 0.0)

    # Inner 20 layers. Do NOT hoist wi_ref[...] into a register value (256x256 is
    # the whole vreg file); let vmatmul stream/stage the invariant RHS from VMEM.
    def body(_, h):
        hb = jnp.dot(h.astype(jnp.bfloat16), wi_ref[...],
                     preferred_element_type=jnp.float32)
        return jnp.maximum(hb + bi, 0.0)

    # Fixed trip count of 20 -> unroll so the LLO scheduler sees straight-line code
    # and the loop-invariant RHS can stay staged across layers.
    h = lax.fori_loop(0, N_INNER, body, h, unroll=True)

    # fc2 (no activation): lane-dense (TILE_B, OUT_PAD) slab -> unmasked vector stores.
    o_ref[...] = (
        jnp.dot(h.astype(jnp.bfloat16), w2_ref[...],
                preferred_element_type=jnp.float32) + b2
    ).astype(o_ref.dtype)


@jax.jit
def simplenet_forward(x, w1, b1, wi, bi, w2p, b2p):
    # x arrives as (B, C, H, W); the module's x.view(B, -1) is plain JAX glue
    # (a contiguous reshape, effectively a bitcast).
    b = x.shape[0]
    x2d = x.reshape(b, -1)

    # Pad batch up to a multiple of the tile (zero rows are ~free, sliced off below).
    b_pad = -(-b // TILE_B) * TILE_B
    if b_pad != b:
        x2d = jnp.pad(x2d, ((0, b_pad - b), (0, 0)))
    n_tiles = b_pad // TILE_B

    const = lambda i: (0, 0)   # weights/biases: same block every step -> stay VMEM-resident
    out_pad = pl.pallas_call(
        simplenet_kernel,
        out_shape=jax.ShapeDtypeStruct((b_pad, OUT_PAD), jnp.float32),
        grid=(n_tiles,),
        in_specs=[
            pl.BlockSpec((TILE_B, IN_DIM), lambda i: (i, 0)),   # x tile
            pl.BlockSpec((IN_DIM, HIDDEN), const),              # w1
            pl.BlockSpec((1, HIDDEN), const),                   # b1
            pl.BlockSpec((HIDDEN, HIDDEN), const),              # wi
            pl.BlockSpec((1, HIDDEN), const),                   # bi
            pl.BlockSpec((HIDDEN, OUT_PAD), const),             # w2 (padded)
            pl.BlockSpec((1, OUT_PAD), const),                  # b2 (padded)
        ],
        out_specs=pl.BlockSpec((TILE_B, OUT_PAD), lambda i: (i, 0)),
        compiler_params=pltpu.CompilerParams(
            # batch tiles are independent -> shard across both TCs on v7x
            dimension_semantics=("parallel",),
        ),
    )(x2d, w1, b1, wi, bi, w2p, b2p)

    # un-pad the lane-dense slab back to the module's 10 logits (and real batch)
    return out_pad[:b, :OUT_DIM]


def reference_forward(x, w1, b1, wi, bi, w2p, b2p):
    """Pure-JAX reference mirroring the kernel's bf16-matmul / f32-accumulate math."""
    h = x.reshape(x.shape[0], -1).astype(jnp.bfloat16)
    h = jnp.dot(h, w1, preferred_element_type=jnp.float32) + b1
    h = jnp.maximum(h, 0.0)
    for _ in range(N_INNER):
        h = jnp.dot(h.astype(jnp.bfloat16), wi,
                    preferred_element_type=jnp.float32) + bi
        h = jnp.maximum(h, 0.0)
    o = jnp.dot(h.astype(jnp.bfloat16), w2p,
                preferred_element_type=jnp.float32) + b2p
    return o[:, :OUT_DIM]


def init_linear(key, fan_in, fan_out, pad_out=None):
    """Deterministic init matching nn.Linear's U(-1/sqrt(fan_in), 1/sqrt(fan_in)).

    Weights stored (in, out) in bf16 (MXU operand dtype), biases (1, out) in f32.
    Optionally zero-pads the output dimension to `pad_out` lanes.
    """
    kw, kb = jax.random.split(key)
    bound = 1.0 / jnp.sqrt(float(fan_in))
    w = jax.random.uniform(kw, (fan_in, fan_out), jnp.float32, -bound, bound)
    b = jax.random.uniform(kb, (1, fan_out), jnp.float32, -bound, bound)
    if pad_out is not None and pad_out > fan_out:
        w = jnp.pad(w, ((0, 0), (0, pad_out - fan_out)))
        b = jnp.pad(b, ((0, 0), (0, pad_out - fan_out)))
    return w.astype(jnp.bfloat16), b.astype(jnp.float32)


if __name__ == "__main__":
    key = jax.random.PRNGKey(0)
    k_x, k1, k2, k3 = jax.random.split(key, 4)

    # input is "image-like" NCHW, flattened by forward()
    x = jax.random.normal(k_x, (BATCH, 3, 16, 16), jnp.float32)

    w1, b1 = init_linear(k1, IN_DIM, HIDDEN)
    wi, bi = init_linear(k2, HIDDEN, HIDDEN)
    w2p, b2p = init_linear(k3, HIDDEN, OUT_DIM, pad_out=OUT_PAD)

    out = simplenet_forward(x, w1, b1, wi, bi, w2p, b2p)
    jax.block_until_ready(out)

    assert out.shape == (BATCH, OUT_DIM), out.shape
    assert jnp.all(jnp.isfinite(out))

    ref = reference_forward(x, w1, b1, wi, bi, w2p, b2p)
    assert jnp.allclose(out, ref, rtol=2e-2, atol=2e-2), (
        float(jnp.max(jnp.abs(out - ref)))
    )
    print("KERNEL_OK")
</pallas_src>

<mosaic_0001>
module attributes {stable_mosaic.version = 11 : i64} {
  func.func @simplenet_kernel(%arg0: i32, %arg1: memref<32x768xf32, #tpu.memory_space<vmem>>, %arg2: memref<768x256xbf16, #tpu.memory_space<vmem>>, %arg3: memref<1x256xf32, #tpu.memory_space<vmem>>, %arg4: memref<256x256xbf16, #tpu.memory_space<vmem>>, %arg5: memref<1x256xf32, #tpu.memory_space<vmem>>, %arg6: memref<256x128xbf16, #tpu.memory_space<vmem>>, %arg7: memref<1x128xf32, #tpu.memory_space<vmem>>, %arg8: memref<32x128xf32, #tpu.memory_space<vmem>>) attributes {dimension_semantics = [#tpu.dimension_semantics<parallel>], iteration_bounds = array<i64: 2>, scalar_prefetch = 0 : i64, scratch_operands = 0 : i64, tpu.core_type = #tpu.core_type<tc>, window_params = [{transform_indices = @transform_0, window_bounds = array<i64: 32, 768>}, {pipeline_mode = #tpu.pipeline_mode<synchronous>, transform_indices = @transform_1, window_bounds = array<i64: 768, 256>}, {pipeline_mode = #tpu.pipeline_mode<synchronous>, transform_indices = @transform_2, window_bounds = array<i64: 1, 256>}, {pipeline_mode = #tpu.pipeline_mode<synchronous>, transform_indices = @transform_3, window_bounds = array<i64: 256, 256>}, {pipeline_mode = #tpu.pipeline_mode<synchronous>, transform_indices = @transform_4, window_bounds = array<i64: 1, 256>}, {pipeline_mode = #tpu.pipeline_mode<synchronous>, transform_indices = @transform_5, window_bounds = array<i64: 256, 128>}, {pipeline_mode = #tpu.pipeline_mode<synchronous>, transform_indices = @transform_6, window_bounds = array<i64: 1, 128>}, {transform_indices = @transform_7, window_bounds = array<i64: 32, 128>}]} {
    %c0 = arith.constant 0 : index
    %c0_0 = arith.constant 0 : index
    %0 = vector.load %arg3[%c0, %c0_0] : memref<1x256xf32, #tpu.memory_space<vmem>>, vector<1x256xf32>
    %1 = vector.shape_cast %0 : vector<1x256xf32> to vector<1x256xf32>
    %2 = vector.broadcast %1 : vector<1x256xf32> to vector<32x256xf32>
    %c0_1 = arith.constant 0 : index
    %c0_2 = arith.constant 0 : index
    %3 = vector.load %arg5[%c0_1, %c0_2] : memref<1x256xf32, #tpu.memory_space<vmem>>, vector<1x256xf32>
    %4 = vector.shape_cast %3 : vector<1x256xf32> to vector<1x256xf32>
    %5 = vector.broadcast %4 : vector<1x256xf32> to vector<32x256xf32>
    %c0_3 = arith.constant 0 : index
    %c0_4 = arith.constant 0 : index
    %6 = vector.load %arg7[%c0_3, %c0_4] : memref<1x128xf32, #tpu.memory_space<vmem>>, vector<1x128xf32>
    %7 = vector.shape_cast %6 : vector<1x128xf32> to vector<1x128xf32>
    %8 = vector.broadcast %7 : vector<1x128xf32> to vector<32x128xf32>
    %c0_5 = arith.constant 0 : index
    %c0_6 = arith.constant 0 : index
    %9 = vector.load %arg1[%c0_5, %c0_6] : memref<32x768xf32, #tpu.memory_space<vmem>>, vector<32x768xf32>
    %10 = arith.truncf %9 : vector<32x768xf32> to vector<32x768xbf16>
    %c0_7 = arith.constant 0 : index
    %c0_8 = arith.constant 0 : index
    %11 = vector.load %arg2[%c0_7, %c0_8] : memref<768x256xbf16, #tpu.memory_space<vmem>>, vector<768x256xbf16>
    %cst = arith.constant dense<0.000000e+00> : vector<32x256xf32>
    %12 = tpu.matmul %10, %11, %cst {dimension_numbers = #tpu.dot_dimension_numbers<[1], [0], [0], [1], [0, 0, 1, 1], [], []>} : vector<32x768xbf16>, vector<768x256xbf16>, vector<32x256xf32> -> vector<32x256xf32>
    %13 = arith.addf %12, %2 : vector<32x256xf32>
    %cst_9 = arith.constant 0.000000e+00 : f32
    %14 = vector.broadcast %cst_9 : f32 to vector<32x256xf32>
    %15 = arith.maximumf %13, %14 : vector<32x256xf32>
    %c0_i32 = arith.constant 0 : i32
    %16 = arith.truncf %15 : vector<32x256xf32> to vector<32x256xbf16>
    %c0_10 = arith.constant 0 : index
    %c0_11 = arith.constant 0 : index
    %17 = vector.load %arg4[%c0_10, %c0_11] : memref<256x256xbf16, #tpu.memory_space<vmem>>, vector<256x256xbf16>
    %cst_12 = arith.constant dense<0.000000e+00> : vector<32x256xf32>
    %18 = tpu.matmul %16, %17, %cst_12 {dimension_numbers = #tpu.dot_dimension_numbers<[1], [0], [0], [1], [0, 0, 1, 1], [], []>} : vector<32x256xbf16>, vector<256x256xbf16>, vector<32x256xf32> -> vector<32x256xf32>
    %19 = arith.addf %18, %5 : vector<32x256xf32>
    %cst_13 = arith.constant 0.000000e+00 : f32
    %20 = vector.broadcast %cst_13 : f32 to vector<32x256xf32>
    %21 = arith.maximumf %19, %20 : vector<32x256xf32>
    %c1_i32 = arith.constant 1 : i32
    %22 = arith.truncf %21 : vector<32x256xf32> to vector<32x256xbf16>
    %c0_14 = arith.constant 0 : index
    %c0_15 = arith.constant 0 : index
    %23 = vector.load %arg4[%c0_14, %c0_15] : memref<256x256xbf16, #tpu.memory_space<vmem>>, vector<256x256xbf16>
    %cst_16 = arith.constant dense<0.000000e+00> : vector<32x256xf32>
    %24 = tpu.matmul %22, %23, %cst_16 {dimension_numbers = #tpu.dot_dimension_numbers<[1], [0], [0], [1], [0, 0, 1, 1], [], []>} : vector<32x256xbf16>, vector<256x256xbf16>, vector<32x256xf32> -> vector<32x256xf32>
    %25 = arith.addf %24, %5 : vector<32x256xf32>
    %cst_17 = arith.constant 0.000000e+00 : f32
    %26 = vector.broadcast %cst_17 : f32 to vector<32x256xf32>
    %27 = arith.maximumf %25, %26 : vector<32x256xf32>
    %c2_i32 = arith.constant 2 : i32
    %28 = arith.truncf %27 : vector<32x256xf32> to vector<32x256xbf16>
    %c0_18 = arith.constant 0 : index
    %c0_19 = arith.constant 0 : index
    %29 = vector.load %arg4[%c0_18, %c0_19] : memref<256x256xbf16, #tpu.memory_space<vmem>>, vector<256x256xbf16>
    %cst_20 = arith.constant dense<0.000000e+00> : vector<32x256xf32>
    %30 = tpu.matmul %28, %29, %cst_20 {dimension_numbers = #tpu.dot_dimension_numbers<[1], [0], [0], [1], [0, 0, 1, 1], [], []>} : vector<32x256xbf16>, vector<256x256xbf16>, vector<32x256xf32> -> vector<32x256xf32>
    %31 = arith.addf %30, %5 : vector<32x256xf32>
    %cst_21 = arith.constant 0.000000e+00 : f32
    %32 = vector.broadcast %cst_21 : f32 to vector<32x256xf32>
    %33 = arith.maximumf %31, %32 : vector<32x256xf32>
    %c3_i32 = arith.constant 3 : i32
    %34 = arith.truncf %33 : vector<32x256xf32> to vector<32x256xbf16>
    %c0_22 = arith.constant 0 : index
    %c0_23 = arith.constant 0 : index
    %35 = vector.load %arg4[%c0_22, %c0_23] : memref<256x256xbf16, #tpu.memory_space<vmem>>, vector<256x256xbf16>
    %cst_24 = arith.constant dense<0.000000e+00> : vector<32x256xf32>
    %36 = tpu.matmul %34, %35, %cst_24 {dimension_numbers = #tpu.dot_dimension_numbers<[1], [0], [0], [1], [0, 0, 1, 1], [], []>} : vector<32x256xbf16>, vector<256x256xbf16>, vector<32x256xf32> -> vector<32x256xf32>
    %37 = arith.addf %36, %5 : vector<32x256xf32>
    %cst_25 = arith.constant 0.000000e+00 : f32
    %38 = vector.broadcast %cst_25 : f32 to vector<32x256xf32>
    %39 = arith.maximumf %37, %38 : vector<32x256xf32>
    %c4_i32 = arith.constant 4 : i32
    %40 = arith.truncf %39 : vector<32x256xf32> to vector<32x256xbf16>
    %c0_26 = arith.constant 0 : index
    %c0_27 = arith.constant 0 : index
    %41 = vector.load %arg4[%c0_26, %c0_27] : memref<256x256xbf16, #tpu.memory_space<vmem>>, vector<256x256xbf16>
    %cst_28 = arith.constant dense<0.000000e+00> : vector<32x256xf32>
    %42 = tpu.matmul %40, %41, %cst_28 {dimension_numbers = #tpu.dot_dimension_numbers<[1], [0], [0], [1], [0, 0, 1, 1], [], []>} : vector<32x256xbf16>, vector<256x256xbf16>, vector<32x256xf32> -> vector<32x256xf32>
    %43 = arith.addf %42, %5 : vector<32x256xf32>
    %cst_29 = arith.constant 0.000000e+00 : f32
    %44 = vector.broadcast %cst_29 : f32 to vector<32x256xf32>
    %45 = arith.maximumf %43, %44 : vector<32x256xf32>
    %c5_i32 = arith.constant 5 : i32
    %46 = arith.truncf %45 : vector<32x256xf32> to vector<32x256xbf16>
    %c0_30 = arith.constant 0 : index
    %c0_31 = arith.constant 0 : index
    %47 = vector.load %arg4[%c0_30, %c0_31] : memref<256x256xbf16, #tpu.memory_space<vmem>>, vector<256x256xbf16>
    %cst_32 = arith.constant dense<0.000000e+00> : vector<32x256xf32>
    %48 = tpu.matmul %46, %47, %cst_32 {dimension_numbers = #tpu.dot_dimension_numbers<[1], [0], [0], [1], [0, 0, 1, 1], [], []>} : vector<32x256xbf16>, vector<256x256xbf16>, vector<32x256xf32> -> vector<32x256xf32>
    %49 = arith.addf %48, %5 : vector<32x256xf32>
    %cst_33 = arith.constant 0.000000e+00 : f32
    %50 = vector.broadcast %cst_33 : f32 to vector<32x256xf32>
    %51 = arith.maximumf %49, %50 : vector<32x256xf32>
    %c6_i32 = arith.constant 6 : i32
    %52 = arith.truncf %51 : vector<32x256xf32> to vector<32x256xbf16>
    %c0_34 = arith.constant 0 : index
    %c0_35 = arith.constant 0 : index
    %53 = vector.load %arg4[%c0_34, %c0_35] : memref<256x256xbf16, #tpu.memory_space<vmem>>, vector<256x256xbf16>
    %cst_36 = arith.constant dense<0.000000e+00> : vector<32x256xf32>
    %54 = tpu.matmul %52, %53, %cst_36 {dimension_numbers = #tpu.dot_dimension_numbers<[1], [0], [0], [1], [0, 0, 1, 1], [], []>} : vector<32x256xbf16>, vector<256x256xbf16>, vector<32x256xf32> -> vector<32x256xf32>
    %55 = arith.addf %54, %5 : vector<32x256xf32>
    %cst_37 = arith.constant 0.000000e+00 : f32
    %56 = vector.broadcast %cst_37 : f32 to vector<32x256xf32>
    %57 = arith.maximumf %55, %56 : vector<32x256xf32>
    %c7_i32 = arith.constant 7 : i32
    %58 = arith.truncf %57 : vector<32x256xf32> to vector<32x256xbf16>
    %c0_38 = arith.constant 0 : index
    %c0_39 = arith.constant 0 : index
    %59 = vector.load %arg4[%c0_38, %c0_39] : memref<256x256xbf16, #tpu.memory_space<vmem>>, vector<256x256xbf16>
    %cst_40 = arith.constant dense<0.000000e+00> : vector<32x256xf32>
    %60 = tpu.matmul %58, %59, %cst_40 {dimension_numbers = #tpu.dot_dimension_numbers<[1], [0], [0], [1], [0, 0, 1, 1], [], []>} : vector<32x256xbf16>, vector<256x256xbf16>, vector<32x256xf32> -> vector<32x256xf32>
    %61 = arith.addf %60, %5 : vector<32x256xf32>
    %cst_41 = arith.constant 0.000000e+00 : f32
    %62 = vector.broadcast %cst_41 : f32 to vector<32x256xf32>
    %63 = arith.maximumf %61, %62 : vector<32x256xf32>
    %c8_i32 = arith.constant 8 : i32
    %64 = arith.truncf %63 : vector<32x256xf32> to vector<32x256xbf16>
    %c0_42 = arith.constant 0 : index
    %c0_43 = arith.constant 0 : index
    %65 = vector.load %arg4[%c0_42, %c0_43] : memref<256x256xbf16, #tpu.memory_space<vmem>>, vector<256x256xbf16>
    %cst_44 = arith.constant dense<0.000000e+00> : vector<32x256xf32>
    %66 = tpu.matmul %64, %65, %cst_44 {dimension_numbers = #tpu.dot_dimension_numbers<[1], [0], [0], [1], [0, 0, 1, 1], [], []>} : vector<32x256xbf16>, vector<256x256xbf16>, vector<32x256xf32> -> vector<32x256xf32>
    %67 = arith.addf %66, %5 : vector<32x256xf32>
    %cst_45 = arith.constant 0.000000e+00 : f32
    %68 = vector.broadcast %cst_45 : f32 to vector<32x256xf32>
    %69 = arith.maximumf %67, %68 : vector<32x256xf32>
    %c9_i32 = arith.constant 9 : i32
    %70 = arith.truncf %69 : vector<32x256xf32> to vector<32x256xbf16>
    %c0_46 = arith.constant 0 : index
    %c0_47 = arith.constant 0 : index
    %71 = vector.load %arg4[%c0_46, %c0_47] : memref<256x256xbf16, #tpu.memory_space<vmem>>, vector<256x256xbf16>
    %cst_48 = arith.constant dense<0.000000e+00> : vector<32x256xf32>
    %72 = tpu.matmul %70, %71, %cst_48 {dimension_numbers = #tpu.dot_dimension_numbers<[1], [0], [0], [1], [0, 0, 1, 1], [], []>} : vector<32x256xbf16>, vector<256x256xbf16>, vector<32x256xf32> -> vector<32x256xf32>
    %73 = arith.addf %72, %5 : vector<32x256xf32>
    %cst_49 = arith.constant 0.000000e+00 : f32
    %74 = vector.broadcast %cst_49 : f32 to vector<32x256xf32>
    %75 = arith.maximumf %73, %74 : vector<32x256xf32>
    %c10_i32 = arith.constant 10 : i32
    %76 = arith.truncf %75 : vector<32x256xf32> to vector<32x256xbf16>
    %c0_50 = arith.constant 0 : index
    %c0_51 = arith.constant 0 : index
    %77 = vector.load %arg4[%c0_50, %c0_51] : memref<256x256xbf16, #tpu.memory_space<vmem>>, vector<256x256xbf16>
    %cst_52 = arith.constant dense<0.000000e+00> : vector<32x256xf32>
    %78 = tpu.matmul %76, %77, %cst_52 {dimension_numbers = #tpu.dot_dimension_numbers<[1], [0], [0], [1], [0, 0, 1, 1], [], []>} : vector<32x256xbf16>, vector<256x256xbf16>, vector<32x256xf32> -> vector<32x256xf32>
    %79 = arith.addf %78, %5 : vector<32x256xf32>
    %cst_53 = arith.constant 0.000000e+00 : f32
    %80 = vector.broadcast %cst_53 : f32 to vector<32x256xf32>
    %81 = arith.maximumf %79, %80 : vector<32x256xf32>
    %c11_i32 = arith.constant 11 : i32
    %82 = arith.truncf %81 : vector<32x256xf32> to vector<32x256xbf16>
    %c0_54 = arith.constant 0 : index
    %c0_55 = arith.constant 0 : index
    %83 = vector.load %arg4[%c0_54, %c0_55] : memref<256x256xbf16, #tpu.memory_space<vmem>>, vector<256x256xbf16>
    %cst_56 = arith.constant dense<0.000000e+00> : vector<32x256xf32>
    %84 = tpu.matmul %82, %83, %cst_56 {dimension_numbers = #tpu.dot_dimension_numbers<[1], [0], [0], [1], [0, 0, 1, 1], [], []>} : vector<32x256xbf16>, vector<256x256xbf16>, vector<32x256xf32> -> vector<32x256xf32>
    %85 = arith.addf %84, %5 : vector<32x256xf32>
    %cst_57 = arith.constant 0.000000e+00 : f32
    %86 = vector.broadcast %cst_57 : f32 to vector<32x256xf32>
    %87 = arith.maximumf %85, %86 : vector<32x256xf32>
    %c12_i32 = arith.constant 12 : i32
    %88 = arith.truncf %87 : vector<32x256xf32> to vector<32x256xbf16>
    %c0_58 = arith.constant 0 : index
    %c0_59 = arith.constant 0 : index
    %89 = vector.load %arg4[%c0_58, %c0_59] : memref<256x256xbf16, #tpu.memory_space<vmem>>, vector<256x256xbf16>
    %cst_60 = arith.constant dense<0.000000e+00> : vector<32x256xf32>
    %90 = tpu.matmul %88, %89, %cst_60 {dimension_numbers = #tpu.dot_dimension_numbers<[1], [0], [0], [1], [0, 0, 1, 1], [], []>} : vector<32x256xbf16>, vector<256x256xbf16>, vector<32x256xf32> -> vector<32x256xf32>
    %91 = arith.addf %90, %5 : vector<32x256xf32>
    %cst_61 = arith.constant 0.000000e+00 : f32
    %92 = vector.broadcast %cst_61 : f32 to vector<32x256xf32>
    %93 = arith.maximumf %91, %92 : vector<32x256xf32>
    %c13_i32 = arith.constant 13 : i32
    %94 = arith.truncf %93 : vector<32x256xf32> to vector<32x256xbf16>
    %c0_62 = arith.constant 0 : index
    %c0_63 = arith.constant 0 : index
    %95 = vector.load %arg4[%c0_62, %c0_63] : memref<256x256xbf16, #tpu.memory_space<vmem>>, vector<256x256xbf16>
    %cst_64 = arith.constant dense<0.000000e+00> : vector<32x256xf32>
    %96 = tpu.matmul %94, %95, %cst_64 {dimension_numbers = #tpu.dot_dimension_numbers<[1], [0], [0], [1], [0, 0, 1, 1], [], []>} : vector<32x256xbf16>, vector<256x256xbf16>, vector<32x256xf32> -> vector<32x256xf32>
    %97 = arith.addf %96, %5 : vector<32x256xf32>
    %cst_65 = arith.constant 0.000000e+00 : f32
    %98 = vector.broadcast %cst_65 : f32 to vector<32x256xf32>
    %99 = arith.maximumf %97, %98 : vector<32x256xf32>
    %c14_i32 = arith.constant 14 : i32
    %100 = arith.truncf %99 : vector<32x256xf32> to vector<32x256xbf16>
    %c0_66 = arith.constant 0 : index
    %c0_67 = arith.constant 0 : index
    %101 = vector.load %arg4[%c0_66, %c0_67] : memref<256x256xbf16, #tpu.memory_space<vmem>>, vector<256x256xbf16>
    %cst_68 = arith.constant dense<0.000000e+00> : vector<32x256xf32>
    %102 = tpu.matmul %100, %101, %cst_68 {dimension_numbers = #tpu.dot_dimension_numbers<[1], [0], [0], [1], [0, 0, 1, 1], [], []>} : vector<32x256xbf16>, vector<256x256xbf16>, vector<32x256xf32> -> vector<32x256xf32>
    %103 = arith.addf %102, %5 : vector<32x256xf32>
    %cst_69 = arith.constant 0.000000e+00 : f32
    %104 = vector.broadcast %cst_69 : f32 to vector<32x256xf32>
    %105 = arith.maximumf %103, %104 : vector<32x256xf32>
    %c15_i32 = arith.constant 15 : i32
    %106 = arith.truncf %105 : vector<32x256xf32> to vector<32x256xbf16>
    %c0_70 = arith.constant 0 : index
    %c0_71 = arith.constant 0 : index
    %107 = vector.load %arg4[%c0_70, %c0_71] : memref<256x256xbf16, #tpu.memory_space<vmem>>, vector<256x256xbf16>
    %cst_72 = arith.constant dense<0.000000e+00> : vector<32x256xf32>
    %108 = tpu.matmul %106, %107, %cst_72 {dimension_numbers = #tpu.dot_dimension_numbers<[1], [0], [0], [1], [0, 0, 1, 1], [], []>} : vector<32x256xbf16>, vector<256x256xbf16>, vector<32x256xf32> -> vector<32x256xf32>
    %109 = arith.addf %108, %5 : vector<32x256xf32>
    %cst_73 = arith.constant 0.000000e+00 : f32
    %110 = vector.broadcast %cst_73 : f32 to vector<32x256xf32>
    %111 = arith.maximumf %109, %110 : vector<32x256xf32>
    %c16_i32 = arith.constant 16 : i32
    %112 = arith.truncf %111 : vector<32x256xf32> to vector<32x256xbf16>
    %c0_74 = arith.constant 0 : index
    %c0_75 = arith.constant 0 : index
    %113 = vector.load %arg4[%c0_74, %c0_75] : memref<256x256xbf16, #tpu.memory_space<vmem>>, vector<256x256xbf16>
    %cst_76 = arith.constant dense<0.000000e+00> : vector<32x256xf32>
    %114 = tpu.matmul %112, %113, %cst_76 {dimension_numbers = #tpu.dot_dimension_numbers<[1], [0], [0], [1], [0, 0, 1, 1], [], []>} : vector<32x256xbf16>, vector<256x256xbf16>, vector<32x256xf32> -> vector<32x256xf32>
    %115 = arith.addf %114, %5 : vector<32x256xf32>
    %cst_77 = arith.constant 0.000000e+00 : f32
    %116 = vector.broadcast %cst_77 : f32 to vector<32x256xf32>
    %117 = arith.maximumf %115, %116 : vector<32x256xf32>
    %c17_i32 = arith.constant 17 : i32
    %118 = arith.truncf %117 : vector<32x256xf32> to vector<32x256xbf16>
    %c0_78 = arith.constant 0 : index
    %c0_79 = arith.constant 0 : index
    %119 = vector.load %arg4[%c0_78, %c0_79] : memref<256x256xbf16, #tpu.memory_space<vmem>>, vector<256x256xbf16>
    %cst_80 = arith.constant dense<0.000000e+00> : vector<32x256xf32>
    %120 = tpu.matmul %118, %119, %cst_80 {dimension_numbers = #tpu.dot_dimension_numbers<[1], [0], [0], [1], [0, 0, 1, 1], [], []>} : vector<32x256xbf16>, vector<256x256xbf16>, vector<32x256xf32> -> vector<32x256xf32>
    %121 = arith.addf %120, %5 : vector<32x256xf32>
    %cst_81 = arith.constant 0.000000e+00 : f32
    %122 = vector.broadcast %cst_81 : f32 to vector<32x256xf32>
    %123 = arith.maximumf %121, %122 : vector<32x256xf32>
    %c18_i32 = arith.constant 18 : i32
    %124 = arith.truncf %123 : vector<32x256xf32> to vector<32x256xbf16>
    %c0_82 = arith.constant 0 : index
    %c0_83 = arith.constant 0 : index
    %125 = vector.load %arg4[%c0_82, %c0_83] : memref<256x256xbf16, #tpu.memory_space<vmem>>, vector<256x256xbf16>
    %cst_84 = arith.constant dense<0.000000e+00> : vector<32x256xf32>
    %126 = tpu.matmul %124, %125, %cst_84 {dimension_numbers = #tpu.dot_dimension_numbers<[1], [0], [0], [1], [0, 0, 1, 1], [], []>} : vector<32x256xbf16>, vector<256x256xbf16>, vector<32x256xf32> -> vector<32x256xf32>
    %127 = arith.addf %126, %5 : vector<32x256xf32>
    %cst_85 = arith.constant 0.000000e+00 : f32
    %128 = vector.broadcast %cst_85 : f32 to vector<32x256xf32>
    %129 = arith.maximumf %127, %128 : vector<32x256xf32>
    %c19_i32 = arith.constant 19 : i32
    %130 = arith.truncf %129 : vector<32x256xf32> to vector<32x256xbf16>
    %c0_86 = arith.constant 0 : index
    %c0_87 = arith.constant 0 : index
    %131 = vector.load %arg4[%c0_86, %c0_87] : memref<256x256xbf16, #tpu.memory_space<vmem>>, vector<256x256xbf16>
    %cst_88 = arith.constant dense<0.000000e+00> : vector<32x256xf32>
    %132 = tpu.matmul %130, %131, %cst_88 {dimension_numbers = #tpu.dot_dimension_numbers<[1], [0], [0], [1], [0, 0, 1, 1], [], []>} : vector<32x256xbf16>, vector<256x256xbf16>, vector<32x256xf32> -> vector<32x256xf32>
    %133 = arith.addf %132, %5 : vector<32x256xf32>
    %cst_89 = arith.constant 0.000000e+00 : f32
    %134 = vector.broadcast %cst_89 : f32 to vector<32x256xf32>
    %135 = arith.maximumf %133, %134 : vector<32x256xf32>
    %136 = arith.truncf %135 : vector<32x256xf32> to vector<32x256xbf16>
    %c0_90 = arith.constant 0 : index
    %c0_91 = arith.constant 0 : index
    %137 = vector.load %arg6[%c0_90, %c0_91] : memref<256x128xbf16, #tpu.memory_space<vmem>>, vector<256x128xbf16>
    %cst_92 = arith.constant dense<0.000000e+00> : vector<32x128xf32>
    %138 = tpu.matmul %136, %137, %cst_92 {dimension_numbers = #tpu.dot_dimension_numbers<[1], [0], [0], [1], [0, 0, 1, 1], [], []>} : vector<32x256xbf16>, vector<256x128xbf16>, vector<32x128xf32> -> vector<32x128xf32>
    %139 = arith.addf %138, %8 : vector<32x128xf32>
    %c0_93 = arith.constant 0 : index
    %c0_94 = arith.constant 0 : index
    %140 = vector.load %arg8[%c0_93, %c0_94] : memref<32x128xf32, #tpu.memory_space<vmem>>, vector<32x128xf32>
    tpu.vector_store %arg8[%c0_93, %c0_94], %139 {strides = array<i32>} : memref<32x128xf32, #tpu.memory_space<vmem>>, vector<32x128xf32>,
    return
  }
  func.func @transform_0(%arg0: i32) -> (i32, i32) {
    %c0_i32 = arith.constant 0 : i32
    %c0_i32_0 = arith.constant 0 : i32
    return %arg0, %c0_i32 : i32, i32
  }
  func.func @transform_1(%arg0: i32) -> (i32, i32) {
    %c0_i32 = arith.constant 0 : i32
    %c0_i32_0 = arith.constant 0 : i32
    %c0_i32_1 = arith.constant 0 : i32
    return %c0_i32, %c0_i32_0 : i32, i32
  }
  func.func @transform_2(%arg0: i32) -> (i32, i32) {
    %c0_i32 = arith.constant 0 : i32
    %c0_i32_0 = arith.constant 0 : i32
    %c0_i32_1 = arith.constant 0 : i32
    return %c0_i32, %c0_i32_0 : i32, i32
  }
  func.func @transform_3(%arg0: i32) -> (i32, i32) {
    %c0_i32 = arith.constant 0 : i32
    %c0_i32_0 = arith.constant 0 : i32
    %c0_i32_1 = arith.constant 0 : i32
    return %c0_i32, %c0_i32_0 : i32, i32
  }
  func.func @transform_4(%arg0: i32) -> (i32, i32) {
    %c0_i32 = arith.constant 0 : i32
    %c0_i32_0 = arith.constant 0 : i32
    %c0_i32_1 = arith.constant 0 : i32
    return %c0_i32, %c0_i32_0 : i32, i32
  }
  func.func @transform_5(%arg0: i32) -> (i32, i32) {
    %c0_i32 = arith.constant 0 : i32
    %c0_i32_0 = arith.constant 0 : i32
    %c0_i32_1 = arith.constant 0 : i32
    return %c0_i32, %c0_i32_0 : i32, i32
  }
  func.func @transform_6(%arg0: i32) -> (i32, i32) {
    %c0_i32 = arith.constant 0 : i32
    %c0_i32_0 = arith.constant 0 : i32
    %c0_i32_1 = arith.constant 0 : i32
    return %c0_i32, %c0_i32_0 : i32, i32
  }
  func.func @transform_7(%arg0: i32) -> (i32, i32) {
    %c0_i32 = arith.constant 0 : i32
    %c0_i32_0 = arith.constant 0 : i32
    return %arg0, %c0_i32 : i32, i32
  }
}

</mosaic_0001>

<bundles_post_ra>
// kernel: simplenet_forward.1
= control target key start
LH: loop header
LB: loop body
LE: loop exit
PB: predicated region body
PF: predicated region fallthrough
CT: control target
= control target key end

     0   :  { %s3366_s24 = smov 0   ;;  %s5054_s0 = inlined_call_operand.vmem [shape: f32[64,768], index: 0, kind: input, shape index: {}]   ;;  %s5055_s1 = inlined_call_operand.vmem [shape: bf16[768,256], index: 1, kind: input, shape index: {}]   ;;  %s5056_s2 = inlined_call_operand.vmem [shape: f32[1,256], index: 2, kind: input, shape index: {}]   ;;  %s5057_s3 = inlined_call_operand.vmem [shape: bf16[256,256], index: 3, kind: input, shape index: {}]   ;;  %s5058_s4 = inlined_call_operand.vmem [shape: f32[1,256], index: 4, kind: input, shape index: {}]   ;;  %s5059_s5 = inlined_call_operand.vmem [shape: bf16[256,128], index: 5, kind: input, shape index: {}]   ;;  %s5060_s6 = inlined_call_operand.vmem [shape: f32[1,128], index: 6, kind: input, shape index: {}]   ;;  %s5061_s7 = inlined_call_operand.vmem [shape: f32[64,128], index: 7, kind: output, shape index: {}]  }
   0x1 LB: > { %s2829_s25 = sadd.s32 4294967295, %s3324_s24   ;;  %p2833_p0 = scmp.ge.s32.totalorder %s3324_s24, 1  ;;  %s3324_s24 = sphi %s3366_s24, %s17_s24  }
   0x2   : > { %p239_p1 = scmp.lt.s32.totalorder %s3324_s24, 3 }
   0x4   : > { %p240_p2 = pnand %p2833_p0, %p239_p1 }
   0x5   : > { %v3046_v0 = vld [vmem:[%s5055_s1 + $0x4] ss:$8 sps:$4 sm:$0xff] (!%p240_p2)   ;;  %v3048_v1 = vld [vmem:[%s5055_s1] ss:$8 sps:$4 sm:$0xff] (!%p240_p2)   ;;  %v3049_v2 = vld [vmem:[%s5055_s1 + $0x14] ss:$8 sps:$4 sm:$0xff] (!%p240_p2)  }
   0x6   : > { %243 = sbr.rel (%p240_p2) target bundleno = 5088 (0x13e0), region = 48  ;;  %929 = vmatprep.subr.bf16.mxu0 (!%p240_p2), %v3046_v0  ;;  %v3051_v3 = vld [vmem:[%s5055_s1 + $0x10] ss:$8 sps:$4 sm:$0xff] (!%p240_p2)   ;;  %s2834_s11 = sshll.u32 (!%p240_p2), %s2829_s25, 2  ;;  %v3052_v4 = vld [vmem:[%s5055_s1 + $0x24] ss:$8 sps:$4 sm:$0xff] (!%p240_p2)  }
   0x7   : > { %930 = vmatpush1.bf16.msra.mxu0 (!%p240_p2), %v3048_v1  ;;  %p273_p3 = scmp.lt.s32.totalorder (!%p240_p2), %s2834_s11, 7  ;;  %v3054_v5 = vld [vmem:[%s5055_s1 + $0x20] ss:$8 sps:$4 sm:$0xff] (!%p240_p2)   ;;  %v3055_v6 = vld [vmem:[%s5055_s1 + $0x34] ss:$8 sps:$4 sm:$0xff] (!%p240_p2)  }
   0x8   : > { %931 = vmatprep.subr.bf16.mxu0 (!%p240_p2), %v3049_v2  ;;  %v3057_v7 = vld [vmem:[%s5055_s1 + $0x30] ss:$8 sps:$4 sm:$0xff] (!%p240_p2)   ;;  %v3058_v8 = vld [vmem:[%s5055_s1 + $0x44] ss:$8 sps:$4 sm:$0xff] (!%p240_p2)   ;;  %v3060_v9 = vld [vmem:[%s5055_s1 + $0x40] ss:$8 sps:$4 sm:$0xff] (!%p240_p2)  }
   0x9   : > { %v3061_v10 = vld [vmem:[%s5055_s1 + $0x54] ss:$8 sps:$4 sm:$0xff] (!%p240_p2)   ;;  %v3063_v11 = vld [vmem:[%s5055_s1 + $0x50] ss:$8 sps:$4 sm:$0xff] (!%p240_p2)   ;;  %v3064_v12 = vld [vmem:[%s5055_s1 + $0x64] ss:$8 sps:$4 sm:$0xff] (!%p240_p2)  }
   0xa   : > { %v3066_v16 = vld [vmem:[%s5055_s1 + $0x60] ss:$8 sps:$4 sm:$0xff] (!%p240_p2)   ;;  %v3067_v17 = vld [vmem:[%s5055_s1 + $0x74] ss:$8 sps:$4 sm:$0xff] (!%p240_p2)   ;;  %v3069_v18 = vld [vmem:[%s5055_s1 + $0x70] ss:$8 sps:$4 sm:$0xff] (!%p240_p2)  }
   0xb   : > { %932 = vmatpush1.bf16.msra.mxu0 (!%p240_p2), %v3051_v3  ;;  %v3070_v19 = vld [vmem:[%s5055_s1 + $0x84] ss:$8 sps:$4 sm:$0xff] (!%p240_p2)   ;;  %v3072_v20 = vld [vmem:[%s5055_s1 + $0x80] ss:$8 sps:$4 sm:$0xff] (!%p240_p2)   ;;  %v3073_v21 = vld [vmem:[%s5055_s1 + $0x94] ss:$8 sps:$4 sm:$0xff] (!%p240_p2)  }
   0xc   : > { %933 = vmatprep.subr.bf16.mxu0 (!%p240_p2), %v3052_v4  ;;  %v3075_v22 = vld [vmem:[%s5055_s1 + $0x90] ss:$8 sps:$4 sm:$0xff] (!%p240_p2)   ;;  %v3076_v23 = vld [vmem:[%s5055_s1 + $0xa4] ss:$8 sps:$4 sm:$0xff] (!%p240_p2)   ;;  %v3078_v24 = vld [vmem:[%s5055_s1 + $0xa0] ss:$8 sps:$4 sm:$0xff] (!%p240_p2)  }
   0xd   : > { %s5063_s11 = smov (!%p273_p3, %s2834_s11), 7  ;;  %v3079_v25 = vld [vmem:[%s5055_s1 + $0xb4] ss:$8 sps:$4 sm:$0xff]   ;;  %v3081_v26 = vld [vmem:[%s5055_s1 + $0xb0] ss:$8 sps:$4 sm:$0xff]  }
   0xe   : > { %s3037_s22 = smul.u32 48, %s5063_s11  ;;  %v3082_v27 = vld [vmem:[%s5055_s1 + $0xc4] ss:$8 sps:$4 sm:$0xff]   ;;  %v3084_v28 = vld [vmem:[%s5055_s1 + $0xc0] ss:$8 sps:$4 sm:$0xff]   ;;  %s2837_s18 = sshll.u32 %s5063_s11, 3 }
   0xf   : > { %934 = vmatpush1.bf16.msra.mxu0 %v3054_v5  ;;  %v3085_v29 = vld [vmem:[%s5055_s1 + $0xd4] ss:$8 sps:$4 sm:$0xff]   ;;  %v3087_v30 = vld [vmem:[%s5055_s1 + $0xd0] ss:$8 sps:$4 sm:$0xff]   ;;  %v3088_v31 = vld [vmem:[%s5055_s1 + $0xe4] ss:$8 sps:$4 sm:$0xff]   ;;  %s283_s23 = scalar_lea.vmem %s5061_s7, %s2837_s18 }
  0x10   : > { %935 = vmatprep.subr.bf16.mxu0 %v3055_v6  ;;  %s3413_s30 = scalar_lea.vmem %s5054_s0, %s3037_s22  ;;  %v3090_v32 = vld [vmem:[%s5055_s1 + $0xe0] ss:$8 sps:$4 sm:$0xff]   ;;  %v3091_v33 = vld [vmem:[%s5055_s1 + $0xf4] ss:$8 sps:$4 sm:$0xff]   ;;  %v3093_v34 = vld [vmem:[%s5055_s1 + $0xf0] ss:$8 sps:$4 sm:$0xff]  }
  0x11   : > { %v318_v13 = vld [vmem:[%s3413_s30 + $0x8] sm:$0xff]  ;;  %v324_v14 = vld [vmem:[%s3413_s30 + $0x38] sm:$0xff]  ;;  %v317_v36 = vld [vmem:[%s3413_s30] sm:$0xff] }
  0x12   : > { %v342_v15 = vpack.c.bf16 %v324_v14, %v318_v13  ;;  %v3096_v35 = vld [vmem:[%s5055_s1 + $0x104] ss:$8 sps:$4 sm:$0xff]   ;;  %v323_v37 = vld [vmem:[%s3413_s30 + $0x30] sm:$0xff]  ;;  %v336_v39 = vld [vmem:[%s3413_s30 + $0x98] sm:$0xff] }
  0x13   : > { %936 = vmatpush1.bf16.msra.mxu0 %v3057_v7  ;;  %v330_v38 = vld [vmem:[%s3413_s30 + $0x68] sm:$0xff]  ;;  %v341_v40 = vpack.c.bf16 %v323_v37, %v317_v36  ;;  %v3099_v43 = vld [vmem:[%s5055_s1 + $0x114] ss:$8 sps:$4 sm:$0xff]   ;;  %v3097_v44 = vld [vmem:[%s5055_s1 + $0x110] ss:$8 sps:$4 sm:$0xff]  }
  0x14   : > { %937 = vmatprep.subr.bf16.mxu0 %v3058_v8  ;;  %961 = vmatprep.mubr.bf16.mxu0 %v342_v15  ;;  %v3094_v41 = vld [vmem:[%s5055_s1 + $0x100] ss:$8 sps:$4 sm:$0xff]   ;;  %v348_v42 = vpack.c.bf16 %v336_v39, %v330_v38  ;;  %v3102_v45 = vld [vmem:[%s5055_s1 + $0x124] ss:$8 sps:$4 sm:$0xff]   ;;  %v335_v47 = vld [vmem:[%s3413_s30 + $0x90] sm:$0xff] }
  0x15   : > { %v329_v46 = vld [vmem:[%s3413_s30 + $0x60] sm:$0xff]  ;;  %v320_v48 = vld [vmem:[%s3413_s30 + $0x18] sm:$0xff]  ;;  %v326_v49 = vld [vmem:[%s3413_s30 + $0x48] sm:$0xff] }
  0x16   : > { %v347_v50 = vpack.c.bf16 %v335_v47, %v329_v46  ;;  %v3100_v51 = vld [vmem:[%s5055_s1 + $0x120] ss:$8 sps:$4 sm:$0xff]   ;;  %v3105_v52 = vld [vmem:[%s5055_s1 + $0x134] ss:$8 sps:$4 sm:$0xff]   ;;  %v344_v53 = vpack.c.bf16 %v326_v49, %v320_v48  ;;  %v3512_v54 = vld [vmem:[%s5057_s3 + $0x4] ss:$8 sps:$4 sm:$0xff]  }
  0x17   : > { %938 = vmatpush1.bf16.msra.mxu0 %v3060_v9  ;;  %v3517_v55 = vld [vmem:[%s5057_s3] ss:$8 sps:$4 sm:$0xff]   ;;  %v3522_v56 = vld [vmem:[%s5057_s3 + $0x14] ss:$8 sps:$4 sm:$0xff]   ;;  %v3103_v57 = vld [vmem:[%s5055_s1 + $0x130] ss:$8 sps:$4 sm:$0xff]   ;;  %1292 = vmatprep.subr.bf16.mxu1 %v3512_v54 }
  0x18   : > { %939 = vmatprep.subr.bf16.mxu0 %v3061_v10  ;;  %v3108_v58 = vld [vmem:[%s5055_s1 + $0x144] ss:$8 sps:$4 sm:$0xff]   ;;  %1293 = vmatpush1.bf16.msra.mxu1 %v3517_v55  ;;  %v3535_v59 = vld [vmem:[%s5057_s3 + $0x10] ss:$8 sps:$4 sm:$0xff]   ;;  %v3106_v61 = vld [vmem:[%s5055_s1 + $0x140] ss:$8 sps:$4 sm:$0xff]  }
  0x19   : > { %1294 = vmatprep.subr.bf16.mxu1 %v3522_v56  ;;  %v3541_v60 = vld [vmem:[%s5057_s3 + $0x24] ss:$8 sps:$4 sm:$0xff]   ;;  %v3111_v62 = vld [vmem:[%s5055_s1 + $0x154] ss:$8 sps:$4 sm:$0xff]   ;;  %v3553_v63 = vld [vmem:[%s5057_s3 + $0x20] ss:$8 sps:$4 sm:$0xff]  }
  0x1a   : > { %v3559_v0 = vld [vmem:[%s5057_s3 + $0x34] ss:$8 sps:$4 sm:$0xff]   ;;  %v3109_v1 = vld [vmem:[%s5055_s1 + $0x150] ss:$8 sps:$4 sm:$0xff]   ;;  %v3114_v2 = vld [vmem:[%s5055_s1 + $0x164] ss:$8 sps:$4 sm:$0xff]  }
  0x1b   : > { %940 = vmatpush1.bf16.msra.mxu0 %v3063_v11  ;;  %v3571_v3 = vld [vmem:[%s5057_s3 + $0x30] ss:$8 sps:$4 sm:$0xff]   ;;  %v3577_v4 = vld [vmem:[%s5057_s3 + $0x44] ss:$8 sps:$4 sm:$0xff]   ;;  %v3112_v5 = vld [vmem:[%s5055_s1 + $0x160] ss:$8 sps:$4 sm:$0xff]  }
  0x1c   : > { %941 = vmatprep.subr.bf16.mxu0 %v3064_v12  ;;  %1295 = vmatpush1.bf16.msra.mxu1 %v3535_v59  ;;  %v3117_v6 = vld [vmem:[%s5055_s1 + $0x174] ss:$8 sps:$4 sm:$0xff]   ;;  %v3589_v7 = vld [vmem:[%s5057_s3 + $0x40] ss:$8 sps:$4 sm:$0xff]   ;;  %v3115_v8 = vld [vmem:[%s5055_s1 + $0x170] ss:$8 sps:$4 sm:$0xff]  }
  0x1d   : > { %1296 = vmatprep.subr.bf16.mxu1 %v3541_v60  ;;  %v3120_v9 = vld [vmem:[%s5055_s1 + $0x184] ss:$8 sps:$4 sm:$0xff]   ;;  %v3601_v10 = vld [vmem:[%s5057_s3 + $0x54] ss:$8 sps:$4 sm:$0xff]   ;;  %v3606_v11 = vld [vmem:[%s5057_s3 + $0x50] ss:$8 sps:$4 sm:$0xff]  }
  0x1e   : > { %v3611_v12 = vld [vmem:[%s5057_s3 + $0x64] ss:$8 sps:$4 sm:$0xff]   ;;  %v3118_v13 = vld [vmem:[%s5055_s1 + $0x180] ss:$8 sps:$4 sm:$0xff]   ;;  %v3123_v14 = vld [vmem:[%s5055_s1 + $0x194] ss:$8 sps:$4 sm:$0xff]  }
  0x1f   : > { %942 = vmatpush1.bf16.msra.mxu0 %v3066_v16  ;;  %v3624_v15 = vld [vmem:[%s5057_s3 + $0x60] ss:$8 sps:$4 sm:$0xff]   ;;  %v3629_v16 = vld [vmem:[%s5057_s3 + $0x74] ss:$8 sps:$4 sm:$0xff]   ;;  %v3721_v36 = vld [vmem:[%s5057_s3 + $0xc4] ss:$8 sps:$4 sm:$0xff]  }
  0x20   : > { %943 = vmatprep.subr.bf16.mxu0 %v3067_v17  ;;  %1297 = vmatpush1.bf16.msra.mxu1 %v3553_v63  ;;  %v3121_v17 = vld [vmem:[%s5055_s1 + $0x190] ss:$8 sps:$4 sm:$0xff]   ;;  %v3136_v37 = vld [vmem:[%s5055_s1 + $0x1e0] ss:$8 sps:$4 sm:$0xff]   ;;  %v3141_v38 = vld [vmem:[%s5055_s1 + $0x1f4] ss:$8 sps:$4 sm:$0xff]  }
  0x21   : > { %1298 = vmatprep.subr.bf16.mxu1 %v3559_v0  ;;  %v3733_v39 = vld [vmem:[%s5057_s3 + $0xc0] ss:$8 sps:$4 sm:$0xff]  }
  0x22   : > { %v338_v46 = vld [vmem:[%s3413_s30 + $0xa8] sm:$0xff] }
  0x23   : > { %944 = vmatpush1.bf16.msra.mxu0 %v3069_v18  ;;  %v3126_v18 = vld [vmem:[%s5055_s1 + $0x1a4] ss:$8 sps:$4 sm:$0xff]   ;;  %v3142_v48 = vld [vmem:[%s5055_s1 + $0x200] ss:$8 sps:$4 sm:$0xff]  }
  0x24   : > { %945 = vmatprep.subr.bf16.mxu0 %v3070_v19  ;;  %1299 = vmatpush1.bf16.msra.mxu1 %v3571_v3  ;;  %v3642_v19 = vld [vmem:[%s5057_s3 + $0x70] ss:$8 sps:$4 sm:$0xff]  }
  0x25   : > { %1300 = vmatprep.subr.bf16.mxu1 %v3577_v4 }
  0x27   : > { %946 = vmatpush1.bf16.msra.mxu0 %v3072_v20  ;;  %v3647_v20 = vld [vmem:[%s5057_s3 + $0x84] ss:$8 sps:$4 sm:$0xff]  }
  0x28   : > { %947 = vmatprep.subr.bf16.mxu0 %v3073_v21  ;;  %1301 = vmatpush1.bf16.msra.mxu1 %v3589_v7  ;;  %v3124_v21 = vld [vmem:[%s5055_s1 + $0x1a0] ss:$8 sps:$4 sm:$0xff]  }
  0x29   : > { %1302 = vmatprep.subr.bf16.mxu1 %v3601_v10 }
  0x2b   : > { %948 = vmatpush1.bf16.msra.mxu0 %v3075_v22  ;;  %v3129_v22 = vld [vmem:[%s5055_s1 + $0x1b4] ss:$8 sps:$4 sm:$0xff]  }
  0x2c   : > { %949 = vmatprep.subr.bf16.mxu0 %v3076_v23  ;;  %1303 = vmatpush1.bf16.msra.mxu1 %v3606_v11  ;;  %v3661_v23 = vld [vmem:[%s5057_s3 + $0x80] ss:$8 sps:$4 sm:$0xff]  }
  0x2d   : > { %1304 = vmatprep.subr.bf16.mxu1 %v3611_v12 }
  0x2f   : > { %950 = vmatpush1.bf16.msra.mxu0 %v3078_v24  ;;  %v3667_v24 = vld [vmem:[%s5057_s3 + $0x94] ss:$8 sps:$4 sm:$0xff]  }
  0x30   : > { %951 = vmatprep.subr.bf16.mxu0 %v3079_v25  ;;  %1305 = vmatpush1.bf16.msra.mxu1 %v3624_v15  ;;  %v3127_v25 = vld [vmem:[%s5055_s1 + $0x1b0] ss:$8 sps:$4 sm:$0xff]  }
  0x31   : > { %1306 = vmatprep.subr.bf16.mxu1 %v3629_v16 }
  0x33   : > { %952 = vmatpush1.bf16.msra.mxu0 %v3081_v26  ;;  %v3132_v26 = vld [vmem:[%s5055_s1 + $0x1c4] ss:$8 sps:$4 sm:$0xff]  }
  0x34   : > { %953 = vmatprep.subr.bf16.mxu0 %v3082_v27  ;;  %1307 = vmatpush1.bf16.msra.mxu1 %v3642_v19  ;;  %v3679_v27 = vld [vmem:[%s5057_s3 + $0x90] ss:$8 sps:$4 sm:$0xff]  }
  0x35   : > { %1308 = vmatprep.subr.bf16.mxu1 %v3647_v20 }
  0x37   : > { %954 = vmatpush1.bf16.msra.mxu0 %v3084_v28  ;;  %v3685_v28 = vld [vmem:[%s5057_s3 + $0xa4] ss:$8 sps:$4 sm:$0xff]  }
  0x38   : > { %955 = vmatprep.subr.bf16.mxu0 %v3085_v29  ;;  %1309 = vmatpush1.bf16.msra.mxu1 %v3661_v23  ;;  %v3130_v29 = vld [vmem:[%s5055_s1 + $0x1c0] ss:$8 sps:$4 sm:$0xff]  }
  0x39   : > { %1310 = vmatprep.subr.bf16.mxu1 %v3667_v24 }
  0x3b   : > { %956 = vmatpush1.bf16.msra.mxu0 %v3087_v30  ;;  %v3135_v30 = vld [vmem:[%s5055_s1 + $0x1d4] ss:$8 sps:$4 sm:$0xff]  }
  0x3c   : > { %957 = vmatprep.subr.bf16.mxu0 %v3088_v31  ;;  %1311 = vmatpush1.bf16.msra.mxu1 %v3679_v27  ;;  %v3697_v31 = vld [vmem:[%s5057_s3 + $0xa0] ss:$8 sps:$4 sm:$0xff]  }
  0x3d   : > { %1312 = vmatprep.subr.bf16.mxu1 %v3685_v28 }
  0x3f   : > { %958 = vmatpush1.bf16.msra.mxu0 %v3090_v32  ;;  %v3703_v32 = vld [vmem:[%s5057_s3 + $0xb4] ss:$8 sps:$4 sm:$0xff]  }
  0x40   : > { %959 = vmatprep.subr.bf16.mxu0 %v3091_v33  ;;  %v3133_v33 = vld [vmem:[%s5055_s1 + $0x1d0] ss:$8 sps:$4 sm:$0xff]   ;;  %1313 = vmatpush1.bf16.msra.mxu1 %v3697_v31 }
  0x41   : > { %1314 = vmatprep.subr.bf16.mxu1 %v3703_v32 }
  0x43   : > { %960 = vmatpush1.bf16.msra.mxu0 %v3093_v34  ;;  %v3138_v34 = vld [vmem:[%s5055_s1 + $0x1e4] ss:$8 sps:$4 sm:$0xff]  }
  0x44   : > { %982 = vmatprep.subr.bf16.mxu0 %v3096_v35  ;;  %v3715_v35 = vld [vmem:[%s5057_s3 + $0xb0] ss:$8 sps:$4 sm:$0xff]  }
  0x45   : > { %1315 = vmatpush1.bf16.msra.mxu1 %v3715_v35 }
  0x46   : > { %962 = vmatmul.mubr.bf16.vlgmr.msra.gmra.mrb[0].mxu0 %v341_v40  ;;  %1316 = vmatprep.subr.bf16.mxu1 %v3721_v36  ;;  %v3739_v40 = vld [vmem:[%s5057_s3 + $0xd4] ss:$8 sps:$4 sm:$0xff]  }
  0x47   : > { %983 = vmatpush1.bf16.msra.mxu0 %v3094_v41  ;;  %971 = vmatprep.mubr.bf16.mxu0 %v348_v42  ;;  %v3139_v41 = vld [vmem:[%s5055_s1 + $0x1f0] ss:$8 sps:$4 sm:$0xff]  }
  0x48   : > { %984 = vmatprep.subr.bf16.mxu0 %v3099_v43  ;;  %v319_v42 = vld [vmem:[%s3413_s30 + $0x10] sm:$0xff]  ;;  %v325_v43 = vld [vmem:[%s3413_s30 + $0x40] sm:$0xff] }
  0x49   : > { %1317 = vmatpush1.bf16.msra.mxu1 %v3733_v39  ;;  %v343_v47 = vpack.c.bf16 %v325_v43, %v319_v42  ;;  %v3178_v42 = vld [vmem:[%s5055_s1 + $0x2c0] ss:$8 sps:$4 sm:$0xff]   ;;  %v3183_v43 = vld [vmem:[%s5055_s1 + $0x2d4] ss:$8 sps:$4 sm:$0xff]  }
  0x4a   : > { %1318 = vmatprep.subr.bf16.mxu1 %v3739_v40 }
  0x4b   : > { %985 = vmatpush1.bf16.msra.mxu0 %v3097_v44  ;;  %v3144_v44 = vld [vmem:[%s5055_s1 + $0x204] ss:$8 sps:$4 sm:$0xff]  }
  0x4c   : > { %986 = vmatprep.subr.bf16.mxu0 %v3102_v45  ;;  %v332_v45 = vld [vmem:[%s3413_s30 + $0x78] sm:$0xff] }
  0x4d   : > { %v350_v49 = vpack.c.bf16 %v338_v46, %v332_v45  ;;  %v3186_v45 = vld [vmem:[%s5055_s1 + $0x2e4] ss:$8 sps:$4 sm:$0xff]   ;;  %v3184_v46 = vld [vmem:[%s5055_s1 + $0x2e0] ss:$8 sps:$4 sm:$0xff]  }
  0x4e   : > { %972 = vmatmul.mubr.bf16.gmra.mrb[4].mxu0 %v347_v50  ;;  %v3147_v50 = vld [vmem:[%s5055_s1 + $0x214] ss:$8 sps:$4 sm:$0xff]  }
  0x4f   : > { %987 = vmatpush1.bf16.msra.mxu0 %v3100_v51  ;;  %1014 = vmatprep.mubr.bf16.mxu0 %v344_v53  ;;  %v3145_v51 = vld [vmem:[%s5055_s1 + $0x210] ss:$8 sps:$4 sm:$0xff]   ;;  %v337_v53 = vld [vmem:[%s3413_s30 + $0xa0] sm:$0xff] }
  0x50   : > { %988 = vmatprep.subr.bf16.mxu0 %v3105_v52  ;;  %v331_v52 = vld [vmem:[%s3413_s30 + $0x70] sm:$0xff] }
  0x53   : > { %989 = vmatpush1.bf16.msra.mxu0 %v3103_v57  ;;  %v3150_v57 = vld [vmem:[%s5055_s1 + $0x224] ss:$8 sps:$4 sm:$0xff]  }
  0x54   : > { %990 = vmatprep.subr.bf16.mxu0 %v3108_v58  ;;  %v322_v58 = vld [vmem:[%s3413_s30 + $0x28] sm:$0xff] }
  0x57   : > { %991 = vmatpush1.bf16.msra.mxu0 %v3106_v61  ;;  %v328_v61 = vld [vmem:[%s3413_s30 + $0x58] sm:$0xff] }
  0x58   : > { %992 = vmatprep.subr.bf16.mxu0 %v3111_v62  ;;  %v349_v62 = vpack.c.bf16 %v337_v53, %v331_v52  ;;  %v340_v52 = vld [vmem:[%s3413_s30 + $0xb8] sm:$0xff] }
  0x5b   : > { %993 = vmatpush1.bf16.msra.mxu0 %v3109_v1  ;;  %v3148_v1 = vld [vmem:[%s5055_s1 + $0x220] ss:$8 sps:$4 sm:$0xff]  }
  0x5c   : > { %994 = vmatprep.subr.bf16.mxu0 %v3114_v2  ;;  %v346_v2 = vpack.c.bf16 %v328_v61, %v322_v58  ;;  %v333_v58 = vld [vmem:[%s3413_s30 + $0x80] sm:$0xff]  ;;  %v339_v61 = vld [vmem:[%s3413_s30 + $0xb0] sm:$0xff] }
  0x5f   : > { %995 = vmatpush1.bf16.msra.mxu0 %v3112_v5  ;;  %v3153_v5 = vld [vmem:[%s5055_s1 + $0x234] ss:$8 sps:$4 sm:$0xff]  }
  0x60   : > { %996 = vmatprep.subr.bf16.mxu0 %v3117_v6  ;;  %v3151_v6 = vld [vmem:[%s5055_s1 + $0x230] ss:$8 sps:$4 sm:$0xff]  }
  0x63   : > { %997 = vmatpush1.bf16.msra.mxu0 %v3115_v8  ;;  %v3156_v8 = vld [vmem:[%s5055_s1 + $0x244] ss:$8 sps:$4 sm:$0xff]  }
  0x64   : > { %998 = vmatprep.subr.bf16.mxu0 %v3120_v9  ;;  %v3154_v9 = vld [vmem:[%s5055_s1 + $0x240] ss:$8 sps:$4 sm:$0xff]  }
  0x67   : > { %999 = vmatpush1.bf16.msra.mxu0 %v3118_v13  ;;  %v3159_v13 = vld [vmem:[%s5055_s1 + $0x254] ss:$8 sps:$4 sm:$0xff]  }
  0x68   : > { %1000 = vmatprep.subr.bf16.mxu0 %v3123_v14  ;;  %v3157_v14 = vld [vmem:[%s5055_s1 + $0x250] ss:$8 sps:$4 sm:$0xff]  }
  0x6b   : > { %1001 = vmatpush1.bf16.msra.mxu0 %v3121_v17  ;;  %v3162_v17 = vld [vmem:[%s5055_s1 + $0x264] ss:$8 sps:$4 sm:$0xff]  }
  0x6c   : > { %1002 = vmatprep.subr.bf16.mxu0 %v3126_v18  ;;  %v3160_v18 = vld [vmem:[%s5055_s1 + $0x260] ss:$8 sps:$4 sm:$0xff]  }
  0x6f   : > { %1003 = vmatpush1.bf16.msra.mxu0 %v3124_v21  ;;  %v3165_v21 = vld [vmem:[%s5055_s1 + $0x274] ss:$8 sps:$4 sm:$0xff]  }
  0x70   : > { %1004 = vmatprep.subr.bf16.mxu0 %v3129_v22  ;;  %v3163_v22 = vld [vmem:[%s5055_s1 + $0x270] ss:$8 sps:$4 sm:$0xff]  }
  0x73   : > { %1005 = vmatpush1.bf16.msra.mxu0 %v3127_v25  ;;  %v3168_v25 = vld [vmem:[%s5055_s1 + $0x284] ss:$8 sps:$4 sm:$0xff]  }
  0x74   : > { %1006 = vmatprep.subr.bf16.mxu0 %v3132_v26  ;;  %v3166_v26 = vld [vmem:[%s5055_s1 + $0x280] ss:$8 sps:$4 sm:$0xff]  }
  0x77   : > { %1007 = vmatpush1.bf16.msra.mxu0 %v3130_v29  ;;  %v3171_v29 = vld [vmem:[%s5055_s1 + $0x294] ss:$8 sps:$4 sm:$0xff]  }
  0x78   : > { %1008 = vmatprep.subr.bf16.mxu0 %v3135_v30  ;;  %v3169_v30 = vld [vmem:[%s5055_s1 + $0x290] ss:$8 sps:$4 sm:$0xff]  }
  0x7b   : > { %1009 = vmatpush1.bf16.msra.mxu0 %v3133_v33  ;;  %v3174_v33 = vld [vmem:[%s5055_s1 + $0x2a4] ss:$8 sps:$4 sm:$0xff]  }
  0x7c   : > { %1010 = vmatprep.subr.bf16.mxu0 %v3138_v34  ;;  %v3172_v34 = vld [vmem:[%s5055_s1 + $0x2a0] ss:$8 sps:$4 sm:$0xff]  }
  0x7f   : > { %1011 = vmatpush1.bf16.msra.mxu0 %v3136_v37  ;;  %v3177_v37 = vld [vmem:[%s5055_s1 + $0x2b4] ss:$8 sps:$4 sm:$0xff]  }
  0x80   : > { %1012 = vmatprep.subr.bf16.mxu0 %v3141_v38  ;;  %v3175_v38 = vld [vmem:[%s5055_s1 + $0x2b0] ss:$8 sps:$4 sm:$0xff]  }
  0x83   : > { %1013 = vmatpush1.bf16.msra.mxu0 %v3139_v41  ;;  %v3180_v41 = vld [vmem:[%s5055_s1 + $0x2c4] ss:$8 sps:$4 sm:$0xff]  }
  0x84   : > { %1035 = vmatprep.subr.bf16.mxu0 %v3144_v44  ;;  %v3181_v44 = vld [vmem:[%s5055_s1 + $0x2d0] ss:$8 sps:$4 sm:$0xff]  }
  0x86   : > { %1015 = vmatmul.mubr.bf16.vlgmr.msra.gmra.mrb[0].mxu0 %v343_v47  ;;  %v3189_v47 = vld [vmem:[%s5055_s1 + $0x2f4] ss:$8 sps:$4 sm:$0xff]  }
  0x87   : > { %1036 = vmatpush1.bf16.msra.mxu0 %v3142_v48  ;;  %1024 = vmatprep.mubr.bf16.mxu0 %v350_v49  ;;  %v3187_v48 = vld [vmem:[%s5055_s1 + $0x2f0] ss:$8 sps:$4 sm:$0xff]   ;;  %v321_v49 = vld [vmem:[%s3413_s30 + $0x20] sm:$0xff] }
  0x88   : > { %1037 = vmatprep.subr.bf16.mxu0 %v3147_v50  ;;  %v327_v50 = vld [vmem:[%s3413_s30 + $0x50] sm:$0xff] }
  0x89   : > { %v345_v53 = vpack.c.bf16 %v327_v50, %v321_v49 }
  0x8b   : > { %1038 = vmatpush1.bf16.msra.mxu0 %v3145_v51  ;;  %v334_v51 = vld [vmem:[%s3413_s30 + $0x88] sm:$0xff] }
  0x8c   : > { %1039 = vmatprep.subr.bf16.mxu0 %v3150_v57  ;;  %v352_v57 = vpack.c.bf16 %v340_v52, %v334_v51 }
  0x8e   : > { %1025 = vmatmul.mubr.bf16.gmra.mrb[4].mxu0 %v349_v62  ;;  %v351_v62 = vpack.c.bf16 %v339_v61, %v333_v58 }
  0x8f   : > { %1040 = vmatpush1.bf16.msra.mxu0 %v3148_v1  ;;  %1067 = vmatprep.mubr.bf16.mxu0 %v346_v2  ;;  %v3886_v1 = vld [vmem:[%s5057_s3 + $0xd0] ss:$8 sps:$4 sm:$0xff]   ;;  %v3893_v2 = vld [vmem:[%s5057_s3 + $0xe4] ss:$8 sps:$4 sm:$0xff]  }
  0x90   : > { %1041 = vmatprep.subr.bf16.mxu0 %v3153_v5  ;;  %1319 = vmatpush1.bf16.msra.mxu1 %v3886_v1  ;;  %v3898_v5 = vld [vmem:[%s5057_s3 + $0xe0] ss:$8 sps:$4 sm:$0xff]  }
  0x91   : > { %1320 = vmatprep.subr.bf16.mxu1 %v3893_v2 }
  0x93   : > { %1042 = vmatpush1.bf16.msra.mxu0 %v3151_v6  ;;  %v3907_v6 = vld [vmem:[%s5057_s3 + $0xf4] ss:$8 sps:$4 sm:$0xff]  }
  0x94   : > { %1043 = vmatprep.subr.bf16.mxu0 %v3156_v8  ;;  %1321 = vmatpush1.bf16.msra.mxu1 %v3898_v5  ;;  %v3912_v8 = vld [vmem:[%s5057_s3 + $0xf0] ss:$8 sps:$4 sm:$0xff]  }
  0x95   : > { %1322 = vmatprep.subr.bf16.mxu1 %v3907_v6 }
  0x97   : > { %1044 = vmatpush1.bf16.msra.mxu0 %v3154_v9  ;;  %v288_v9 = vlaneseq }
  0x98   : > { %1045 = vmatprep.subr.bf16.mxu0 %v3159_v13  ;;  %1323 = vmatpush1.bf16.msra.mxu1 %v3912_v8 }
  0x99   : > { %1357 = vmatprep.subr.bf16.mxu1 %v3512_v54  ;;  %v3920_v13 = vshrl.u32 %v288_v9, 7 }
  0x9b   : > { %1046 = vmatpush1.bf16.msra.mxu0 %v3157_v14  ;;  %v290_v14 = vsub.s32 0, %v3920_v13 }
  0x9c   : > { %1047 = vmatprep.subr.bf16.mxu0 %v3162_v17  ;;  %v286_v17 = vld [vmem:[%s5056_s2] sm:$0x3] }
  0x9f   : > { %1048 = vmatpush1.bf16.msra.mxu0 %v3160_v18  ;;  %v294_v18 = vsub.s32 1, %v3920_v13 }
  0xa0   : > { %1049 = vmatprep.subr.bf16.mxu0 %v3165_v21  ;;  %v291_v21 = vrot.slane %v286_v17, %v290_v14 }
  0xa3   : > { %1050 = vmatpush1.bf16.msra.mxu0 %v3163_v22  ;;  %v295_v22 = vrot.slane %v286_v17, %v294_v18 }
  0xa4   : > { %1051 = vmatprep.subr.bf16.mxu0 %v3168_v25 }
  0xa7   : > { %1052 = vmatpush1.bf16.msra.mxu0 %v3166_v26 }
  0xa8   : > { %1053 = vmatprep.subr.bf16.mxu0 %v3171_v29 }
  0xab   : > { %1054 = vmatpush1.bf16.msra.mxu0 %v3169_v30 }
  0xac   : > { %1055 = vmatprep.subr.bf16.mxu0 %v3174_v33 }
  0xaf   : > { %1056 = vmatpush1.bf16.msra.mxu0 %v3172_v34 }
  0xb0   : > { %1057 = vmatprep.subr.bf16.mxu0 %v3177_v37 }
  0xb3   : > { %1058 = vmatpush1.bf16.msra.mxu0 %v3175_v38 }
  0xb4   : > { %1059 = vmatprep.subr.bf16.mxu0 %v3180_v41 }
  0xb7   : > { %1060 = vmatpush1.bf16.msra.mxu0 %v3178_v42 }
  0xb8   : > { %1061 = vmatprep.subr.bf16.mxu0 %v3183_v43 }
  0xbb   : > { %1062 = vmatpush1.bf16.msra.mxu0 %v3181_v44 }
  0xbc   : > { %1063 = vmatprep.subr.bf16.mxu0 %v3186_v45 }
  0xbf   : > { %1064 = vmatpush1.bf16.msra.mxu0 %v3184_v46 }
  0xc0   : > { %1065 = vmatprep.subr.bf16.mxu0 %v3189_v47 }
  0xc3   : > { %1066 = vmatpush1.bf16.msra.mxu0 %v3187_v48 }
  0xc4   : > { %1487 = vmatprep.subr.bf16.mxu0 %v3512_v54 }
  0xc6   : > { %1068 = vmatmul.mubr.bf16.vlgmr.msra.gmra.mrb[0].mxu0 %v345_v53 }
  0xc7   : > { %1077 = vmatprep.mubr.bf16.mxu0 %v352_v57  ;;  %1488 = vmatpush1.bf16.msra.mxu0 %v3517_v55 }
  0xc8   : > { %1489 = vmatprep.subr.bf16.mxu0 %v3522_v56 }
  0xcb   : > { %1490 = vmatpush1.bf16.msra.mxu0 %v3535_v59 }
  0xcc   : > { %1491 = vmatprep.subr.bf16.mxu0 %v3541_v60 }
  0xce   : > { %1078 = vmatmul.mubr.bf16.gmra.mrb[4].mxu0 %v351_v62 }
  0xcf   : > { %1492 = vmatpush1.bf16.msra.mxu0 %v3553_v63 }
  0xd0   : > { %1493 = vmatprep.subr.bf16.mxu0 %v3559_v0 }
  0xd3   : > { %1494 = vmatpush1.bf16.msra.mxu0 %v3571_v3 }
  0xd4   : > { %1495 = vmatprep.subr.bf16.mxu0 %v3577_v4 }
  0xd7   : > { %1496 = vmatpush1.bf16.msra.mxu0 %v3589_v7 }
  0xd8   : > { %1497 = vmatprep.subr.bf16.mxu0 %v3601_v10 }
  0xdb   : > { %1498 = vmatpush1.bf16.msra.mxu0 %v3606_v11 }
  0xdc   : > { %1499 = vmatprep.subr.bf16.mxu0 %v3611_v12 }
  0xdf   : > { %1500 = vmatpush1.bf16.msra.mxu0 %v3624_v15 }
  0xe0   : > { %1501 = vmatprep.subr.bf16.mxu0 %v3629_v16 }
  0xe3   : > { %1502 = vmatpush1.bf16.msra.mxu0 %v3642_v19 }
  0xe4   : > { %1503 = vmatprep.subr.bf16.mxu0 %v3647_v20 }
  0xe7   : > { %1504 = vmatpush1.bf16.msra.mxu0 %v3661_v23 }
  0xe8   : > { %1505 = vmatprep.subr.bf16.mxu0 %v3667_v24 }
  0xeb   : > { %1506 = vmatpush1.bf16.msra.mxu0 %v3679_v27 }
  0xec   : > { %1507 = vmatprep.subr.bf16.mxu0 %v3685_v28 }
  0xef   : > { %1508 = vmatpush1.bf16.msra.mxu0 %v3697_v31 }
  0xf0   : > { %1509 = vmatprep.subr.bf16.mxu0 %v3703_v32 }
  0xf3   : > { %1510 = vmatpush1.bf16.msra.mxu0 %v3715_v35 }
  0xf4   : > { %1511 = vmatprep.subr.bf16.mxu0 %v3721_v36 }
  0xf7   : > { %1512 = vmatpush1.bf16.msra.mxu0 %v3733_v39 }
  0xf8   : > { %1513 = vmatprep.subr.bf16.mxu0 %v3739_v40 }
  0xfb   : > { %1514 = vmatpush1.bf16.msra.mxu0 %v3886_v1 }
  0xfc   : > { %1515 = vmatprep.subr.bf16.mxu0 %v3893_v2 }
  0xff   : > { %1516 = vmatpush1.bf16.msra.mxu0 %v3898_v5 }
 0x100   : > { %1517 = vmatprep.subr.bf16.mxu0 %v3907_v6 }
 0x103   : > { %1518 = vmatpush1.bf16.msra.mxu0 %v3912_v8 }
 0x104   : > { %1617 = vmatprep.subr.bf16.mxu0 %v3512_v54 }
 0x199   : > { %v1069_v25 = vpop.f32.mrb[0].mxu0 }
 0x19a   : > { %v3013_v26 = vadd.f32 %v1069_v25, %v291_v21  ;;  %v1071_v29 = vpop.f32.mrb[1].mxu0 }
 0x19b   : > { %v3014_v30 = vadd.f32 %v1071_v29, %v295_v22  ;;  %v1073_v33 = vpop.f32.mrb[2].mxu0 }
 0x19c   : > { %v3015_v34 = vadd.f32 %v1073_v33, %v291_v21  ;;  %v1075_v37 = vpop.f32.mrb[3].mxu0  ;;  %v1088_v41 = vmax.f32 %v3013_v26, 0.0 }
 0x19d   : > { %v3016_v38 = vadd.f32 %v1075_v37, %v295_v22  ;;  %v1089_v43 = vmax.f32 %v3014_v30, 0.0 }
 0x19e   : > { %v1090_v42 = vmax.f32 %v3015_v34, 0.0 }
 0x19f   : > { %v1091_v44 = vmax.f32 %v3016_v38, 0.0 }
 0x1a0   : > { %v1096_v45 = vpack.c.bf16 %v1090_v42, %v1088_v41 }
 0x1a1   : > { %v1079_v46 = vpop.f32.mrb[4].mxu0  ;;  %v1097_v47 = vpack.c.bf16 %v1091_v44, %v1089_v43 }
 0x1a2   : > { %v3017_v48 = vadd.f32 %v1079_v46, %v291_v21  ;;  %v1081_v49 = vpop.f32.mrb[5].mxu0 }
 0x1a3   : > { %v3018_v50 = vadd.f32 %v1081_v49, %v295_v22  ;;  %v1083_v51 = vpop.f32.mrb[6].mxu0  ;;  %1324 = vmatprep.mubr.bf16.mxu1 %v1097_v47 }
 0x1a4   : > { %v3019_v52 = vadd.f32 %v1083_v51, %v291_v21  ;;  %v1085_v53 = vpop.f32.mrb[7].mxu0  ;;  %1325 = vmatmul.mubr.bf16.vlgmr.msra.gmra.mrb[0].mxu1 %v1096_v45  ;;  %v1092_v58 = vmax.f32 %v3017_v48, 0.0  ;;  %v298_v21 = vld [vmem:[%s5058_s4] sm:$0x3] }
 0x1a5   : > { %v3020_v57 = vadd.f32 %v1085_v53, %v295_v22  ;;  %1358 = vmatpush1.bf16.msra.mxu1 %v3517_v55  ;;  %v1093_v62 = vmax.f32 %v3018_v50, 0.0  ;;  %v3968_v22 = vrot.slane %v298_v21, %v290_v14  ;;  %v3972_v26 = vrot.slane %v298_v21, %v294_v18 }
 0x1a6   : > { %v1094_v61 = vmax.f32 %v3019_v52, 0.0  ;;  %1359 = vmatprep.subr.bf16.mxu1 %v3522_v56 }
 0x1a7   : > { %v1095_v9 = vmax.f32 %v3020_v57, 0.0 }
 0x1a8   : > { %v1098_v17 = vpack.c.bf16 %v1094_v61, %v1092_v58 }
 0x1a9   : > { %v1099_v25 = vpack.c.bf16 %v1095_v9, %v1093_v62  ;;  %1360 = vmatpush1.bf16.msra.mxu1 %v3535_v59 }
 0x1aa   : > { %1361 = vmatprep.subr.bf16.mxu1 %v3541_v60 }
 0x1ab   : > { %1334 = vmatprep.mubr.bf16.mxu1 %v1099_v25 }
 0x1ac   : > { %1335 = vmatmul.mubr.bf16.gmra.mrb[4].mxu1 %v1098_v17 }
 0x1ad   : > { %1362 = vmatpush1.bf16.msra.mxu1 %v3553_v63 }
 0x1ae   : > { %1363 = vmatprep.subr.bf16.mxu1 %v3559_v0 }
 0x1b1   : > { %1364 = vmatpush1.bf16.msra.mxu1 %v3571_v3 }
 0x1b2   : > { %1365 = vmatprep.subr.bf16.mxu1 %v3577_v4 }
 0x1b5   : > { %1366 = vmatpush1.bf16.msra.mxu1 %v3589_v7 }
 0x1b6   : > { %1367 = vmatprep.subr.bf16.mxu1 %v3601_v10 }
 0x1b9   : > { %1368 = vmatpush1.bf16.msra.mxu1 %v3606_v11 }
 0x1ba   : > { %1369 = vmatprep.subr.bf16.mxu1 %v3611_v12 }
 0x1bd   : > { %1370 = vmatpush1.bf16.msra.mxu1 %v3624_v15 }
 0x1be   : > { %1371 = vmatprep.subr.bf16.mxu1 %v3629_v16 }
 0x1c1   : > { %1372 = vmatpush1.bf16.msra.mxu1 %v3642_v19 }
 0x1c2   : > { %1373 = vmatprep.subr.bf16.mxu1 %v3647_v20 }
 0x1c5   : > { %1374 = vmatpush1.bf16.msra.mxu1 %v3661_v23 }
 0x1c6   : > { %1375 = vmatprep.subr.bf16.mxu1 %v3667_v24 }
 0x1c9   : > { %1376 = vmatpush1.bf16.msra.mxu1 %v3679_v27 }
 0x1ca   : > { %1377 = vmatprep.subr.bf16.mxu1 %v3685_v28 }
 0x1cd   : > { %1378 = vmatpush1.bf16.msra.mxu1 %v3697_v31 }
 0x1ce   : > { %1379 = vmatprep.subr.bf16.mxu1 %v3703_v32 }
 0x1d1   : > { %1380 = vmatpush1.bf16.msra.mxu1 %v3715_v35 }
 0x1d2   : > { %1381 = vmatprep.subr.bf16.mxu1 %v3721_v36 }
 0x1d5   : > { %1382 = vmatpush1.bf16.msra.mxu1 %v3733_v39 }
 0x1d6   : > { %1383 = vmatprep.subr.bf16.mxu1 %v3739_v40 }
 0x1d9   : > { %1384 = vmatpush1.bf16.msra.mxu1 %v3886_v1 }
 0x1da   : > { %1385 = vmatprep.subr.bf16.mxu1 %v3893_v2 }
 0x1dd   : > { %1386 = vmatpush1.bf16.msra.mxu1 %v3898_v5 }
 0x1de   : > { %1387 = vmatprep.subr.bf16.mxu1 %v3907_v6 }
 0x1e1   : > { %1388 = vmatpush1.bf16.msra.mxu1 %v3912_v8 }
 0x1e2   : > { %1422 = vmatprep.subr.bf16.mxu1 %v3512_v54 }
 0x277   : > { %v1326_v29 = vpop.f32.mrb[0].mxu1 }
 0x278   : > { %v1327_v30 = vadd.f32 %v1326_v29, %v3968_v22  ;;  %v1328_v33 = vpop.f32.mrb[1].mxu1 }
 0x279   : > { %v1329_v34 = vadd.f32 %v1328_v33, %v3972_v26  ;;  %v1330_v37 = vpop.f32.mrb[2].mxu1 }
 0x27a   : > { %v1331_v38 = vadd.f32 %v1330_v37, %v3968_v22  ;;  %v1332_v41 = vpop.f32.mrb[3].mxu1  ;;  %v1345_v43 = vmax.f32 %v1327_v30, 0.0 }
 0x27b   : > { %v1333_v42 = vadd.f32 %v1332_v41, %v3972_v26  ;;  %v1346_v14 = vmax.f32 %v1329_v34, 0.0 }
 0x27c   : > { %v1347_v44 = vmax.f32 %v1331_v38, 0.0 }
 0x27d   : > { %v1348_v45 = vmax.f32 %v1333_v42, 0.0 }
 0x27e   : > { %v1353_v46 = vpack.c.bf16 %v1347_v44, %v1345_v43 }
 0x27f   : > { %v1354_v13 = vpack.c.bf16 %v1348_v45, %v1346_v14  ;;  %v1336_v18 = vpop.f32.mrb[4].mxu1 }
 0x280   : > { %v1337_v47 = vadd.f32 %v1336_v18, %v3968_v22  ;;  %v1338_v48 = vpop.f32.mrb[5].mxu1 }
 0x281   : > { %v1339_v49 = vadd.f32 %v1338_v48, %v3972_v26  ;;  %v1340_v50 = vpop.f32.mrb[6].mxu1  ;;  %1389 = vmatprep.mubr.bf16.mxu1 %v1354_v13 }
 0x282   : > { %v1341_v51 = vadd.f32 %v1340_v50, %v3968_v22  ;;  %v1342_v52 = vpop.f32.mrb[7].mxu1  ;;  %1390 = vmatmul.mubr.bf16.vlgmr.msra.gmra.mrb[8].mxu1 %v1353_v46  ;;  %v1349_v57 = vmax.f32 %v1337_v47, 0.0 }
 0x283   : > { %v1343_v53 = vadd.f32 %v1342_v52, %v3972_v26  ;;  %1423 = vmatpush1.bf16.msra.mxu1 %v3517_v55  ;;  %v1350_v61 = vmax.f32 %v1339_v49, 0.0 }
 0x284   : > { %v1351_v58 = vmax.f32 %v1341_v51, 0.0  ;;  %1424 = vmatprep.subr.bf16.mxu1 %v3522_v56 }
 0x285   : > { %v1352_v62 = vmax.f32 %v1343_v53, 0.0 }
 0x286   : > { %v1355_v9 = vpack.c.bf16 %v1351_v58, %v1349_v57 }
 0x287   : > { %v1356_v17 = vpack.c.bf16 %v1352_v62, %v1350_v61  ;;  %1425 = vmatpush1.bf16.msra.mxu1 %v3535_v59 }
 0x288   : > { %1426 = vmatprep.subr.bf16.mxu1 %v3541_v60 }
 0x289   : > { %1399 = vmatprep.mubr.bf16.mxu1 %v1356_v17 }
 0x28a   : > { %1400 = vmatmul.mubr.bf16.gmra.mrb[12].mxu1 %v1355_v9 }
 0x28b   : > { %1427 = vmatpush1.bf16.msra.mxu1 %v3553_v63 }
 0x28c   : > { %1428 = vmatprep.subr.bf16.mxu1 %v3559_v0 }
 0x28f   : > { %1429 = vmatpush1.bf16.msra.mxu1 %v3571_v3 }
 0x290   : > { %1430 = vmatprep.subr.bf16.mxu1 %v3577_v4 }
 0x293   : > { %1431 = vmatpush1.bf16.msra.mxu1 %v3589_v7 }
 0x294   : > { %1432 = vmatprep.subr.bf16.mxu1 %v3601_v10 }
 0x297   : > { %1433 = vmatpush1.bf16.msra.mxu1 %v3606_v11 }
 0x298   : > { %1434 = vmatprep.subr.bf16.mxu1 %v3611_v12 }
 0x29b   : > { %1435 = vmatpush1.bf16.msra.mxu1 %v3624_v15 }
 0x29c   : > { %1436 = vmatprep.subr.bf16.mxu1 %v3629_v16 }
 0x29f   : > { %1437 = vmatpush1.bf16.msra.mxu1 %v3642_v19 }
 0x2a0   : > { %1438 = vmatprep.subr.bf16.mxu1 %v3647_v20 }
 0x2a3   : > { %1439 = vmatpush1.bf16.msra.mxu1 %v3661_v23 }
 0x2a4   : > { %1440 = vmatprep.subr.bf16.mxu1 %v3667_v24 }
 0x2a7   : > { %1441 = vmatpush1.bf16.msra.mxu1 %v3679_v27 }
 0x2a8   : > { %1442 = vmatprep.subr.bf16.mxu1 %v3685_v28 }
 0x2ab   : > { %1443 = vmatpush1.bf16.msra.mxu1 %v3697_v31 }
 0x2ac   : > { %1444 = vmatprep.subr.bf16.mxu1 %v3703_v32 }
 0x2af   : > { %1445 = vmatpush1.bf16.msra.mxu1 %v3715_v35 }
 0x2b0   : > { %1446 = vmatprep.subr.bf16.mxu1 %v3721_v36 }
 0x2b3   : > { %1447 = vmatpush1.bf16.msra.mxu1 %v3733_v39 }
 0x2b4   : > { %1448 = vmatprep.subr.bf16.mxu1 %v3739_v40 }
 0x2b7   : > { %1449 = vmatpush1.bf16.msra.mxu1 %v3886_v1 }
 0x2b8   : > { %1450 = vmatprep.subr.bf16.mxu1 %v3893_v2 }
 0x2bb   : > { %1451 = vmatpush1.bf16.msra.mxu1 %v3898_v5 }
 0x2bc   : > { %1452 = vmatprep.subr.bf16.mxu1 %v3907_v6 }
 0x2bf   : > { %1453 = vmatpush1.bf16.msra.mxu1 %v3912_v8 }
 0x2c0   : > { %1552 = vmatprep.subr.bf16.mxu1 %v3512_v54 }
 0x355   : > { %v1391_v25 = vpop.f32.mrb[8].mxu1 }
 0x356   : > { %v1392_v21 = vadd.f32 %v1391_v25, %v3968_v22  ;;  %v1393_v29 = vpop.f32.mrb[9].mxu1 }
 0x357   : > { %v1394_v30 = vadd.f32 %v1393_v29, %v3972_v26  ;;  %v1395_v33 = vpop.f32.mrb[10].mxu1 }
 0x358   : > { %v1396_v34 = vadd.f32 %v1395_v33, %v3968_v22  ;;  %v1397_v37 = vpop.f32.mrb[11].mxu1  ;;  %v1410_v41 = vmax.f32 %v1392_v21, 0.0 }
 0x359   : > { %v1398_v38 = vadd.f32 %v1397_v37, %v3972_v26  ;;  %v1411_v43 = vmax.f32 %v1394_v30, 0.0 }
 0x35a   : > { %v1412_v42 = vmax.f32 %v1396_v34, 0.0 }
 0x35b   : > { %v1413_v44 = vmax.f32 %v1398_v38, 0.0 }
 0x35c   : > { %v1418_v14 = vpack.c.bf16 %v1412_v42, %v1410_v41 }
 0x35d   : > { %v1419_v45 = vpack.c.bf16 %v1413_v44, %v1411_v43  ;;  %v1401_v46 = vpop.f32.mrb[12].mxu1 }
 0x35e   : > { %v1402_v13 = vadd.f32 %v1401_v46, %v3968_v22  ;;  %v1403_v18 = vpop.f32.mrb[13].mxu1  ;;  %v4065_v46 = vld [vmem:[%s5057_s3] ss:$8 sps:$4 sm:$0xff]  }
 0x35f   : > { %v1404_v47 = vadd.f32 %v1403_v18, %v3972_v26  ;;  %v1405_v48 = vpop.f32.mrb[14].mxu1  ;;  %1454 = vmatprep.mubr.bf16.mxu1 %v1419_v45 }
 0x360   : > { %v1406_v49 = vadd.f32 %v1405_v48, %v3968_v22  ;;  %v1407_v50 = vpop.f32.mrb[15].mxu1  ;;  %1455 = vmatmul.mubr.bf16.vlgmr.msra.gmra.mrb[16].mxu1 %v1418_v14  ;;  %v1414_v52 = vmax.f32 %v1402_v13, 0.0 }
 0x361   : > { %v1408_v51 = vadd.f32 %v1407_v50, %v3972_v26  ;;  %1553 = vmatpush1.bf16.msra.mxu1 %v3517_v55  ;;  %v1415_v57 = vmax.f32 %v1404_v47, 0.0  ;;  %v4071_v47 = vld [vmem:[%s5057_s3 + $0x14] ss:$8 sps:$4 sm:$0xff]  }
 0x362   : > { %v1416_v53 = vmax.f32 %v1406_v49, 0.0  ;;  %1554 = vmatprep.subr.bf16.mxu1 %v3522_v56 }
 0x363   : > { %v1417_v58 = vmax.f32 %v1408_v51, 0.0 }
 0x364   : > { %v1420_v61 = vpack.c.bf16 %v1416_v53, %v1414_v52  ;;  %v4077_v52 = vld [vmem:[%s5057_s3 + $0x10] ss:$8 sps:$4 sm:$0xff]   ;;  %v4083_v53 = vld [vmem:[%s5057_s3 + $0x24] ss:$8 sps:$4 sm:$0xff]  }
 0x365   : > { %v1421_v62 = vpack.c.bf16 %v1417_v58, %v1415_v57  ;;  %1555 = vmatpush1.bf16.msra.mxu1 %v3535_v59  ;;  %v4089_v57 = vld [vmem:[%s5057_s3 + $0x20] ss:$8 sps:$4 sm:$0xff]  }
 0x366   : > { %1556 = vmatprep.subr.bf16.mxu1 %v3541_v60 }
 0x367   : > { %1464 = vmatprep.mubr.bf16.mxu1 %v1421_v62 }
 0x368   : > { %1465 = vmatmul.mubr.bf16.gmra.mrb[20].mxu1 %v1420_v61 }
 0x369   : > { %1557 = vmatpush1.bf16.msra.mxu1 %v3553_v63 }
 0x36a   : > { %1558 = vmatprep.subr.bf16.mxu1 %v3559_v0 }
 0x36d   : > { %1559 = vmatpush1.bf16.msra.mxu1 %v3571_v3 }
 0x36e   : > { %1560 = vmatprep.subr.bf16.mxu1 %v3577_v4 }
 0x371   : > { %1561 = vmatpush1.bf16.msra.mxu1 %v3589_v7 }
 0x372   : > { %1562 = vmatprep.subr.bf16.mxu1 %v3601_v10 }
 0x375   : > { %1563 = vmatpush1.bf16.msra.mxu1 %v3606_v11 }
 0x376   : > { %1564 = vmatprep.subr.bf16.mxu1 %v3611_v12 }
 0x379   : > { %1565 = vmatpush1.bf16.msra.mxu1 %v3624_v15 }
 0x37a   : > { %1566 = vmatprep.subr.bf16.mxu1 %v3629_v16 }
 0x37d   : > { %1567 = vmatpush1.bf16.msra.mxu1 %v3642_v19 }
 0x37e   : > { %1568 = vmatprep.subr.bf16.mxu1 %v3647_v20 }
 0x381   : > { %1569 = vmatpush1.bf16.msra.mxu1 %v3661_v23 }
 0x382   : > { %1570 = vmatprep.subr.bf16.mxu1 %v3667_v24 }
 0x385   : > { %1571 = vmatpush1.bf16.msra.mxu1 %v3679_v27 }
 0x386   : > { %1572 = vmatprep.subr.bf16.mxu1 %v3685_v28 }
 0x389   : > { %1573 = vmatpush1.bf16.msra.mxu1 %v3697_v31 }
 0x38a   : > { %1574 = vmatprep.subr.bf16.mxu1 %v3703_v32 }
 0x38d   : > { %1575 = vmatpush1.bf16.msra.mxu1 %v3715_v35 }
 0x38e   : > { %1576 = vmatprep.subr.bf16.mxu1 %v3721_v36 }
 0x391   : > { %1577 = vmatpush1.bf16.msra.mxu1 %v3733_v39 }
 0x392   : > { %1578 = vmatprep.subr.bf16.mxu1 %v3739_v40 }
 0x395   : > { %1579 = vmatpush1.bf16.msra.mxu1 %v3886_v1 }
 0x396   : > { %1580 = vmatprep.subr.bf16.mxu1 %v3893_v2 }
 0x399   : > { %1581 = vmatpush1.bf16.msra.mxu1 %v3898_v5 }
 0x39a   : > { %1582 = vmatprep.subr.bf16.mxu1 %v3907_v6 }
 0x39d   : > { %1583 = vmatpush1.bf16.msra.mxu1 %v3912_v8 }
 0x39e   : > { %1682 = vmatprep.subr.bf16.mxu1 %v3512_v54 }
 0x433   : > { %v1456_v55 = vpop.f32.mrb[16].mxu1 }
 0x434   : > { %v1457_v56 = vadd.f32 %v1456_v55, %v3968_v22  ;;  %v1458_v59 = vpop.f32.mrb[17].mxu1 }
 0x435   : > { %v1459_v60 = vadd.f32 %v1458_v59, %v3972_v26  ;;  %v1460_v63 = vpop.f32.mrb[18].mxu1 }
 0x436   : > { %v1461_v9 = vadd.f32 %v1460_v63, %v3968_v22  ;;  %v1462_v17 = vpop.f32.mrb[19].mxu1  ;;  %v1475_v21 = vmax.f32 %v1457_v56, 0.0 }
 0x437   : > { %v1463_v25 = vadd.f32 %v1462_v17, %v3972_v26  ;;  %v1476_v30 = vmax.f32 %v1459_v60, 0.0 }
 0x438   : > { %v1477_v29 = vmax.f32 %v1461_v9, 0.0 }
 0x439   : > { %v1478_v33 = vmax.f32 %v1463_v25, 0.0 }
 0x43a   : > { %v1483_v34 = vpack.c.bf16 %v1477_v29, %v1475_v21 }
 0x43b   : > { %v1484_v37 = vpack.c.bf16 %v1478_v33, %v1476_v30  ;;  %v1466_v38 = vpop.f32.mrb[20].mxu1 }
 0x43c   : > { %v1467_v54 = vadd.f32 %v1466_v38, %v3968_v22  ;;  %v1468_v41 = vpop.f32.mrb[21].mxu1 }
 0x43d   : > { %v1469_v42 = vadd.f32 %v1468_v41, %v3972_v26  ;;  %v1470_v43 = vpop.f32.mrb[22].mxu1  ;;  %1519 = vmatprep.mubr.bf16.mxu0 %v1484_v37 }
 0x43e   : > { %v1471_v44 = vadd.f32 %v1470_v43, %v3968_v22  ;;  %v1472_v14 = vpop.f32.mrb[23].mxu1  ;;  %1520 = vmatmul.mubr.bf16.vlgmr.msra.gmra.mrb[8].mxu0 %v1483_v34  ;;  %v1479_v13 = vmax.f32 %v1467_v54, 0.0  ;;  %v4146_v43 = vld [vmem:[%s5057_s3 + $0x30] ss:$8 sps:$4 sm:$0xff]  }
 0x43f   : > { %v1473_v45 = vadd.f32 %v1472_v14, %v3972_v26  ;;  %1618 = vmatpush1.bf16.msra.mxu0 %v4065_v46  ;;  %v1480_v48 = vmax.f32 %v1469_v42, 0.0  ;;  %v4140_v42 = vld [vmem:[%s5057_s3 + $0x34] ss:$8 sps:$4 sm:$0xff]   ;;  %v4158_v14 = vld [vmem:[%s5057_s3 + $0x40] ss:$8 sps:$4 sm:$0xff]  }
 0x440   : > { %v1481_v18 = vmax.f32 %v1471_v44, 0.0  ;;  %1619 = vmatprep.subr.bf16.mxu0 %v4071_v47  ;;  %v4152_v44 = vld [vmem:[%s5057_s3 + $0x44] ss:$8 sps:$4 sm:$0xff]  }
 0x441   : > { %v1482_v49 = vmax.f32 %v1473_v45, 0.0  ;;  %v4164_v45 = vld [vmem:[%s5057_s3 + $0x54] ss:$8 sps:$4 sm:$0xff]  }
 0x442   : > { %v1485_v50 = vpack.c.bf16 %v1481_v18, %v1479_v13  ;;  %v4170_v13 = vld [vmem:[%s5057_s3 + $0x50] ss:$8 sps:$4 sm:$0xff]   ;;  %v4176_v18 = vld [vmem:[%s5057_s3 + $0x64] ss:$8 sps:$4 sm:$0xff]  }
 0x443   : > { %v1486_v51 = vpack.c.bf16 %v1482_v49, %v1480_v48  ;;  %1620 = vmatpush1.bf16.msra.mxu0 %v4077_v52  ;;  %v4182_v48 = vld [vmem:[%s5057_s3 + $0x60] ss:$8 sps:$4 sm:$0xff]   ;;  %v4188_v49 = vld [vmem:[%s5057_s3 + $0x74] ss:$8 sps:$4 sm:$0xff]  }
 0x444   : > { %1621 = vmatprep.subr.bf16.mxu0 %v4083_v53 }
 0x445   : > { %1529 = vmatprep.mubr.bf16.mxu0 %v1486_v51 }
 0x446   : > { %1530 = vmatmul.mubr.bf16.gmra.mrb[12].mxu0 %v1485_v50 }
 0x447   : > { %1622 = vmatpush1.bf16.msra.mxu0 %v4089_v57 }
 0x448   : > { %1623 = vmatprep.subr.bf16.mxu0 %v3559_v0  ;;  %v4121_v0 = vld [vmem:[%s5057_s3 + $0x4] ss:$8 sps:$4 sm:$0xff]  }
 0x44b   : > { %1624 = vmatpush1.bf16.msra.mxu0 %v3571_v3 }
 0x44c   : > { %1625 = vmatprep.subr.bf16.mxu0 %v3577_v4 }
 0x44f   : > { %1626 = vmatpush1.bf16.msra.mxu0 %v3589_v7 }
 0x450   : > { %1627 = vmatprep.subr.bf16.mxu0 %v3601_v10 }
 0x453   : > { %1628 = vmatpush1.bf16.msra.mxu0 %v3606_v11 }
 0x454   : > { %1629 = vmatprep.subr.bf16.mxu0 %v3611_v12 }
 0x457   : > { %1630 = vmatpush1.bf16.msra.mxu0 %v3624_v15 }
 0x458   : > { %1631 = vmatprep.subr.bf16.mxu0 %v3629_v16 }
 0x45b   : > { %1632 = vmatpush1.bf16.msra.mxu0 %v3642_v19 }
 0x45c   : > { %1633 = vmatprep.subr.bf16.mxu0 %v3647_v20 }
 0x45f   : > { %1634 = vmatpush1.bf16.msra.mxu0 %v3661_v23 }
 0x460   : > { %1635 = vmatprep.subr.bf16.mxu0 %v3667_v24 }
 0x463   : > { %1636 = vmatpush1.bf16.msra.mxu0 %v3679_v27 }
 0x464   : > { %1637 = vmatprep.subr.bf16.mxu0 %v3685_v28 }
 0x467   : > { %1638 = vmatpush1.bf16.msra.mxu0 %v3697_v31 }
 0x468   : > { %1639 = vmatprep.subr.bf16.mxu0 %v3703_v32 }
 0x46b   : > { %1640 = vmatpush1.bf16.msra.mxu0 %v3715_v35 }
 0x46c   : > { %1641 = vmatprep.subr.bf16.mxu0 %v3721_v36 }
 0x46f   : > { %1642 = vmatpush1.bf16.msra.mxu0 %v3733_v39 }
 0x470   : > { %1643 = vmatprep.subr.bf16.mxu0 %v3739_v40 }
 0x473   : > { %1644 = vmatpush1.bf16.msra.mxu0 %v3886_v1 }
 0x474   : > { %1645 = vmatprep.subr.bf16.mxu0 %v3893_v2 }
 0x477   : > { %1646 = vmatpush1.bf16.msra.mxu0 %v3898_v5 }
 0x478   : > { %1647 = vmatprep.subr.bf16.mxu0 %v3907_v6 }
 0x47b   : > { %1648 = vmatpush1.bf16.msra.mxu0 %v3912_v8 }
 0x47c   : > { %1747 = vmatprep.subr.bf16.mxu0 %v4121_v0 }
 0x511   : > { %v1521_v3 = vpop.f32.mrb[8].mxu0 }
 0x512   : > { %v1522_v4 = vadd.f32 %v1521_v3, %v3968_v22  ;;  %v1523_v7 = vpop.f32.mrb[9].mxu0 }
 0x513   : > { %v1524_v10 = vadd.f32 %v1523_v7, %v3972_v26  ;;  %v1525_v11 = vpop.f32.mrb[10].mxu0 }
 0x514   : > { %v1526_v12 = vadd.f32 %v1525_v11, %v3968_v22  ;;  %v1527_v15 = vpop.f32.mrb[11].mxu0  ;;  %v1540_v58 = vmax.f32 %v1522_v4, 0.0 }
 0x515   : > { %v1528_v16 = vadd.f32 %v1527_v15, %v3972_v26  ;;  %v1541_v62 = vmax.f32 %v1524_v10, 0.0 }
 0x516   : > { %v1542_v61 = vmax.f32 %v1526_v12, 0.0 }
 0x517   : > { %v1543_v55 = vmax.f32 %v1528_v16, 0.0 }
 0x518   : > { %v1548_v56 = vpack.c.bf16 %v1542_v61, %v1540_v58 }
 0x519   : > { %v1549_v59 = vpack.c.bf16 %v1543_v55, %v1541_v62  ;;  %v1531_v60 = vpop.f32.mrb[12].mxu0 }
 0x51a   : > { %v1532_v63 = vadd.f32 %v1531_v60, %v3968_v22  ;;  %v1533_v9 = vpop.f32.mrb[13].mxu0  ;;  %v4234_v60 = vld [vmem:[%s5057_s3 + $0x70] ss:$8 sps:$4 sm:$0xff]  }
 0x51b   : > { %v1534_v17 = vadd.f32 %v1533_v9, %v3972_v26  ;;  %v1535_v25 = vpop.f32.mrb[14].mxu0  ;;  %1584 = vmatprep.mubr.bf16.mxu1 %v1549_v59  ;;  %v4246_v9 = vld [vmem:[%s5057_s3 + $0x80] ss:$8 sps:$4 sm:$0xff]  }
 0x51c   : > { %v1536_v21 = vadd.f32 %v1535_v25, %v3968_v22  ;;  %v1537_v29 = vpop.f32.mrb[15].mxu0  ;;  %1585 = vmatmul.mubr.bf16.vlgmr.msra.gmra.mrb[24].mxu1 %v1548_v56  ;;  %v1544_v33 = vmax.f32 %v1532_v63, 0.0  ;;  %v4240_v63 = vld [vmem:[%s5057_s3 + $0x84] ss:$8 sps:$4 sm:$0xff]   ;;  %v4258_v25 = vld [vmem:[%s5057_s3 + $0x90] ss:$8 sps:$4 sm:$0xff]  }
 0x51d   : > { %v1538_v30 = vadd.f32 %v1537_v29, %v3972_v26  ;;  %1683 = vmatpush1.bf16.msra.mxu1 %v4065_v46  ;;  %v1545_v37 = vmax.f32 %v1534_v17, 0.0  ;;  %v4252_v17 = vld [vmem:[%s5057_s3 + $0x94] ss:$8 sps:$4 sm:$0xff]   ;;  %v4270_v29 = vld [vmem:[%s5057_s3 + $0xa0] ss:$8 sps:$4 sm:$0xff]  }
 0x51e   : > { %v1546_v34 = vmax.f32 %v1536_v21, 0.0  ;;  %1684 = vmatprep.subr.bf16.mxu1 %v4071_v47  ;;  %v4264_v21 = vld [vmem:[%s5057_s3 + $0xa4] ss:$8 sps:$4 sm:$0xff]  }
 0x51f   : > { %v1547_v38 = vmax.f32 %v1538_v30, 0.0  ;;  %v4276_v30 = vld [vmem:[%s5057_s3 + $0xb4] ss:$8 sps:$4 sm:$0xff]  }
 0x520   : > { %v1550_v54 = vpack.c.bf16 %v1546_v34, %v1544_v33  ;;  %v4282_v33 = vld [vmem:[%s5057_s3 + $0xb0] ss:$8 sps:$4 sm:$0xff]   ;;  %v4288_v34 = vld [vmem:[%s5057_s3 + $0xc4] ss:$8 sps:$4 sm:$0xff]  }
 0x521   : > { %v1551_v41 = vpack.c.bf16 %v1547_v38, %v1545_v37  ;;  %1685 = vmatpush1.bf16.msra.mxu1 %v4077_v52  ;;  %v4294_v37 = vld [vmem:[%s5057_s3 + $0xc0] ss:$8 sps:$4 sm:$0xff]   ;;  %v4300_v38 = vld [vmem:[%s5057_s3 + $0xd4] ss:$8 sps:$4 sm:$0xff]  }
 0x522   : > { %1686 = vmatprep.subr.bf16.mxu1 %v4083_v53 }
 0x523   : > { %1594 = vmatprep.mubr.bf16.mxu1 %v1551_v41 }
 0x524   : > { %1595 = vmatmul.mubr.bf16.gmra.mrb[28].mxu1 %v1550_v54 }
 0x525   : > { %1687 = vmatpush1.bf16.msra.mxu1 %v4089_v57 }
 0x526   : > { %1688 = vmatprep.subr.bf16.mxu1 %v4140_v42 }
 0x529   : > { %1689 = vmatpush1.bf16.msra.mxu1 %v4146_v43 }
 0x52a   : > { %1690 = vmatprep.subr.bf16.mxu1 %v4152_v44 }
 0x52d   : > { %1691 = vmatpush1.bf16.msra.mxu1 %v4158_v14 }
 0x52e   : > { %1692 = vmatprep.subr.bf16.mxu1 %v4164_v45 }
 0x531   : > { %1693 = vmatpush1.bf16.msra.mxu1 %v4170_v13 }
 0x532   : > { %1694 = vmatprep.subr.bf16.mxu1 %v4176_v18 }
 0x535   : > { %1695 = vmatpush1.bf16.msra.mxu1 %v4182_v48 }
 0x536   : > { %1696 = vmatprep.subr.bf16.mxu1 %v4188_v49 }
 0x539   : > { %1697 = vmatpush1.bf16.msra.mxu1 %v3642_v19 }
 0x53a   : > { %1698 = vmatprep.subr.bf16.mxu1 %v3647_v20 }
 0x53d   : > { %1699 = vmatpush1.bf16.msra.mxu1 %v3661_v23 }
 0x53e   : > { %1700 = vmatprep.subr.bf16.mxu1 %v3667_v24 }
 0x541   : > { %1701 = vmatpush1.bf16.msra.mxu1 %v3679_v27 }
 0x542   : > { %1702 = vmatprep.subr.bf16.mxu1 %v3685_v28 }
 0x545   : > { %1703 = vmatpush1.bf16.msra.mxu1 %v3697_v31 }
 0x546   : > { %1704 = vmatprep.subr.bf16.mxu1 %v3703_v32 }
 0x549   : > { %1705 = vmatpush1.bf16.msra.mxu1 %v3715_v35 }
 0x54a   : > { %1706 = vmatprep.subr.bf16.mxu1 %v3721_v36 }
 0x54d   : > { %1707 = vmatpush1.bf16.msra.mxu1 %v3733_v39 }
 0x54e   : > { %1708 = vmatprep.subr.bf16.mxu1 %v3739_v40 }
 0x551   : > { %1709 = vmatpush1.bf16.msra.mxu1 %v3886_v1 }
 0x552   : > { %1710 = vmatprep.subr.bf16.mxu1 %v3893_v2 }
 0x555   : > { %1711 = vmatpush1.bf16.msra.mxu1 %v3898_v5 }
 0x556   : > { %1712 = vmatprep.subr.bf16.mxu1 %v3907_v6 }
 0x559   : > { %1713 = vmatpush1.bf16.msra.mxu1 %v3912_v8 }
 0x55a   : > { %1812 = vmatprep.subr.bf16.mxu1 %v4121_v0 }
 0x5ef   : > { %v1586_v19 = vpop.f32.mrb[24].mxu1 }
 0x5f0   : > { %v1587_v20 = vadd.f32 %v1586_v19, %v3968_v22  ;;  %v1588_v23 = vpop.f32.mrb[25].mxu1 }
 0x5f1   : > { %v1589_v24 = vadd.f32 %v1588_v23, %v3972_v26  ;;  %v1590_v27 = vpop.f32.mrb[26].mxu1 }
 0x5f2   : > { %v1591_v28 = vadd.f32 %v1590_v27, %v3968_v22  ;;  %v1592_v31 = vpop.f32.mrb[27].mxu1  ;;  %v1605_v35 = vmax.f32 %v1587_v20, 0.0 }
 0x5f3   : > { %v1593_v32 = vadd.f32 %v1592_v31, %v3972_v26  ;;  %v1606_v39 = vmax.f32 %v1589_v24, 0.0 }
 0x5f4   : > { %v1607_v36 = vmax.f32 %v1591_v28, 0.0 }
 0x5f5   : > { %v1608_v40 = vmax.f32 %v1593_v32, 0.0 }
 0x5f6   : > { %v1613_v50 = vpack.c.bf16 %v1607_v36, %v1605_v35 }
 0x5f7   : > { %v1614_v51 = vpack.c.bf16 %v1608_v40, %v1606_v39  ;;  %v1596_v3 = vpop.f32.mrb[28].mxu1 }
 0x5f8   : > { %v1597_v4 = vadd.f32 %v1596_v3, %v3968_v22  ;;  %v1598_v7 = vpop.f32.mrb[29].mxu1 }
 0x5f9   : > { %v1599_v10 = vadd.f32 %v1598_v7, %v3972_v26  ;;  %v1600_v11 = vpop.f32.mrb[30].mxu1  ;;  %1649 = vmatprep.mubr.bf16.mxu0 %v1614_v51 }
 0x5fa   : > { %v1601_v12 = vadd.f32 %v1600_v11, %v3968_v22  ;;  %v1602_v15 = vpop.f32.mrb[31].mxu1  ;;  %1650 = vmatmul.mubr.bf16.vlgmr.msra.gmra.mrb[16].mxu0 %v1613_v50  ;;  %v1609_v58 = vmax.f32 %v1597_v4, 0.0 }
 0x5fb   : > { %v1603_v16 = vadd.f32 %v1602_v15, %v3972_v26  ;;  %1748 = vmatpush1.bf16.msra.mxu0 %v4065_v46  ;;  %v1610_v62 = vmax.f32 %v1599_v10, 0.0 }
 0x5fc   : > { %v1611_v61 = vmax.f32 %v1601_v12, 0.0  ;;  %1749 = vmatprep.subr.bf16.mxu0 %v4071_v47 }
 0x5fd   : > { %v1612_v55 = vmax.f32 %v1603_v16, 0.0 }
 0x5fe   : > { %v1615_v56 = vpack.c.bf16 %v1611_v61, %v1609_v58 }
 0x5ff   : > { %v1616_v59 = vpack.c.bf16 %v1612_v55, %v1610_v62  ;;  %1750 = vmatpush1.bf16.msra.mxu0 %v4077_v52 }
 0x600   : > { %1751 = vmatprep.subr.bf16.mxu0 %v4083_v53 }
 0x601   : > { %1659 = vmatprep.mubr.bf16.mxu0 %v1616_v59 }
 0x602   : > { %1660 = vmatmul.mubr.bf16.gmra.mrb[20].mxu0 %v1615_v56 }
 0x603   : > { %1752 = vmatpush1.bf16.msra.mxu0 %v4089_v57 }
 0x604   : > { %1753 = vmatprep.subr.bf16.mxu0 %v4140_v42 }
 0x607   : > { %1754 = vmatpush1.bf16.msra.mxu0 %v4146_v43 }
 0x608   : > { %1755 = vmatprep.subr.bf16.mxu0 %v4152_v44 }
 0x60b   : > { %1756 = vmatpush1.bf16.msra.mxu0 %v4158_v14 }
 0x60c   : > { %1757 = vmatprep.subr.bf16.mxu0 %v4164_v45 }
 0x60f   : > { %1758 = vmatpush1.bf16.msra.mxu0 %v4170_v13 }
 0x610   : > { %1759 = vmatprep.subr.bf16.mxu0 %v4176_v18 }
 0x613   : > { %1760 = vmatpush1.bf16.msra.mxu0 %v4182_v48 }
 0x614   : > { %1761 = vmatprep.subr.bf16.mxu0 %v4188_v49 }
 0x617   : > { %1762 = vmatpush1.bf16.msra.mxu0 %v4234_v60 }
 0x618   : > { %1763 = vmatprep.subr.bf16.mxu0 %v4240_v63 }
 0x61b   : > { %1764 = vmatpush1.bf16.msra.mxu0 %v4246_v9 }
 0x61c   : > { %1765 = vmatprep.subr.bf16.mxu0 %v4252_v17 }
 0x61f   : > { %1766 = vmatpush1.bf16.msra.mxu0 %v4258_v25 }
 0x620   : > { %1767 = vmatprep.subr.bf16.mxu0 %v4264_v21 }
 0x623   : > { %1768 = vmatpush1.bf16.msra.mxu0 %v4270_v29 }
 0x624   : > { %1769 = vmatprep.subr.bf16.mxu0 %v4276_v30 }
 0x627   : > { %1770 = vmatpush1.bf16.msra.mxu0 %v4282_v33 }
 0x628   : > { %1771 = vmatprep.subr.bf16.mxu0 %v4288_v34 }
 0x62b   : > { %1772 = vmatpush1.bf16.msra.mxu0 %v4294_v37 }
 0x62c   : > { %1773 = vmatprep.subr.bf16.mxu0 %v4300_v38 }
 0x62f   : > { %1774 = vmatpush1.bf16.msra.mxu0 %v3886_v1 }
 0x630   : > { %1775 = vmatprep.subr.bf16.mxu0 %v3893_v2 }
 0x633   : > { %1776 = vmatpush1.bf16.msra.mxu0 %v3898_v5 }
 0x634   : > { %1777 = vmatprep.subr.bf16.mxu0 %v3907_v6 }
 0x637   : > { %1778 = vmatpush1.bf16.msra.mxu0 %v3912_v8 }
 0x638   : > { %1877 = vmatprep.subr.bf16.mxu0 %v4121_v0 }
 0x6cd   : > { %v1651_v54 = vpop.f32.mrb[16].mxu0 }
 0x6ce   : > { %v1652_v41 = vadd.f32 %v1651_v54, %v3968_v22  ;;  %v1653_v19 = vpop.f32.mrb[17].mxu0 }
 0x6cf   : > { %v1654_v20 = vadd.f32 %v1653_v19, %v3972_v26  ;;  %v1655_v23 = vpop.f32.mrb[18].mxu0 }
 0x6d0   : > { %v1656_v24 = vadd.f32 %v1655_v23, %v3968_v22  ;;  %v1657_v27 = vpop.f32.mrb[19].mxu0  ;;  %v1670_v31 = vmax.f32 %v1652_v41, 0.0 }
 0x6d1   : > { %v1658_v28 = vadd.f32 %v1657_v27, %v3972_v26  ;;  %v1671_v35 = vmax.f32 %v1654_v20, 0.0 }
 0x6d2   : > { %v1672_v32 = vmax.f32 %v1656_v24, 0.0 }
 0x6d3   : > { %v1673_v36 = vmax.f32 %v1658_v28, 0.0 }
 0x6d4   : > { %v1678_v39 = vpack.c.bf16 %v1672_v32, %v1670_v31 }
 0x6d5   : > { %v1679_v40 = vpack.c.bf16 %v1673_v36, %v1671_v35  ;;  %v1661_v50 = vpop.f32.mrb[20].mxu0 }
 0x6d6   : > { %v1662_v51 = vadd.f32 %v1661_v50, %v3968_v22  ;;  %v1663_v3 = vpop.f32.mrb[21].mxu0 }
 0x6d7   : > { %v1664_v4 = vadd.f32 %v1663_v3, %v3972_v26  ;;  %v1665_v7 = vpop.f32.mrb[22].mxu0  ;;  %1714 = vmatprep.mubr.bf16.mxu1 %v1679_v40 }
 0x6d8   : > { %v1666_v10 = vadd.f32 %v1665_v7, %v3968_v22  ;;  %v1667_v11 = vpop.f32.mrb[23].mxu0  ;;  %1715 = vmatmul.mubr.bf16.vlgmr.msra.gmra.mrb[32].mxu1 %v1678_v39  ;;  %v1674_v15 = vmax.f32 %v1662_v51, 0.0 }
 0x6d9   : > { %v1668_v12 = vadd.f32 %v1667_v11, %v3972_v26  ;;  %1813 = vmatpush1.bf16.msra.mxu1 %v4065_v46  ;;  %v1675_v58 = vmax.f32 %v1664_v4, 0.0 }
 0x6da   : > { %v1676_v16 = vmax.f32 %v1666_v10, 0.0  ;;  %1814 = vmatprep.subr.bf16.mxu1 %v4071_v47 }
 0x6db   : > { %v1677_v61 = vmax.f32 %v1668_v12, 0.0  ;;  %v4386_v12 = vld [vmem:[%s5057_s3 + $0xd0] ss:$8 sps:$4 sm:$0xff]  }
 0x6dc   : > { %v1680_v62 = vpack.c.bf16 %v1676_v16, %v1674_v15  ;;  %v4392_v15 = vld [vmem:[%s5057_s3 + $0xe4] ss:$8 sps:$4 sm:$0xff]   ;;  %v4398_v16 = vld [vmem:[%s5057_s3 + $0xe0] ss:$8 sps:$4 sm:$0xff]  }
 0x6dd   : > { %v1681_v55 = vpack.c.bf16 %v1677_v61, %v1675_v58  ;;  %1815 = vmatpush1.bf16.msra.mxu1 %v4077_v52  ;;  %v4404_v58 = vld [vmem:[%s5057_s3 + $0xf4] ss:$8 sps:$4 sm:$0xff]   ;;  %v4410_v61 = vld [vmem:[%s5057_s3 + $0xf0] ss:$8 sps:$4 sm:$0xff]  }
 0x6de   : > { %1816 = vmatprep.subr.bf16.mxu1 %v4083_v53 }
 0x6df   : > { %1724 = vmatprep.mubr.bf16.mxu1 %v1681_v55 }
 0x6e0   : > { %1725 = vmatmul.mubr.bf16.gmra.mrb[36].mxu1 %v1680_v62 }
 0x6e1   : > { %1817 = vmatpush1.bf16.msra.mxu1 %v4089_v57 }
 0x6e2   : > { %1818 = vmatprep.subr.bf16.mxu1 %v4140_v42 }
 0x6e5   : > { %1819 = vmatpush1.bf16.msra.mxu1 %v4146_v43 }
 0x6e6   : > { %1820 = vmatprep.subr.bf16.mxu1 %v4152_v44 }
 0x6e9   : > { %1821 = vmatpush1.bf16.msra.mxu1 %v4158_v14 }
 0x6ea   : > { %1822 = vmatprep.subr.bf16.mxu1 %v4164_v45 }
 0x6ed   : > { %1823 = vmatpush1.bf16.msra.mxu1 %v4170_v13 }
 0x6ee   : > { %1824 = vmatprep.subr.bf16.mxu1 %v4176_v18 }
 0x6f1   : > { %1825 = vmatpush1.bf16.msra.mxu1 %v4182_v48 }
 0x6f2   : > { %1826 = vmatprep.subr.bf16.mxu1 %v4188_v49 }
 0x6f5   : > { %1827 = vmatpush1.bf16.msra.mxu1 %v4234_v60 }
 0x6f6   : > { %1828 = vmatprep.subr.bf16.mxu1 %v4240_v63 }
 0x6f9   : > { %1829 = vmatpush1.bf16.msra.mxu1 %v4246_v9 }
 0x6fa   : > { %1830 = vmatprep.subr.bf16.mxu1 %v4252_v17 }
 0x6fd   : > { %1831 = vmatpush1.bf16.msra.mxu1 %v4258_v25 }
 0x6fe   : > { %1832 = vmatprep.subr.bf16.mxu1 %v4264_v21 }
 0x701   : > { %1833 = vmatpush1.bf16.msra.mxu1 %v4270_v29 }
 0x702   : > { %1834 = vmatprep.subr.bf16.mxu1 %v4276_v30 }
 0x705   : > { %1835 = vmatpush1.bf16.msra.mxu1 %v4282_v33 }
 0x706   : > { %1836 = vmatprep.subr.bf16.mxu1 %v4288_v34 }
 0x709   : > { %1837 = vmatpush1.bf16.msra.mxu1 %v4294_v37 }
 0x70a   : > { %1838 = vmatprep.subr.bf16.mxu1 %v4300_v38 }
 0x70d   : > { %1839 = vmatpush1.bf16.msra.mxu1 %v3886_v1 }
 0x70e   : > { %1840 = vmatprep.subr.bf16.mxu1 %v3893_v2 }
 0x711   : > { %1841 = vmatpush1.bf16.msra.mxu1 %v3898_v5 }
 0x712   : > { %1842 = vmatprep.subr.bf16.mxu1 %v3907_v6 }
 0x715   : > { %1843 = vmatpush1.bf16.msra.mxu1 %v3912_v8 }
 0x716   : > { %1942 = vmatprep.subr.bf16.mxu1 %v4121_v0 }
 0x7ab   : > { %v1716_v56 = vpop.f32.mrb[32].mxu1 }
 0x7ac   : > { %v1717_v59 = vadd.f32 %v1716_v56, %v3968_v22  ;;  %v1718_v54 = vpop.f32.mrb[33].mxu1 }
 0x7ad   : > { %v1719_v41 = vadd.f32 %v1718_v54, %v3972_v26  ;;  %v1720_v19 = vpop.f32.mrb[34].mxu1 }
 0x7ae   : > { %v1721_v20 = vadd.f32 %v1720_v19, %v3968_v22  ;;  %v1722_v1 = vpop.f32.mrb[35].mxu1  ;;  %v1735_v23 = vmax.f32 %v1717_v59, 0.0 }
 0x7af   : > { %v1723_v2 = vadd.f32 %v1722_v1, %v3972_v26  ;;  %v1736_v24 = vmax.f32 %v1719_v41, 0.0 }
 0x7b0   : > { %v1737_v5 = vmax.f32 %v1721_v20, 0.0 }
 0x7b1   : > { %v1738_v6 = vmax.f32 %v1723_v2, 0.0 }
 0x7b2   : > { %v1743_v27 = vpack.c.bf16 %v1737_v5, %v1735_v23 }
 0x7b3   : > { %v1744_v8 = vpack.c.bf16 %v1738_v6, %v1736_v24  ;;  %v1726_v28 = vpop.f32.mrb[36].mxu1 }
 0x7b4   : > { %v1727_v31 = vadd.f32 %v1726_v28, %v3968_v22  ;;  %v1728_v32 = vpop.f32.mrb[37].mxu1 }
 0x7b5   : > { %v1729_v35 = vadd.f32 %v1728_v32, %v3972_v26  ;;  %v1730_v36 = vpop.f32.mrb[38].mxu1  ;;  %1779 = vmatprep.mubr.bf16.mxu0 %v1744_v8 }
 0x7b6   : > { %v1731_v39 = vadd.f32 %v1730_v36, %v3968_v22  ;;  %v1732_v40 = vpop.f32.mrb[39].mxu1  ;;  %1780 = vmatmul.mubr.bf16.vlgmr.msra.gmra.mrb[24].mxu0 %v1743_v27  ;;  %v1739_v51 = vmax.f32 %v1727_v31, 0.0 }
 0x7b7   : > { %v1733_v50 = vadd.f32 %v1732_v40, %v3972_v26  ;;  %1878 = vmatpush1.bf16.msra.mxu0 %v4065_v46  ;;  %v1740_v4 = vmax.f32 %v1729_v35, 0.0 }
 0x7b8   : > { %v1741_v3 = vmax.f32 %v1731_v39, 0.0  ;;  %1879 = vmatprep.subr.bf16.mxu0 %v4071_v47 }
 0x7b9   : > { %v1742_v7 = vmax.f32 %v1733_v50, 0.0 }
 0x7ba   : > { %v1745_v10 = vpack.c.bf16 %v1741_v3, %v1739_v51 }
 0x7bb   : > { %v1746_v11 = vpack.c.bf16 %v1742_v7, %v1740_v4  ;;  %1880 = vmatpush1.bf16.msra.mxu0 %v4077_v52 }
 0x7bc   : > { %1881 = vmatprep.subr.bf16.mxu0 %v4083_v53 }
 0x7bd   : > { %1789 = vmatprep.mubr.bf16.mxu0 %v1746_v11 }
 0x7be   : > { %1790 = vmatmul.mubr.bf16.gmra.mrb[28].mxu0 %v1745_v10 }
 0x7bf   : > { %1882 = vmatpush1.bf16.msra.mxu0 %v4089_v57 }
 0x7c0   : > { %1883 = vmatprep.subr.bf16.mxu0 %v4140_v42 }
 0x7c3   : > { %1884 = vmatpush1.bf16.msra.mxu0 %v4146_v43 }
 0x7c4   : > { %1885 = vmatprep.subr.bf16.mxu0 %v4152_v44 }
 0x7c7   : > { %1886 = vmatpush1.bf16.msra.mxu0 %v4158_v14 }
 0x7c8   : > { %1887 = vmatprep.subr.bf16.mxu0 %v4164_v45 }
 0x7cb   : > { %1888 = vmatpush1.bf16.msra.mxu0 %v4170_v13 }
 0x7cc   : > { %1889 = vmatprep.subr.bf16.mxu0 %v4176_v18 }
 0x7cf   : > { %1890 = vmatpush1.bf16.msra.mxu0 %v4182_v48 }
 0x7d0   : > { %1891 = vmatprep.subr.bf16.mxu0 %v4188_v49 }
 0x7d3   : > { %1892 = vmatpush1.bf16.msra.mxu0 %v4234_v60 }
 0x7d4   : > { %1893 = vmatprep.subr.bf16.mxu0 %v4240_v63 }
 0x7d7   : > { %1894 = vmatpush1.bf16.msra.mxu0 %v4246_v9 }
 0x7d8   : > { %1895 = vmatprep.subr.bf16.mxu0 %v4252_v17 }
 0x7db   : > { %1896 = vmatpush1.bf16.msra.mxu0 %v4258_v25 }
 0x7dc   : > { %1897 = vmatprep.subr.bf16.mxu0 %v4264_v21 }
 0x7df   : > { %1898 = vmatpush1.bf16.msra.mxu0 %v4270_v29 }
 0x7e0   : > { %1899 = vmatprep.subr.bf16.mxu0 %v4276_v30 }
 0x7e3   : > { %1900 = vmatpush1.bf16.msra.mxu0 %v4282_v33 }
 0x7e4   : > { %1901 = vmatprep.subr.bf16.mxu0 %v4288_v34 }
 0x7e7   : > { %1902 = vmatpush1.bf16.msra.mxu0 %v4294_v37 }
 0x7e8   : > { %1903 = vmatprep.subr.bf16.mxu0 %v4300_v38 }
 0x7eb   : > { %1904 = vmatpush1.bf16.msra.mxu0 %v4386_v12 }
 0x7ec   : > { %1905 = vmatprep.subr.bf16.mxu0 %v4392_v15 }
 0x7ef   : > { %1906 = vmatpush1.bf16.msra.mxu0 %v4398_v16 }
 0x7f0   : > { %1907 = vmatprep.subr.bf16.mxu0 %v4404_v58 }
 0x7f3   : > { %1908 = vmatpush1.bf16.msra.mxu0 %v4410_v61 }
 0x7f4   : > { %2007 = vmatprep.subr.bf16.mxu0 %v4121_v0 }
 0x889   : > { %v1781_v62 = vpop.f32.mrb[24].mxu0 }
 0x88a   : > { %v1782_v55 = vadd.f32 %v1781_v62, %v3968_v22  ;;  %v1783_v56 = vpop.f32.mrb[25].mxu0 }
 0x88b   : > { %v1784_v59 = vadd.f32 %v1783_v56, %v3972_v26  ;;  %v1785_v54 = vpop.f32.mrb[26].mxu0 }
 0x88c   : > { %v1786_v41 = vadd.f32 %v1785_v54, %v3968_v22  ;;  %v1787_v19 = vpop.f32.mrb[27].mxu0  ;;  %v1800_v1 = vmax.f32 %v1782_v55, 0.0 }
 0x88d   : > { %v1788_v20 = vadd.f32 %v1787_v19, %v3972_v26  ;;  %v1801_v23 = vmax.f32 %v1784_v59, 0.0 }
 0x88e   : > { %v1802_v2 = vmax.f32 %v1786_v41, 0.0 }
 0x88f   : > { %v1803_v5 = vmax.f32 %v1788_v20, 0.0 }
 0x890   : > { %v1808_v24 = vpack.c.bf16 %v1802_v2, %v1800_v1 }
 0x891   : > { %v1809_v6 = vpack.c.bf16 %v1803_v5, %v1801_v23  ;;  %v1791_v27 = vpop.f32.mrb[28].mxu0 }
 0x892   : > { %v1792_v8 = vadd.f32 %v1791_v27, %v3968_v22  ;;  %v1793_v28 = vpop.f32.mrb[29].mxu0 }
 0x893   : > { %v1794_v31 = vadd.f32 %v1793_v28, %v3972_v26  ;;  %v1795_v32 = vpop.f32.mrb[30].mxu0  ;;  %1844 = vmatprep.mubr.bf16.mxu1 %v1809_v6 }
 0x894   : > { %v1796_v35 = vadd.f32 %v1795_v32, %v3968_v22  ;;  %v1797_v36 = vpop.f32.mrb[31].mxu0  ;;  %1845 = vmatmul.mubr.bf16.vlgmr.msra.gmra.mrb[40].mxu1 %v1808_v24  ;;  %v1804_v40 = vmax.f32 %v1792_v8, 0.0 }
 0x895   : > { %v1798_v39 = vadd.f32 %v1797_v36, %v3972_v26  ;;  %1943 = vmatpush1.bf16.msra.mxu1 %v4065_v46  ;;  %v1805_v51 = vmax.f32 %v1794_v31, 0.0 }
 0x896   : > { %v1806_v50 = vmax.f32 %v1796_v35, 0.0  ;;  %1944 = vmatprep.subr.bf16.mxu1 %v4071_v47 }
 0x897   : > { %v1807_v3 = vmax.f32 %v1798_v39, 0.0 }
 0x898   : > { %v1810_v4 = vpack.c.bf16 %v1806_v50, %v1804_v40 }
 0x899   : > { %v1811_v7 = vpack.c.bf16 %v1807_v3, %v1805_v51  ;;  %1945 = vmatpush1.bf16.msra.mxu1 %v4077_v52 }
 0x89a   : > { %1946 = vmatprep.subr.bf16.mxu1 %v4083_v53 }
 0x89b   : > { %1854 = vmatprep.mubr.bf16.mxu1 %v1811_v7 }
 0x89c   : > { %1855 = vmatmul.mubr.bf16.gmra.mrb[44].mxu1 %v1810_v4 }
 0x89d   : > { %1947 = vmatpush1.bf16.msra.mxu1 %v4089_v57 }
 0x89e   : > { %1948 = vmatprep.subr.bf16.mxu1 %v4140_v42 }
 0x8a1   : > { %1949 = vmatpush1.bf16.msra.mxu1 %v4146_v43 }
 0x8a2   : > { %1950 = vmatprep.subr.bf16.mxu1 %v4152_v44 }
 0x8a5   : > { %1951 = vmatpush1.bf16.msra.mxu1 %v4158_v14 }
 0x8a6   : > { %1952 = vmatprep.subr.bf16.mxu1 %v4164_v45 }
 0x8a9   : > { %1953 = vmatpush1.bf16.msra.mxu1 %v4170_v13 }
 0x8aa   : > { %1954 = vmatprep.subr.bf16.mxu1 %v4176_v18 }
 0x8ad   : > { %1955 = vmatpush1.bf16.msra.mxu1 %v4182_v48 }
 0x8ae   : > { %1956 = vmatprep.subr.bf16.mxu1 %v4188_v49 }
 0x8b1   : > { %1957 = vmatpush1.bf16.msra.mxu1 %v4234_v60 }
 0x8b2   : > { %1958 = vmatprep.subr.bf16.mxu1 %v4240_v63 }
 0x8b5   : > { %1959 = vmatpush1.bf16.msra.mxu1 %v4246_v9 }
 0x8b6   : > { %1960 = vmatprep.subr.bf16.mxu1 %v4252_v17 }
 0x8b9   : > { %1961 = vmatpush1.bf16.msra.mxu1 %v4258_v25 }
 0x8ba   : > { %1962 = vmatprep.subr.bf16.mxu1 %v4264_v21 }
 0x8bd   : > { %1963 = vmatpush1.bf16.msra.mxu1 %v4270_v29 }
 0x8be   : > { %1964 = vmatprep.subr.bf16.mxu1 %v4276_v30 }
 0x8c1   : > { %1965 = vmatpush1.bf16.msra.mxu1 %v4282_v33 }
 0x8c2   : > { %1966 = vmatprep.subr.bf16.mxu1 %v4288_v34 }
 0x8c5   : > { %1967 = vmatpush1.bf16.msra.mxu1 %v4294_v37 }
 0x8c6   : > { %1968 = vmatprep.subr.bf16.mxu1 %v4300_v38 }
 0x8c9   : > { %1969 = vmatpush1.bf16.msra.mxu1 %v4386_v12 }
 0x8ca   : > { %1970 = vmatprep.subr.bf16.mxu1 %v4392_v15 }
 0x8cd   : > { %1971 = vmatpush1.bf16.msra.mxu1 %v4398_v16 }
 0x8ce   : > { %1972 = vmatprep.subr.bf16.mxu1 %v4404_v58 }
 0x8d1   : > { %1973 = vmatpush1.bf16.msra.mxu1 %v4410_v61 }
 0x8d2   : > { %2072 = vmatprep.subr.bf16.mxu1 %v4121_v0 }
 0x967   : > { %v1846_v10 = vpop.f32.mrb[40].mxu1 }
 0x968   : > { %v1847_v11 = vadd.f32 %v1846_v10, %v3968_v22  ;;  %v1848_v62 = vpop.f32.mrb[41].mxu1 }
 0x969   : > { %v1849_v55 = vadd.f32 %v1848_v62, %v3972_v26  ;;  %v1850_v56 = vpop.f32.mrb[42].mxu1 }
 0x96a   : > { %v1851_v59 = vadd.f32 %v1850_v56, %v3968_v22  ;;  %v1852_v54 = vpop.f32.mrb[43].mxu1  ;;  %v1865_v19 = vmax.f32 %v1847_v11, 0.0 }
 0x96b   : > { %v1853_v41 = vadd.f32 %v1852_v54, %v3972_v26  ;;  %v1866_v1 = vmax.f32 %v1849_v55, 0.0 }
 0x96c   : > { %v1867_v20 = vmax.f32 %v1851_v59, 0.0 }
 0x96d   : > { %v1868_v2 = vmax.f32 %v1853_v41, 0.0 }
 0x96e   : > { %v1873_v23 = vpack.c.bf16 %v1867_v20, %v1865_v19 }
 0x96f   : > { %v1874_v5 = vpack.c.bf16 %v1868_v2, %v1866_v1  ;;  %v1856_v24 = vpop.f32.mrb[44].mxu1 }
 0x970   : > { %v1857_v6 = vadd.f32 %v1856_v24, %v3968_v22  ;;  %v1858_v27 = vpop.f32.mrb[45].mxu1 }
 0x971   : > { %v1859_v8 = vadd.f32 %v1858_v27, %v3972_v26  ;;  %v1860_v28 = vpop.f32.mrb[46].mxu1  ;;  %1909 = vmatprep.mubr.bf16.mxu0 %v1874_v5 }
 0x972   : > { %v1861_v31 = vadd.f32 %v1860_v28, %v3968_v22  ;;  %v1862_v32 = vpop.f32.mrb[47].mxu1  ;;  %1910 = vmatmul.mubr.bf16.vlgmr.msra.gmra.mrb[32].mxu0 %v1873_v23  ;;  %v1869_v36 = vmax.f32 %v1857_v6, 0.0 }
 0x973   : > { %v1863_v35 = vadd.f32 %v1862_v32, %v3972_v26  ;;  %2008 = vmatpush1.bf16.msra.mxu0 %v4065_v46  ;;  %v1870_v40 = vmax.f32 %v1859_v8, 0.0 }
 0x974   : > { %v1871_v39 = vmax.f32 %v1861_v31, 0.0  ;;  %2009 = vmatprep.subr.bf16.mxu0 %v4071_v47 }
 0x975   : > { %v1872_v50 = vmax.f32 %v1863_v35, 0.0 }
 0x976   : > { %v1875_v51 = vpack.c.bf16 %v1871_v39, %v1869_v36 }
 0x977   : > { %v1876_v3 = vpack.c.bf16 %v1872_v50, %v1870_v40  ;;  %2010 = vmatpush1.bf16.msra.mxu0 %v4077_v52 }
 0x978   : > { %2011 = vmatprep.subr.bf16.mxu0 %v4083_v53 }
 0x979   : > { %1919 = vmatprep.mubr.bf16.mxu0 %v1876_v3 }
 0x97a   : > { %1920 = vmatmul.mubr.bf16.gmra.mrb[36].mxu0 %v1875_v51 }
 0x97b   : > { %2012 = vmatpush1.bf16.msra.mxu0 %v4089_v57 }
 0x97c   : > { %2013 = vmatprep.subr.bf16.mxu0 %v4140_v42 }
 0x97f   : > { %2014 = vmatpush1.bf16.msra.mxu0 %v4146_v43 }
 0x980   : > { %2015 = vmatprep.subr.bf16.mxu0 %v4152_v44 }
 0x983   : > { %2016 = vmatpush1.bf16.msra.mxu0 %v4158_v14 }
 0x984   : > { %2017 = vmatprep.subr.bf16.mxu0 %v4164_v45 }
 0x987   : > { %2018 = vmatpush1.bf16.msra.mxu0 %v4170_v13 }
 0x988   : > { %2019 = vmatprep.subr.bf16.mxu0 %v4176_v18 }
 0x98b   : > { %2020 = vmatpush1.bf16.msra.mxu0 %v4182_v48 }
 0x98c   : > { %2021 = vmatprep.subr.bf16.mxu0 %v4188_v49 }
 0x98f   : > { %2022 = vmatpush1.bf16.msra.mxu0 %v4234_v60 }
 0x990   : > { %2023 = vmatprep.subr.bf16.mxu0 %v4240_v63 }
 0x993   : > { %2024 = vmatpush1.bf16.msra.mxu0 %v4246_v9 }
 0x994   : > { %2025 = vmatprep.subr.bf16.mxu0 %v4252_v17 }
 0x997   : > { %2026 = vmatpush1.bf16.msra.mxu0 %v4258_v25 }
 0x998   : > { %2027 = vmatprep.subr.bf16.mxu0 %v4264_v21 }
 0x99b   : > { %2028 = vmatpush1.bf16.msra.mxu0 %v4270_v29 }
 0x99c   : > { %2029 = vmatprep.subr.bf16.mxu0 %v4276_v30 }
 0x99f   : > { %2030 = vmatpush1.bf16.msra.mxu0 %v4282_v33 }
 0x9a0   : > { %2031 = vmatprep.subr.bf16.mxu0 %v4288_v34 }
 0x9a3   : > { %2032 = vmatpush1.bf16.msra.mxu0 %v4294_v37 }
 0x9a4   : > { %2033 = vmatprep.subr.bf16.mxu0 %v4300_v38 }
 0x9a7   : > { %2034 = vmatpush1.bf16.msra.mxu0 %v4386_v12 }
 0x9a8   : > { %2035 = vmatprep.subr.bf16.mxu0 %v4392_v15 }
 0x9ab   : > { %2036 = vmatpush1.bf16.msra.mxu0 %v4398_v16 }
 0x9ac   : > { %2037 = vmatprep.subr.bf16.mxu0 %v4404_v58 }
 0x9af   : > { %2038 = vmatpush1.bf16.msra.mxu0 %v4410_v61 }
 0x9b0   : > { %2137 = vmatprep.subr.bf16.mxu0 %v4121_v0 }
 0xa45   : > { %v1911_v4 = vpop.f32.mrb[32].mxu0 }
 0xa46   : > { %v1912_v7 = vadd.f32 %v1911_v4, %v3968_v22  ;;  %v1913_v10 = vpop.f32.mrb[33].mxu0 }
 0xa47   : > { %v1914_v11 = vadd.f32 %v1913_v10, %v3972_v26  ;;  %v1915_v62 = vpop.f32.mrb[34].mxu0 }
 0xa48   : > { %v1916_v55 = vadd.f32 %v1915_v62, %v3968_v22  ;;  %v1917_v56 = vpop.f32.mrb[35].mxu0  ;;  %v1930_v54 = vmax.f32 %v1912_v7, 0.0 }
 0xa49   : > { %v1918_v59 = vadd.f32 %v1917_v56, %v3972_v26  ;;  %v1931_v19 = vmax.f32 %v1914_v11, 0.0 }
 0xa4a   : > { %v1932_v41 = vmax.f32 %v1916_v55, 0.0 }
 0xa4b   : > { %v1933_v20 = vmax.f32 %v1918_v59, 0.0 }
 0xa4c   : > { %v1938_v1 = vpack.c.bf16 %v1932_v41, %v1930_v54 }
 0xa4d   : > { %v1939_v2 = vpack.c.bf16 %v1933_v20, %v1931_v19  ;;  %v1921_v23 = vpop.f32.mrb[36].mxu0 }
 0xa4e   : > { %v1922_v5 = vadd.f32 %v1921_v23, %v3968_v22  ;;  %v1923_v24 = vpop.f32.mrb[37].mxu0  ;;  %v4545_v23 = vld [vmem:[%s5057_s3] ss:$8 sps:$4 sm:$0xff]  }
 0xa4f   : > { %v1924_v6 = vadd.f32 %v1923_v24, %v3972_v26  ;;  %v1925_v27 = vpop.f32.mrb[38].mxu0  ;;  %1974 = vmatprep.mubr.bf16.mxu1 %v1939_v2 }
 0xa50   : > { %v1926_v8 = vadd.f32 %v1925_v27, %v3968_v22  ;;  %v1927_v28 = vpop.f32.mrb[39].mxu0  ;;  %1975 = vmatmul.mubr.bf16.vlgmr.msra.gmra.mrb[48].mxu1 %v1938_v1  ;;  %v1934_v32 = vmax.f32 %v1922_v5, 0.0 }
 0xa51   : > { %v1928_v31 = vadd.f32 %v1927_v28, %v3972_v26  ;;  %2073 = vmatpush1.bf16.msra.mxu1 %v4065_v46  ;;  %v1935_v36 = vmax.f32 %v1924_v6, 0.0  ;;  %v4551_v6 = vld [vmem:[%s5057_s3 + $0x14] ss:$8 sps:$4 sm:$0xff]  }
 0xa52   : > { %v1936_v35 = vmax.f32 %v1926_v8, 0.0  ;;  %2074 = vmatprep.subr.bf16.mxu1 %v4071_v47 }
 0xa53   : > { %v1937_v39 = vmax.f32 %v1928_v31, 0.0 }
 0xa54   : > { %v1940_v40 = vpack.c.bf16 %v1936_v35, %v1934_v32  ;;  %v4557_v32 = vld [vmem:[%s5057_s3 + $0x10] ss:$8 sps:$4 sm:$0xff]   ;;  %v4563_v35 = vld [vmem:[%s5057_s3 + $0x24] ss:$8 sps:$4 sm:$0xff]  }
 0xa55   : > { %v1941_v50 = vpack.c.bf16 %v1937_v39, %v1935_v36  ;;  %2075 = vmatpush1.bf16.msra.mxu1 %v4077_v52  ;;  %v4569_v36 = vld [vmem:[%s5057_s3 + $0x20] ss:$8 sps:$4 sm:$0xff]  }
 0xa56   : > { %2076 = vmatprep.subr.bf16.mxu1 %v4083_v53 }
 0xa57   : > { %1984 = vmatprep.mubr.bf16.mxu1 %v1941_v50 }
 0xa58   : > { %1985 = vmatmul.mubr.bf16.gmra.mrb[52].mxu1 %v1940_v40 }
 0xa59   : > { %2077 = vmatpush1.bf16.msra.mxu1 %v4089_v57 }
 0xa5a   : > { %2078 = vmatprep.subr.bf16.mxu1 %v4140_v42 }
 0xa5d   : > { %2079 = vmatpush1.bf16.msra.mxu1 %v4146_v43 }
 0xa5e   : > { %2080 = vmatprep.subr.bf16.mxu1 %v4152_v44 }
 0xa61   : > { %2081 = vmatpush1.bf16.msra.mxu1 %v4158_v14 }
 0xa62   : > { %2082 = vmatprep.subr.bf16.mxu1 %v4164_v45 }
 0xa65   : > { %2083 = vmatpush1.bf16.msra.mxu1 %v4170_v13 }
 0xa66   : > { %2084 = vmatprep.subr.bf16.mxu1 %v4176_v18 }
 0xa69   : > { %2085 = vmatpush1.bf16.msra.mxu1 %v4182_v48 }
 0xa6a   : > { %2086 = vmatprep.subr.bf16.mxu1 %v4188_v49 }
 0xa6d   : > { %2087 = vmatpush1.bf16.msra.mxu1 %v4234_v60 }
 0xa6e   : > { %2088 = vmatprep.subr.bf16.mxu1 %v4240_v63 }
 0xa71   : > { %2089 = vmatpush1.bf16.msra.mxu1 %v4246_v9 }
 0xa72   : > { %2090 = vmatprep.subr.bf16.mxu1 %v4252_v17 }
 0xa75   : > { %2091 = vmatpush1.bf16.msra.mxu1 %v4258_v25 }
 0xa76   : > { %2092 = vmatprep.subr.bf16.mxu1 %v4264_v21 }
 0xa79   : > { %2093 = vmatpush1.bf16.msra.mxu1 %v4270_v29 }
 0xa7a   : > { %2094 = vmatprep.subr.bf16.mxu1 %v4276_v30 }
 0xa7d   : > { %2095 = vmatpush1.bf16.msra.mxu1 %v4282_v33 }
 0xa7e   : > { %2096 = vmatprep.subr.bf16.mxu1 %v4288_v34 }
 0xa81   : > { %2097 = vmatpush1.bf16.msra.mxu1 %v4294_v37 }
 0xa82   : > { %2098 = vmatprep.subr.bf16.mxu1 %v4300_v38 }
 0xa85   : > { %2099 = vmatpush1.bf16.msra.mxu1 %v4386_v12 }
 0xa86   : > { %2100 = vmatprep.subr.bf16.mxu1 %v4392_v15 }
 0xa89   : > { %2101 = vmatpush1.bf16.msra.mxu1 %v4398_v16 }
 0xa8a   : > { %2102 = vmatprep.subr.bf16.mxu1 %v4404_v58 }
 0xa8d   : > { %2103 = vmatpush1.bf16.msra.mxu1 %v4410_v61 }
 0xa8e   : > { %2202 = vmatprep.subr.bf16.mxu1 %v4121_v0 }
 0xb23   : > { %v1976_v46 = vpop.f32.mrb[48].mxu1 }
 0xb24   : > { %v1977_v47 = vadd.f32 %v1976_v46, %v3968_v22  ;;  %v1978_v52 = vpop.f32.mrb[49].mxu1 }
 0xb25   : > { %v1979_v53 = vadd.f32 %v1978_v52, %v3972_v26  ;;  %v1980_v57 = vpop.f32.mrb[50].mxu1 }
 0xb26   : > { %v1981_v51 = vadd.f32 %v1980_v57, %v3968_v22  ;;  %v1982_v3 = vpop.f32.mrb[51].mxu1  ;;  %v1995_v7 = vmax.f32 %v1977_v47, 0.0 }
 0xb27   : > { %v1983_v4 = vadd.f32 %v1982_v3, %v3972_v26  ;;  %v1996_v11 = vmax.f32 %v1979_v53, 0.0 }
 0xb28   : > { %v1997_v10 = vmax.f32 %v1981_v51, 0.0 }
 0xb29   : > { %v1998_v62 = vmax.f32 %v1983_v4, 0.0 }
 0xb2a   : > { %v2003_v55 = vpack.c.bf16 %v1997_v10, %v1995_v7 }
 0xb2b   : > { %v2004_v56 = vpack.c.bf16 %v1998_v62, %v1996_v11  ;;  %v1986_v59 = vpop.f32.mrb[52].mxu1 }
 0xb2c   : > { %v1987_v0 = vadd.f32 %v1986_v59, %v3968_v22  ;;  %v1988_v54 = vpop.f32.mrb[53].mxu1 }
 0xb2d   : > { %v1989_v41 = vadd.f32 %v1988_v54, %v3972_v26  ;;  %v1990_v19 = vpop.f32.mrb[54].mxu1  ;;  %2039 = vmatprep.mubr.bf16.mxu0 %v2004_v56 }
 0xb2e   : > { %v1991_v20 = vadd.f32 %v1990_v19, %v3968_v22  ;;  %v1992_v1 = vpop.f32.mrb[55].mxu1  ;;  %2040 = vmatmul.mubr.bf16.vlgmr.msra.gmra.mrb[40].mxu0 %v2003_v55  ;;  %v1999_v5 = vmax.f32 %v1987_v0, 0.0  ;;  %v4626_v19 = vld [vmem:[%s5057_s3 + $0x30] ss:$8 sps:$4 sm:$0xff]  }
 0xb2f   : > { %v1993_v2 = vadd.f32 %v1992_v1, %v3972_v26  ;;  %2138 = vmatpush1.bf16.msra.mxu0 %v4545_v23  ;;  %v2000_v27 = vmax.f32 %v1989_v41, 0.0  ;;  %v4620_v41 = vld [vmem:[%s5057_s3 + $0x34] ss:$8 sps:$4 sm:$0xff]   ;;  %v4638_v1 = vld [vmem:[%s5057_s3 + $0x40] ss:$8 sps:$4 sm:$0xff]  }
 0xb30   : > { %v2001_v24 = vmax.f32 %v1991_v20, 0.0  ;;  %2139 = vmatprep.subr.bf16.mxu0 %v4551_v6  ;;  %v4632_v20 = vld [vmem:[%s5057_s3 + $0x44] ss:$8 sps:$4 sm:$0xff]  }
 0xb31   : > { %v2002_v8 = vmax.f32 %v1993_v2, 0.0  ;;  %v4644_v2 = vld [vmem:[%s5057_s3 + $0x54] ss:$8 sps:$4 sm:$0xff]  }
 0xb32   : > { %v2005_v28 = vpack.c.bf16 %v2001_v24, %v1999_v5  ;;  %v4650_v5 = vld [vmem:[%s5057_s3 + $0x50] ss:$8 sps:$4 sm:$0xff]   ;;  %v4656_v24 = vld [vmem:[%s5057_s3 + $0x64] ss:$8 sps:$4 sm:$0xff]  }
 0xb33   : > { %v2006_v31 = vpack.c.bf16 %v2002_v8, %v2000_v27  ;;  %2140 = vmatpush1.bf16.msra.mxu0 %v4557_v32  ;;  %v4662_v27 = vld [vmem:[%s5057_s3 + $0x60] ss:$8 sps:$4 sm:$0xff]   ;;  %v4668_v8 = vld [vmem:[%s5057_s3 + $0x74] ss:$8 sps:$4 sm:$0xff]  }
 0xb34   : > { %2141 = vmatprep.subr.bf16.mxu0 %v4563_v35 }
 0xb35   : > { %2049 = vmatprep.mubr.bf16.mxu0 %v2006_v31 }
 0xb36   : > { %2050 = vmatmul.mubr.bf16.gmra.mrb[44].mxu0 %v2005_v28 }
 0xb37   : > { %2142 = vmatpush1.bf16.msra.mxu0 %v4569_v36 }
 0xb38   : > { %2143 = vmatprep.subr.bf16.mxu0 %v4140_v42  ;;  %v4601_v42 = vld [vmem:[%s5057_s3 + $0x4] ss:$8 sps:$4 sm:$0xff]  }
 0xb3b   : > { %2144 = vmatpush1.bf16.msra.mxu0 %v4146_v43 }
 0xb3c   : > { %2145 = vmatprep.subr.bf16.mxu0 %v4152_v44 }
 0xb3f   : > { %2146 = vmatpush1.bf16.msra.mxu0 %v4158_v14 }
 0xb40   : > { %2147 = vmatprep.subr.bf16.mxu0 %v4164_v45 }
 0xb43   : > { %2148 = vmatpush1.bf16.msra.mxu0 %v4170_v13 }
 0xb44   : > { %2149 = vmatprep.subr.bf16.mxu0 %v4176_v18 }
 0xb47   : > { %2150 = vmatpush1.bf16.msra.mxu0 %v4182_v48 }
 0xb48   : > { %2151 = vmatprep.subr.bf16.mxu0 %v4188_v49 }
 0xb4b   : > { %2152 = vmatpush1.bf16.msra.mxu0 %v4234_v60 }
 0xb4c   : > { %2153 = vmatprep.subr.bf16.mxu0 %v4240_v63 }
 0xb4f   : > { %2154 = vmatpush1.bf16.msra.mxu0 %v4246_v9 }
 0xb50   : > { %2155 = vmatprep.subr.bf16.mxu0 %v4252_v17 }
 0xb53   : > { %2156 = vmatpush1.bf16.msra.mxu0 %v4258_v25 }
 0xb54   : > { %2157 = vmatprep.subr.bf16.mxu0 %v4264_v21 }
 0xb57   : > { %2158 = vmatpush1.bf16.msra.mxu0 %v4270_v29 }
 0xb58   : > { %2159 = vmatprep.subr.bf16.mxu0 %v4276_v30 }
 0xb5b   : > { %2160 = vmatpush1.bf16.msra.mxu0 %v4282_v33 }
 0xb5c   : > { %2161 = vmatprep.subr.bf16.mxu0 %v4288_v34 }
 0xb5f   : > { %2162 = vmatpush1.bf16.msra.mxu0 %v4294_v37 }
 0xb60   : > { %2163 = vmatprep.subr.bf16.mxu0 %v4300_v38 }
 0xb63   : > { %2164 = vmatpush1.bf16.msra.mxu0 %v4386_v12 }
 0xb64   : > { %2165 = vmatprep.subr.bf16.mxu0 %v4392_v15 }
 0xb67   : > { %2166 = vmatpush1.bf16.msra.mxu0 %v4398_v16 }
 0xb68   : > { %2167 = vmatprep.subr.bf16.mxu0 %v4404_v58 }
 0xb6b   : > { %2168 = vmatpush1.bf16.msra.mxu0 %v4410_v61 }
 0xb6c   : > { %2267 = vmatprep.subr.bf16.mxu0 %v4601_v42 }
 0xc01   : > { %v2041_v43 = vpop.f32.mrb[40].mxu0 }
 0xc02   : > { %v2042_v44 = vadd.f32 %v2041_v43, %v3968_v22  ;;  %v2043_v14 = vpop.f32.mrb[41].mxu0 }
 0xc03   : > { %v2044_v45 = vadd.f32 %v2043_v14, %v3972_v26  ;;  %v2045_v13 = vpop.f32.mrb[42].mxu0 }
 0xc04   : > { %v2046_v18 = vadd.f32 %v2045_v13, %v3968_v22  ;;  %v2047_v48 = vpop.f32.mrb[43].mxu0  ;;  %v2060_v39 = vmax.f32 %v2042_v44, 0.0 }
 0xc05   : > { %v2048_v49 = vadd.f32 %v2047_v48, %v3972_v26  ;;  %v2061_v50 = vmax.f32 %v2044_v45, 0.0 }
 0xc06   : > { %v2062_v40 = vmax.f32 %v2046_v18, 0.0 }
 0xc07   : > { %v2063_v46 = vmax.f32 %v2048_v49, 0.0 }
 0xc08   : > { %v2068_v47 = vpack.c.bf16 %v2062_v40, %v2060_v39 }
 0xc09   : > { %v2069_v52 = vpack.c.bf16 %v2063_v46, %v2061_v50  ;;  %v2051_v53 = vpop.f32.mrb[44].mxu0 }
 0xc0a   : > { %v2052_v57 = vadd.f32 %v2051_v53, %v3968_v22  ;;  %v2053_v51 = vpop.f32.mrb[45].mxu0  ;;  %v4714_v53 = vld [vmem:[%s5057_s3 + $0x70] ss:$8 sps:$4 sm:$0xff]  }
 0xc0b   : > { %v2054_v3 = vadd.f32 %v2053_v51, %v3972_v26  ;;  %v2055_v4 = vpop.f32.mrb[46].mxu0  ;;  %2104 = vmatprep.mubr.bf16.mxu1 %v2069_v52  ;;  %v4726_v51 = vld [vmem:[%s5057_s3 + $0x80] ss:$8 sps:$4 sm:$0xff]  }
 0xc0c   : > { %v2056_v7 = vadd.f32 %v2055_v4, %v3968_v22  ;;  %v2057_v10 = vpop.f32.mrb[47].mxu0  ;;  %2105 = vmatmul.mubr.bf16.vlgmr.msra.gmra.mrb[56].mxu1 %v2068_v47  ;;  %v2064_v62 = vmax.f32 %v2052_v57, 0.0  ;;  %v4720_v57 = vld [vmem:[%s5057_s3 + $0x84] ss:$8 sps:$4 sm:$0xff]   ;;  %v4738_v4 = vld [vmem:[%s5057_s3 + $0x90] ss:$8 sps:$4 sm:$0xff]  }
 0xc0d   : > { %v2058_v11 = vadd.f32 %v2057_v10, %v3972_v26  ;;  %2203 = vmatpush1.bf16.msra.mxu1 %v4545_v23  ;;  %v2065_v56 = vmax.f32 %v2054_v3, 0.0  ;;  %v4732_v3 = vld [vmem:[%s5057_s3 + $0x94] ss:$8 sps:$4 sm:$0xff]   ;;  %v4750_v10 = vld [vmem:[%s5057_s3 + $0xa0] ss:$8 sps:$4 sm:$0xff]  }
 0xc0e   : > { %v2066_v55 = vmax.f32 %v2056_v7, 0.0  ;;  %2204 = vmatprep.subr.bf16.mxu1 %v4551_v6  ;;  %v4744_v7 = vld [vmem:[%s5057_s3 + $0xa4] ss:$8 sps:$4 sm:$0xff]  }
 0xc0f   : > { %v2067_v59 = vmax.f32 %v2058_v11, 0.0  ;;  %v4756_v11 = vld [vmem:[%s5057_s3 + $0xb4] ss:$8 sps:$4 sm:$0xff]  }
 0xc10   : > { %v2070_v0 = vpack.c.bf16 %v2066_v55, %v2064_v62  ;;  %v4762_v62 = vld [vmem:[%s5057_s3 + $0xb0] ss:$8 sps:$4 sm:$0xff]   ;;  %v4768_v55 = vld [vmem:[%s5057_s3 + $0xc4] ss:$8 sps:$4 sm:$0xff]  }
 0xc11   : > { %v2071_v54 = vpack.c.bf16 %v2067_v59, %v2065_v56  ;;  %2205 = vmatpush1.bf16.msra.mxu1 %v4557_v32  ;;  %v4774_v56 = vld [vmem:[%s5057_s3 + $0xc0] ss:$8 sps:$4 sm:$0xff]   ;;  %v4780_v59 = vld [vmem:[%s5057_s3 + $0xd4] ss:$8 sps:$4 sm:$0xff]  }
 0xc12   : > { %2206 = vmatprep.subr.bf16.mxu1 %v4563_v35 }
 0xc13   : > { %2114 = vmatprep.mubr.bf16.mxu1 %v2071_v54 }
 0xc14   : > { %2115 = vmatmul.mubr.bf16.gmra.mrb[60].mxu1 %v2070_v0 }
 0xc15   : > { %2207 = vmatpush1.bf16.msra.mxu1 %v4569_v36 }
 0xc16   : > { %2208 = vmatprep.subr.bf16.mxu1 %v4620_v41 }
 0xc19   : > { %2209 = vmatpush1.bf16.msra.mxu1 %v4626_v19 }
 0xc1a   : > { %2210 = vmatprep.subr.bf16.mxu1 %v4632_v20 }
 0xc1d   : > { %2211 = vmatpush1.bf16.msra.mxu1 %v4638_v1 }
 0xc1e   : > { %2212 = vmatprep.subr.bf16.mxu1 %v4644_v2 }
 0xc21   : > { %2213 = vmatpush1.bf16.msra.mxu1 %v4650_v5 }
 0xc22   : > { %2214 = vmatprep.subr.bf16.mxu1 %v4656_v24 }
 0xc25   : > { %2215 = vmatpush1.bf16.msra.mxu1 %v4662_v27 }
 0xc26   : > { %2216 = vmatprep.subr.bf16.mxu1 %v4668_v8 }
 0xc29   : > { %2217 = vmatpush1.bf16.msra.mxu1 %v4234_v60 }
 0xc2a   : > { %2218 = vmatprep.subr.bf16.mxu1 %v4240_v63 }
 0xc2d   : > { %2219 = vmatpush1.bf16.msra.mxu1 %v4246_v9 }
 0xc2e   : > { %2220 = vmatprep.subr.bf16.mxu1 %v4252_v17 }
 0xc31   : > { %2221 = vmatpush1.bf16.msra.mxu1 %v4258_v25 }
 0xc32   : > { %2222 = vmatprep.subr.bf16.mxu1 %v4264_v21 }
 0xc35   : > { %2223 = vmatpush1.bf16.msra.mxu1 %v4270_v29 }
 0xc36   : > { %2224 = vmatprep.subr.bf16.mxu1 %v4276_v30 }
 0xc39   : > { %2225 = vmatpush1.bf16.msra.mxu1 %v4282_v33 }
 0xc3a   : > { %2226 = vmatprep.subr.bf16.mxu1 %v4288_v34 }
 0xc3d   : > { %2227 = vmatpush1.bf16.msra.mxu1 %v4294_v37 }
 0xc3e   : > { %2228 = vmatprep.subr.bf16.mxu1 %v4300_v38 }
 0xc41   : > { %2229 = vmatpush1.bf16.msra.mxu1 %v4386_v12 }
 0xc42   : > { %2230 = vmatprep.subr.bf16.mxu1 %v4392_v15 }
 0xc45   : > { %2231 = vmatpush1.bf16.msra.mxu1 %v4398_v16 }
 0xc46   : > { %2232 = vmatprep.subr.bf16.mxu1 %v4404_v58 }
 0xc49   : > { %2233 = vmatpush1.bf16.msra.mxu1 %v4410_v61 }
 0xc4a   : > { %2332 = vmatprep.subr.bf16.mxu1 %v4601_v42 }
 0xcdf   : > { %v2106_v60 = vpop.f32.mrb[56].mxu1 }
 0xce0   : > { %v2107_v63 = vadd.f32 %v2106_v60, %v3968_v22  ;;  %v2108_v9 = vpop.f32.mrb[57].mxu1 }
 0xce1   : > { %v2109_v17 = vadd.f32 %v2108_v9, %v3972_v26  ;;  %v2110_v25 = vpop.f32.mrb[58].mxu1 }
 0xce2   : > { %v2111_v21 = vadd.f32 %v2110_v25, %v3968_v22  ;;  %v2112_v29 = vpop.f32.mrb[59].mxu1  ;;  %v2125_v33 = vmax.f32 %v2107_v63, 0.0 }
 0xce3   : > { %v2113_v30 = vadd.f32 %v2112_v29, %v3972_v26  ;;  %v2126_v37 = vmax.f32 %v2109_v17, 0.0 }
 0xce4   : > { %v2127_v34 = vmax.f32 %v2111_v21, 0.0 }
 0xce5   : > { %v2128_v38 = vmax.f32 %v2113_v30, 0.0 }
 0xce6   : > { %v2133_v28 = vpack.c.bf16 %v2127_v34, %v2125_v33 }
 0xce7   : > { %v2134_v31 = vpack.c.bf16 %v2128_v38, %v2126_v37  ;;  %v2116_v43 = vpop.f32.mrb[60].mxu1 }
 0xce8   : > { %v2117_v44 = vadd.f32 %v2116_v43, %v3968_v22  ;;  %v2118_v14 = vpop.f32.mrb[61].mxu1 }
 0xce9   : > { %v2119_v45 = vadd.f32 %v2118_v14, %v3972_v26  ;;  %v2120_v13 = vpop.f32.mrb[62].mxu1  ;;  %2169 = vmatprep.mubr.bf16.mxu0 %v2134_v31 }
 0xcea   : > { %v2121_v18 = vadd.f32 %v2120_v13, %v3968_v22  ;;  %v2122_v48 = vpop.f32.mrb[63].mxu1  ;;  %2170 = vmatmul.mubr.bf16.vlgmr.msra.gmra.mrb[48].mxu0 %v2133_v28  ;;  %v2129_v39 = vmax.f32 %v2117_v44, 0.0 }
 0xceb   : > { %v2123_v49 = vadd.f32 %v2122_v48, %v3972_v26  ;;  %2268 = vmatpush1.bf16.msra.mxu0 %v4545_v23  ;;  %v2130_v50 = vmax.f32 %v2119_v45, 0.0 }
 0xcec   : > { %v2131_v40 = vmax.f32 %v2121_v18, 0.0  ;;  %2269 = vmatprep.subr.bf16.mxu0 %v4551_v6 }
 0xced   : > { %v2132_v46 = vmax.f32 %v2123_v49, 0.0 }
 0xcee   : > { %v2135_v47 = vpack.c.bf16 %v2131_v40, %v2129_v39 }
 0xcef   : > { %v2136_v52 = vpack.c.bf16 %v2132_v46, %v2130_v50  ;;  %2270 = vmatpush1.bf16.msra.mxu0 %v4557_v32 }
 0xcf0   : > { %2271 = vmatprep.subr.bf16.mxu0 %v4563_v35 }
 0xcf1   : > { %2179 = vmatprep.mubr.bf16.mxu0 %v2136_v52 }
 0xcf2   : > { %2180 = vmatmul.mubr.bf16.gmra.mrb[52].mxu0 %v2135_v47 }
 0xcf3   : > { %2272 = vmatpush1.bf16.msra.mxu0 %v4569_v36 }
 0xcf4   : > { %2273 = vmatprep.subr.bf16.mxu0 %v4620_v41 }
 0xcf7   : > { %2274 = vmatpush1.bf16.msra.mxu0 %v4626_v19 }
 0xcf8   : > { %2275 = vmatprep.subr.bf16.mxu0 %v4632_v20 }
 0xcfb   : > { %2276 = vmatpush1.bf16.msra.mxu0 %v4638_v1 }
 0xcfc   : > { %2277 = vmatprep.subr.bf16.mxu0 %v4644_v2 }
 0xcff   : > { %2278 = vmatpush1.bf16.msra.mxu0 %v4650_v5 }
 0xd00   : > { %2279 = vmatprep.subr.bf16.mxu0 %v4656_v24 }
 0xd03   : > { %2280 = vmatpush1.bf16.msra.mxu0 %v4662_v27 }
 0xd04   : > { %2281 = vmatprep.subr.bf16.mxu0 %v4668_v8 }
 0xd07   : > { %2282 = vmatpush1.bf16.msra.mxu0 %v4714_v53 }
 0xd08   : > { %2283 = vmatprep.subr.bf16.mxu0 %v4720_v57 }
 0xd0b   : > { %2284 = vmatpush1.bf16.msra.mxu0 %v4726_v51 }
 0xd0c   : > { %2285 = vmatprep.subr.bf16.mxu0 %v4732_v3 }
 0xd0f   : > { %2286 = vmatpush1.bf16.msra.mxu0 %v4738_v4 }
 0xd10   : > { %2287 = vmatprep.subr.bf16.mxu0 %v4744_v7 }
 0xd13   : > { %2288 = vmatpush1.bf16.msra.mxu0 %v4750_v10 }
 0xd14   : > { %2289 = vmatprep.subr.bf16.mxu0 %v4756_v11 }
 0xd17   : > { %2290 = vmatpush1.bf16.msra.mxu0 %v4762_v62 }
 0xd18   : > { %2291 = vmatprep.subr.bf16.mxu0 %v4768_v55 }
 0xd1b   : > { %2292 = vmatpush1.bf16.msra.mxu0 %v4774_v56 }
 0xd1c   : > { %2293 = vmatprep.subr.bf16.mxu0 %v4780_v59 }
 0xd1f   : > { %2294 = vmatpush1.bf16.msra.mxu0 %v4386_v12 }
 0xd20   : > { %2295 = vmatprep.subr.bf16.mxu0 %v4392_v15 }
 0xd23   : > { %2296 = vmatpush1.bf16.msra.mxu0 %v4398_v16 }
 0xd24   : > { %2297 = vmatprep.subr.bf16.mxu0 %v4404_v58 }
 0xd27   : > { %2298 = vmatpush1.bf16.msra.mxu0 %v4410_v61 }
 0xd28   : > { %2397 = vmatprep.subr.bf16.mxu0 %v4601_v42 }
 0xdbd   : > { %v2171_v0 = vpop.f32.mrb[48].mxu0 }
 0xdbe   : > { %v2172_v54 = vadd.f32 %v2171_v0, %v3968_v22  ;;  %v2173_v60 = vpop.f32.mrb[49].mxu0 }
 0xdbf   : > { %v2174_v63 = vadd.f32 %v2173_v60, %v3972_v26  ;;  %v2175_v9 = vpop.f32.mrb[50].mxu0 }
 0xdc0   : > { %v2176_v17 = vadd.f32 %v2175_v9, %v3968_v22  ;;  %v2177_v25 = vpop.f32.mrb[51].mxu0  ;;  %v2190_v29 = vmax.f32 %v2172_v54, 0.0 }
 0xdc1   : > { %v2178_v21 = vadd.f32 %v2177_v25, %v3972_v26  ;;  %v2191_v33 = vmax.f32 %v2174_v63, 0.0 }
 0xdc2   : > { %v2192_v30 = vmax.f32 %v2176_v17, 0.0 }
 0xdc3   : > { %v2193_v34 = vmax.f32 %v2178_v21, 0.0 }
 0xdc4   : > { %v2198_v37 = vpack.c.bf16 %v2192_v30, %v2190_v29 }
 0xdc5   : > { %v2199_v38 = vpack.c.bf16 %v2193_v34, %v2191_v33  ;;  %v2181_v28 = vpop.f32.mrb[52].mxu0 }
 0xdc6   : > { %v2182_v31 = vadd.f32 %v2181_v28, %v3968_v22  ;;  %v2183_v43 = vpop.f32.mrb[53].mxu0 }
 0xdc7   : > { %v2184_v44 = vadd.f32 %v2183_v43, %v3972_v26  ;;  %v2185_v14 = vpop.f32.mrb[54].mxu0  ;;  %2234 = vmatprep.mubr.bf16.mxu1 %v2199_v38 }
 0xdc8   : > { %v2186_v45 = vadd.f32 %v2185_v14, %v3968_v22  ;;  %v2187_v13 = vpop.f32.mrb[55].mxu0  ;;  %2235 = vmatmul.mubr.bf16.vlgmr.msra.gmra.mrb[64].mxu1 %v2198_v37  ;;  %v2194_v48 = vmax.f32 %v2182_v31, 0.0 }
 0xdc9   : > { %v2188_v18 = vadd.f32 %v2187_v13, %v3972_v26  ;;  %2333 = vmatpush1.bf16.msra.mxu1 %v4545_v23  ;;  %v2195_v39 = vmax.f32 %v2184_v44, 0.0 }
 0xdca   : > { %v2196_v49 = vmax.f32 %v2186_v45, 0.0  ;;  %2334 = vmatprep.subr.bf16.mxu1 %v4551_v6 }
 0xdcb   : > { %v2197_v40 = vmax.f32 %v2188_v18, 0.0  ;;  %v4866_v18 = vld [vmem:[%s5057_s3 + $0xd0] ss:$8 sps:$4 sm:$0xff]  }
 0xdcc   : > { %v2200_v50 = vpack.c.bf16 %v2196_v49, %v2194_v48  ;;  %v4872_v48 = vld [vmem:[%s5057_s3 + $0xe4] ss:$8 sps:$4 sm:$0xff]   ;;  %v4878_v49 = vld [vmem:[%s5057_s3 + $0xe0] ss:$8 sps:$4 sm:$0xff]  }
 0xdcd   : > { %v2201_v46 = vpack.c.bf16 %v2197_v40, %v2195_v39  ;;  %2335 = vmatpush1.bf16.msra.mxu1 %v4557_v32  ;;  %v4884_v39 = vld [vmem:[%s5057_s3 + $0xf4] ss:$8 sps:$4 sm:$0xff]   ;;  %v4890_v40 = vld [vmem:[%s5057_s3 + $0xf0] ss:$8 sps:$4 sm:$0xff]  }
 0xdce   : > { %2336 = vmatprep.subr.bf16.mxu1 %v4563_v35 }
 0xdcf   : > { %2244 = vmatprep.mubr.bf16.mxu1 %v2201_v46 }
 0xdd0   : > { %2245 = vmatmul.mubr.bf16.gmra.mrb[68].mxu1 %v2200_v50 }
 0xdd1   : > { %2337 = vmatpush1.bf16.msra.mxu1 %v4569_v36 }
 0xdd2   : > { %2338 = vmatprep.subr.bf16.mxu1 %v4620_v41 }
 0xdd5   : > { %2339 = vmatpush1.bf16.msra.mxu1 %v4626_v19 }
 0xdd6   : > { %2340 = vmatprep.subr.bf16.mxu1 %v4632_v20 }
 0xdd9   : > { %2341 = vmatpush1.bf16.msra.mxu1 %v4638_v1 }
 0xdda   : > { %2342 = vmatprep.subr.bf16.mxu1 %v4644_v2 }
 0xddd   : > { %2343 = vmatpush1.bf16.msra.mxu1 %v4650_v5 }
 0xdde   : > { %2344 = vmatprep.subr.bf16.mxu1 %v4656_v24 }
 0xde1   : > { %2345 = vmatpush1.bf16.msra.mxu1 %v4662_v27 }
 0xde2   : > { %2346 = vmatprep.subr.bf16.mxu1 %v4668_v8 }
 0xde5   : > { %2347 = vmatpush1.bf16.msra.mxu1 %v4714_v53 }
 0xde6   : > { %2348 = vmatprep.subr.bf16.mxu1 %v4720_v57 }
 0xde9   : > { %2349 = vmatpush1.bf16.msra.mxu1 %v4726_v51 }
 0xdea   : > { %2350 = vmatprep.subr.bf16.mxu1 %v4732_v3 }
 0xded   : > { %2351 = vmatpush1.bf16.msra.mxu1 %v4738_v4 }
 0xdee   : > { %2352 = vmatprep.subr.bf16.mxu1 %v4744_v7 }
 0xdf1   : > { %2353 = vmatpush1.bf16.msra.mxu1 %v4750_v10 }
 0xdf2   : > { %2354 = vmatprep.subr.bf16.mxu1 %v4756_v11 }
 0xdf5   : > { %2355 = vmatpush1.bf16.msra.mxu1 %v4762_v62 }
 0xdf6   : > { %2356 = vmatprep.subr.bf16.mxu1 %v4768_v55 }
 0xdf9   : > { %2357 = vmatpush1.bf16.msra.mxu1 %v4774_v56 }
 0xdfa   : > { %2358 = vmatprep.subr.bf16.mxu1 %v4780_v59 }
 0xdfd   : > { %2359 = vmatpush1.bf16.msra.mxu1 %v4386_v12 }
 0xdfe   : > { %2360 = vmatprep.subr.bf16.mxu1 %v4392_v15 }
 0xe01   : > { %2361 = vmatpush1.bf16.msra.mxu1 %v4398_v16 }
 0xe02   : > { %2362 = vmatprep.subr.bf16.mxu1 %v4404_v58 }
 0xe05   : > { %2363 = vmatpush1.bf16.msra.mxu1 %v4410_v61 }
 0xe06   : > { %2462 = vmatprep.subr.bf16.mxu1 %v4601_v42 }
 0xe9b   : > { %v2236_v47 = vpop.f32.mrb[64].mxu1 }
 0xe9c   : > { %v2237_v52 = vadd.f32 %v2236_v47, %v3968_v22  ;;  %v2238_v0 = vpop.f32.mrb[65].mxu1 }
 0xe9d   : > { %v2239_v54 = vadd.f32 %v2238_v0, %v3972_v26  ;;  %v2240_v60 = vpop.f32.mrb[66].mxu1 }
 0xe9e   : > { %v2241_v63 = vadd.f32 %v2240_v60, %v3968_v22  ;;  %v2242_v12 = vpop.f32.mrb[67].mxu1  ;;  %v2255_v9 = vmax.f32 %v2237_v52, 0.0 }
 0xe9f   : > { %v2243_v15 = vadd.f32 %v2242_v12, %v3972_v26  ;;  %v2256_v17 = vmax.f32 %v2239_v54, 0.0 }
 0xea0   : > { %v2257_v16 = vmax.f32 %v2241_v63, 0.0 }
 0xea1   : > { %v2258_v58 = vmax.f32 %v2243_v15, 0.0 }
 0xea2   : > { %v2263_v25 = vpack.c.bf16 %v2257_v16, %v2255_v9 }
 0xea3   : > { %v2264_v61 = vpack.c.bf16 %v2258_v58, %v2256_v17  ;;  %v2246_v21 = vpop.f32.mrb[68].mxu1 }
 0xea4   : > { %v2247_v29 = vadd.f32 %v2246_v21, %v3968_v22  ;;  %v2248_v30 = vpop.f32.mrb[69].mxu1 }
 0xea5   : > { %v2249_v33 = vadd.f32 %v2248_v30, %v3972_v26  ;;  %v2250_v34 = vpop.f32.mrb[70].mxu1  ;;  %2299 = vmatprep.mubr.bf16.mxu0 %v2264_v61 }
 0xea6   : > { %v2251_v37 = vadd.f32 %v2250_v34, %v3968_v22  ;;  %v2252_v38 = vpop.f32.mrb[71].mxu1  ;;  %2300 = vmatmul.mubr.bf16.vlgmr.msra.gmra.mrb[56].mxu0 %v2263_v25  ;;  %v2259_v31 = vmax.f32 %v2247_v29, 0.0 }
 0xea7   : > { %v2253_v28 = vadd.f32 %v2252_v38, %v3972_v26  ;;  %2398 = vmatpush1.bf16.msra.mxu0 %v4545_v23  ;;  %v2260_v44 = vmax.f32 %v2249_v33, 0.0 }
 0xea8   : > { %v2261_v43 = vmax.f32 %v2251_v37, 0.0  ;;  %2399 = vmatprep.subr.bf16.mxu0 %v4551_v6 }
 0xea9   : > { %v2262_v14 = vmax.f32 %v2253_v28, 0.0 }
 0xeaa   : > { %v2265_v45 = vpack.c.bf16 %v2261_v43, %v2259_v31 }
 0xeab   : > { %v2266_v13 = vpack.c.bf16 %v2262_v14, %v2260_v44  ;;  %2400 = vmatpush1.bf16.msra.mxu0 %v4557_v32 }
 0xeac   : > { %2401 = vmatprep.subr.bf16.mxu0 %v4563_v35 }
 0xead   : > { %2309 = vmatprep.mubr.bf16.mxu0 %v2266_v13 }
 0xeae   : > { %2310 = vmatmul.mubr.bf16.gmra.mrb[60].mxu0 %v2265_v45 }
 0xeaf   : > { %2402 = vmatpush1.bf16.msra.mxu0 %v4569_v36 }
 0xeb0   : > { %2403 = vmatprep.subr.bf16.mxu0 %v4620_v41 }
 0xeb3   : > { %2404 = vmatpush1.bf16.msra.mxu0 %v4626_v19 }
 0xeb4   : > { %2405 = vmatprep.subr.bf16.mxu0 %v4632_v20 }
 0xeb7   : > { %2406 = vmatpush1.bf16.msra.mxu0 %v4638_v1 }
 0xeb8   : > { %2407 = vmatprep.subr.bf16.mxu0 %v4644_v2 }
 0xebb   : > { %2408 = vmatpush1.bf16.msra.mxu0 %v4650_v5 }
 0xebc   : > { %2409 = vmatprep.subr.bf16.mxu0 %v4656_v24 }
 0xebf   : > { %2410 = vmatpush1.bf16.msra.mxu0 %v4662_v27 }
 0xec0   : > { %2411 = vmatprep.subr.bf16.mxu0 %v4668_v8 }
 0xec3   : > { %2412 = vmatpush1.bf16.msra.mxu0 %v4714_v53 }
 0xec4   : > { %2413 = vmatprep.subr.bf16.mxu0 %v4720_v57 }
 0xec7   : > { %2414 = vmatpush1.bf16.msra.mxu0 %v4726_v51 }
 0xec8   : > { %2415 = vmatprep.subr.bf16.mxu0 %v4732_v3 }
 0xecb   : > { %2416 = vmatpush1.bf16.msra.mxu0 %v4738_v4 }
 0xecc   : > { %2417 = vmatprep.subr.bf16.mxu0 %v4744_v7 }
 0xecf   : > { %2418 = vmatpush1.bf16.msra.mxu0 %v4750_v10 }
 0xed0   : > { %2419 = vmatprep.subr.bf16.mxu0 %v4756_v11 }
 0xed3   : > { %2420 = vmatpush1.bf16.msra.mxu0 %v4762_v62 }
 0xed4   : > { %2421 = vmatprep.subr.bf16.mxu0 %v4768_v55 }
 0xed7   : > { %2422 = vmatpush1.bf16.msra.mxu0 %v4774_v56 }
 0xed8   : > { %2423 = vmatprep.subr.bf16.mxu0 %v4780_v59 }
 0xedb   : > { %2424 = vmatpush1.bf16.msra.mxu0 %v4866_v18 }
 0xedc   : > { %2425 = vmatprep.subr.bf16.mxu0 %v4872_v48 }
 0xedf   : > { %2426 = vmatpush1.bf16.msra.mxu0 %v4878_v49 }
 0xee0   : > { %2427 = vmatprep.subr.bf16.mxu0 %v4884_v39 }
 0xee3   : > { %2428 = vmatpush1.bf16.msra.mxu0 %v4890_v40 }
 0xee4   : > { %2527 = vmatprep.subr.bf16.mxu0 %v4601_v42 }
 0xf79   : > { %v2301_v50 = vpop.f32.mrb[56].mxu0 }
 0xf7a   : > { %v2302_v46 = vadd.f32 %v2301_v50, %v3968_v22  ;;  %v2303_v47 = vpop.f32.mrb[57].mxu0 }
 0xf7b   : > { %v2304_v52 = vadd.f32 %v2303_v47, %v3972_v26  ;;  %v2305_v0 = vpop.f32.mrb[58].mxu0 }
 0xf7c   : > { %v2306_v54 = vadd.f32 %v2305_v0, %v3968_v22  ;;  %v2307_v60 = vpop.f32.mrb[59].mxu0  ;;  %v2320_v12 = vmax.f32 %v2302_v46, 0.0 }
 0xf7d   : > { %v2308_v63 = vadd.f32 %v2307_v60, %v3972_v26  ;;  %v2321_v9 = vmax.f32 %v2304_v52, 0.0 }
 0xf7e   : > { %v2322_v15 = vmax.f32 %v2306_v54, 0.0 }
 0xf7f   : > { %v2323_v16 = vmax.f32 %v2308_v63, 0.0 }
 0xf80   : > { %v2328_v17 = vpack.c.bf16 %v2322_v15, %v2320_v12 }
 0xf81   : > { %v2329_v58 = vpack.c.bf16 %v2323_v16, %v2321_v9  ;;  %v2311_v25 = vpop.f32.mrb[60].mxu0 }
 0xf82   : > { %v2312_v42 = vadd.f32 %v2311_v25, %v3968_v22  ;;  %v2313_v61 = vpop.f32.mrb[61].mxu0 }
 0xf83   : > { %v2314_v21 = vadd.f32 %v2313_v61, %v3972_v26  ;;  %v2315_v29 = vpop.f32.mrb[62].mxu0  ;;  %2364 = vmatprep.mubr.bf16.mxu1 %v2329_v58 }
 0xf84   : > { %v2316_v30 = vadd.f32 %v2315_v29, %v3968_v22  ;;  %v2317_v33 = vpop.f32.mrb[63].mxu0  ;;  %2365 = vmatmul.mubr.bf16.vlgmr.msra.gmra.mrb[72].mxu1 %v2328_v17  ;;  %v2324_v37 = vmax.f32 %v2312_v42, 0.0 }
 0xf85   : > { %v2318_v34 = vadd.f32 %v2317_v33, %v3972_v26  ;;  %2463 = vmatpush1.bf16.msra.mxu1 %v4545_v23  ;;  %v2325_v28 = vmax.f32 %v2314_v21, 0.0 }
 0xf86   : > { %v2326_v38 = vmax.f32 %v2316_v30, 0.0  ;;  %2464 = vmatprep.subr.bf16.mxu1 %v4551_v6 }
 0xf87   : > { %v2327_v31 = vmax.f32 %v2318_v34, 0.0 }
 0xf88   : > { %v2330_v43 = vpack.c.bf16 %v2326_v38, %v2324_v37 }
 0xf89   : > { %v2331_v44 = vpack.c.bf16 %v2327_v31, %v2325_v28  ;;  %2465 = vmatpush1.bf16.msra.mxu1 %v4557_v32  ;;  %v3241_v31 = vld [vmem:[%s5059_s5 + $0x8] sm:$0xff]  }
 0xf8a   : > { %2466 = vmatprep.subr.bf16.mxu1 %v4563_v35 }
 0xf8b   : > { %2374 = vmatprep.mubr.bf16.mxu1 %v2331_v44  ;;  %v3243_v44 = vld [vmem:[%s5059_s5 + $0x10] sm:$0xff]  }
 0xf8c   : > { %2375 = vmatmul.mubr.bf16.gmra.mrb[76].mxu1 %v2330_v43  ;;  %v3242_v43 = vld [vmem:[%s5059_s5 + $0x50] sm:$0xff]  }
 0xf8d   : > { %2467 = vmatpush1.bf16.msra.mxu1 %v4569_v36 }
 0xf8e   : > { %2468 = vmatprep.subr.bf16.mxu1 %v4620_v41 }
 0xf91   : > { %2469 = vmatpush1.bf16.msra.mxu1 %v4626_v19 }
 0xf92   : > { %2470 = vmatprep.subr.bf16.mxu1 %v4632_v20 }
 0xf95   : > { %2471 = vmatpush1.bf16.msra.mxu1 %v4638_v1 }
 0xf96   : > { %2472 = vmatprep.subr.bf16.mxu1 %v4644_v2 }
 0xf99   : > { %2473 = vmatpush1.bf16.msra.mxu1 %v4650_v5 }
 0xf9a   : > { %2474 = vmatprep.subr.bf16.mxu1 %v4656_v24 }
 0xf9d   : > { %2475 = vmatpush1.bf16.msra.mxu1 %v4662_v27 }
 0xf9e   : > { %2476 = vmatprep.subr.bf16.mxu1 %v4668_v8 }
 0xfa1   : > { %2477 = vmatpush1.bf16.msra.mxu1 %v4714_v53 }
 0xfa2   : > { %2478 = vmatprep.subr.bf16.mxu1 %v4720_v57 }
 0xfa5   : > { %2479 = vmatpush1.bf16.msra.mxu1 %v4726_v51 }
 0xfa6   : > { %2480 = vmatprep.subr.bf16.mxu1 %v4732_v3 }
 0xfa9   : > { %2481 = vmatpush1.bf16.msra.mxu1 %v4738_v4 }
 0xfaa   : > { %2482 = vmatprep.subr.bf16.mxu1 %v4744_v7 }
 0xfad   : > { %2483 = vmatpush1.bf16.msra.mxu1 %v4750_v10 }
 0xfae   : > { %2484 = vmatprep.subr.bf16.mxu1 %v4756_v11 }
 0xfb1   : > { %2485 = vmatpush1.bf16.msra.mxu1 %v4762_v62 }
 0xfb2   : > { %2486 = vmatprep.subr.bf16.mxu1 %v4768_v55 }
 0xfb5   : > { %2487 = vmatpush1.bf16.msra.mxu1 %v4774_v56 }
 0xfb6   : > { %2488 = vmatprep.subr.bf16.mxu1 %v4780_v59 }
 0xfb9   : > { %2489 = vmatpush1.bf16.msra.mxu1 %v4866_v18 }
 0xfba   : > { %2490 = vmatprep.subr.bf16.mxu1 %v4872_v48 }
 0xfbd   : > { %2491 = vmatpush1.bf16.msra.mxu1 %v4878_v49 }
 0xfbe   : > { %2492 = vmatprep.subr.bf16.mxu1 %v4884_v39 }
 0xfc1   : > { %2493 = vmatpush1.bf16.msra.mxu1 %v4890_v40 }
0x1057   : > { %v2366_v14 = vpop.f32.mrb[72].mxu1 }
0x1058   : > { %v2367_v45 = vadd.f32 %v2366_v14, %v3968_v22  ;;  %v2368_v13 = vpop.f32.mrb[73].mxu1  ;;  %v3244_v14 = vld [vmem:[%s5059_s5 + $0x58] sm:$0xff]  }
0x1059   : > { %v2369_v50 = vadd.f32 %v2368_v13, %v3972_v26  ;;  %v2370_v46 = vpop.f32.mrb[74].mxu1  ;;  %v3246_v13 = vld [vmem:[%s5059_s5 + $0x60] sm:$0xff]  }
0x105a   : > { %v2371_v47 = vadd.f32 %v2370_v46, %v3968_v22  ;;  %v2372_v52 = vpop.f32.mrb[75].mxu1  ;;  %v2385_v54 = vmax.f32 %v2367_v45, 0.0  ;;  %v3245_v45 = vld [vmem:[%s5059_s5 + $0x18] sm:$0xff]   ;;  %v3248_v46 = vld [vmem:[%s5059_s5 + $0x68] sm:$0xff]  }
0x105b   : > { %v2373_v0 = vadd.f32 %v2372_v52, %v3972_v26  ;;  %v2386_v63 = vmax.f32 %v2369_v50, 0.0  ;;  %v3247_v50 = vld [vmem:[%s5059_s5 + $0x20] sm:$0xff]  }
0x105c   : > { %v2387_v60 = vmax.f32 %v2371_v47, 0.0 }
0x105d   : > { %v2388_v12 = vmax.f32 %v2373_v0, 0.0 }
0x105e   : > { %v2393_v15 = vpack.c.bf16 %v2387_v60, %v2385_v54 }
0x105f   : > { %v2394_v9 = vpack.c.bf16 %v2388_v12, %v2386_v63  ;;  %v2376_v16 = vpop.f32.mrb[76].mxu1 }
0x1060   : > { %v2377_v17 = vadd.f32 %v2376_v16, %v3968_v22  ;;  %v2378_v58 = vpop.f32.mrb[77].mxu1 }
0x1061   : > { %v2379_v25 = vadd.f32 %v2378_v58, %v3972_v26  ;;  %v2380_v42 = vpop.f32.mrb[78].mxu1  ;;  %2429 = vmatprep.mubr.bf16.mxu0 %v2394_v9 }
0x1062   : > { %v2381_v61 = vadd.f32 %v2380_v42, %v3968_v22  ;;  %v2382_v21 = vpop.f32.mrb[79].mxu1  ;;  %2430 = vmatmul.mubr.bf16.vlgmr.msra.gmra.mrb[64].mxu0 %v2393_v15  ;;  %v2389_v30 = vmax.f32 %v2377_v17, 0.0 }
0x1063   : > { %v2383_v29 = vadd.f32 %v2382_v21, %v3972_v26  ;;  %2528 = vmatpush1.bf16.msra.mxu0 %v4545_v23  ;;  %v2390_v34 = vmax.f32 %v2379_v25, 0.0 }
0x1064   : > { %v2391_v33 = vmax.f32 %v2381_v61, 0.0  ;;  %2529 = vmatprep.subr.bf16.mxu0 %v4551_v6 }
0x1065   : > { %v2392_v37 = vmax.f32 %v2383_v29, 0.0 }
0x1066   : > { %v2395_v38 = vpack.c.bf16 %v2391_v33, %v2389_v30 }
0x1067   : > { %v2396_v28 = vpack.c.bf16 %v2392_v37, %v2390_v34  ;;  %2530 = vmatpush1.bf16.msra.mxu0 %v4557_v32 }
0x1068   : > { %2531 = vmatprep.subr.bf16.mxu0 %v4563_v35 }
0x1069   : > { %2439 = vmatprep.mubr.bf16.mxu0 %v2396_v28 }
0x106a   : > { %2440 = vmatmul.mubr.bf16.gmra.mrb[68].mxu0 %v2395_v38 }
0x106b   : > { %2532 = vmatpush1.bf16.msra.mxu0 %v4569_v36 }
0x106c   : > { %2533 = vmatprep.subr.bf16.mxu0 %v4620_v41 }
0x106f   : > { %2534 = vmatpush1.bf16.msra.mxu0 %v4626_v19 }
0x1070   : > { %2535 = vmatprep.subr.bf16.mxu0 %v4632_v20 }
0x1073   : > { %2536 = vmatpush1.bf16.msra.mxu0 %v4638_v1 }
0x1074   : > { %2537 = vmatprep.subr.bf16.mxu0 %v4644_v2 }
0x1077   : > { %2538 = vmatpush1.bf16.msra.mxu0 %v4650_v5 }
0x1078   : > { %2539 = vmatprep.subr.bf16.mxu0 %v4656_v24 }
0x107b   : > { %2540 = vmatpush1.bf16.msra.mxu0 %v4662_v27 }
0x107c   : > { %2541 = vmatprep.subr.bf16.mxu0 %v4668_v8 }
0x107f   : > { %2542 = vmatpush1.bf16.msra.mxu0 %v4714_v53 }
0x1080   : > { %2543 = vmatprep.subr.bf16.mxu0 %v4720_v57 }
0x1083   : > { %2544 = vmatpush1.bf16.msra.mxu0 %v4726_v51 }
0x1084   : > { %2545 = vmatprep.subr.bf16.mxu0 %v4732_v3 }
0x1087   : > { %2546 = vmatpush1.bf16.msra.mxu0 %v4738_v4 }
0x1088   : > { %2547 = vmatprep.subr.bf16.mxu0 %v4744_v7 }
0x108b   : > { %2548 = vmatpush1.bf16.msra.mxu0 %v4750_v10 }
0x108c   : > { %2549 = vmatprep.subr.bf16.mxu0 %v4756_v11 }
0x108f   : > { %2550 = vmatpush1.bf16.msra.mxu0 %v4762_v62 }
0x1090   : > { %2551 = vmatprep.subr.bf16.mxu0 %v4768_v55 }
0x1093   : > { %2552 = vmatpush1.bf16.msra.mxu0 %v4774_v56 }
0x1094   : > { %2553 = vmatprep.subr.bf16.mxu0 %v4780_v59 }
0x1097   : > { %2554 = vmatpush1.bf16.msra.mxu0 %v4866_v18 }
0x1098   : > { %2555 = vmatprep.subr.bf16.mxu0 %v4872_v48 }
0x109b   : > { %2556 = vmatpush1.bf16.msra.mxu0 %v4878_v49  ;;  %v3238_v49 = vld [vmem:[%s5059_s5 + $0x40] sm:$0xff]  }
0x109c   : > { %2557 = vmatprep.subr.bf16.mxu0 %v4884_v39  ;;  %v3239_v39 = vld [vmem:[%s5059_s5] sm:$0xff]   ;;  %2985 = vmatprep.subr.bf16.mxu1 %v3238_v49 }
0x109f   : > { %2558 = vmatpush1.bf16.msra.mxu0 %v4890_v40  ;;  %v3240_v40 = vld [vmem:[%s5059_s5 + $0x48] sm:$0xff]  }
0x1135   : > { %v2431_v23 = vpop.f32.mrb[64].mxu0 }
0x1136   : > { %v2432_v6 = vadd.f32 %v2431_v23, %v3968_v22  ;;  %v2433_v32 = vpop.f32.mrb[65].mxu0 }
0x1137   : > { %v2434_v35 = vadd.f32 %v2433_v32, %v3972_v26  ;;  %v2435_v36 = vpop.f32.mrb[66].mxu0 }
0x1138   : > { %v2436_v41 = vadd.f32 %v2435_v36, %v3968_v22  ;;  %v2437_v19 = vpop.f32.mrb[67].mxu0  ;;  %v2450_v1 = vmax.f32 %v2432_v6, 0.0 }
0x1139   : > { %v2438_v20 = vadd.f32 %v2437_v19, %v3972_v26  ;;  %v2451_v5 = vmax.f32 %v2434_v35, 0.0  ;;  %v3250_v19 = vld [vmem:[%s5059_s5 + $0x70] sm:$0xff]  }
0x113a   : > { %v2452_v2 = vmax.f32 %v2436_v41, 0.0  ;;  %v3249_v41 = vld [vmem:[%s5059_s5 + $0x28] sm:$0xff]  }
0x113b   : > { %v2453_v24 = vmax.f32 %v2438_v20, 0.0  ;;  %v3251_v20 = vld [vmem:[%s5059_s5 + $0x30] sm:$0xff]  }
0x113c   : > { %v2458_v27 = vpack.c.bf16 %v2452_v2, %v2450_v1  ;;  %v3252_v1 = vld [vmem:[%s5059_s5 + $0x78] sm:$0xff]  }
0x113d   : > { %v2459_v8 = vpack.c.bf16 %v2453_v24, %v2451_v5  ;;  %v2441_v53 = vpop.f32.mrb[68].mxu0  ;;  %v3253_v2 = vld [vmem:[%s5059_s5 + $0x38] sm:$0xff]  }
0x113e   : > { %v2442_v57 = vadd.f32 %v2441_v53, %v3968_v22  ;;  %v2443_v51 = vpop.f32.mrb[69].mxu0 }
0x113f   : > { %v2444_v3 = vadd.f32 %v2443_v51, %v3972_v26  ;;  %v2445_v4 = vpop.f32.mrb[70].mxu0  ;;  %2494 = vmatprep.mubr.bf16.mxu1 %v2459_v8 }
0x1140   : > { %v2446_v7 = vadd.f32 %v2445_v4, %v3968_v22  ;;  %v2447_v10 = vpop.f32.mrb[71].mxu0  ;;  %2495 = vmatmul.mubr.bf16.vlgmr.msra.gmra.mrb[80].mxu1 %v2458_v27  ;;  %v2454_v62 = vmax.f32 %v2442_v57, 0.0 }
0x1141   : > { %v2448_v11 = vadd.f32 %v2447_v10, %v3972_v26  ;;  %v2455_v56 = vmax.f32 %v2444_v3, 0.0  ;;  %2986 = vmatpush3.bf16.msra.mxu1 %v3239_v39 }
0x1142   : > { %v2456_v55 = vmax.f32 %v2446_v7, 0.0  ;;  %2987 = vmatprep.subr.bf16.mxu1 %v3240_v40 }
0x1143   : > { %v2457_v59 = vmax.f32 %v2448_v11, 0.0 }
0x1144   : > { %v2460_v18 = vpack.c.bf16 %v2456_v55, %v2454_v62 }
0x1145   : > { %v2461_v48 = vpack.c.bf16 %v2457_v59, %v2455_v56  ;;  %2988 = vmatpush3.bf16.msra.mxu1 %v3241_v31 }
0x1146   : > { %2989 = vmatprep.subr.bf16.mxu1 %v3242_v43 }
0x1147   : > { %2504 = vmatprep.mubr.bf16.mxu1 %v2461_v48 }
0x1148   : > { %2505 = vmatmul.mubr.bf16.gmra.mrb[84].mxu1 %v2460_v18 }
0x1149   : > { %2990 = vmatpush3.bf16.msra.mxu1 %v3243_v44 }
0x114a   : > { %2991 = vmatprep.subr.bf16.mxu1 %v3244_v14 }
0x114d   : > { %2992 = vmatpush3.bf16.msra.mxu1 %v3245_v45 }
0x114e   : > { %2993 = vmatprep.subr.bf16.mxu1 %v3246_v13 }
0x1151   : > { %2994 = vmatpush3.bf16.msra.mxu1 %v3247_v50 }
0x1152   : > { %2995 = vmatprep.subr.bf16.mxu1 %v3248_v46 }
0x1155   : > { %2996 = vmatpush3.bf16.msra.mxu1 %v3249_v41 }
0x1156   : > { %2997 = vmatprep.subr.bf16.mxu1 %v3250_v19 }
0x1159   : > { %2998 = vmatpush3.bf16.msra.mxu1 %v3251_v20 }
0x115a   : > { %2999 = vmatprep.subr.bf16.mxu1 %v3252_v1 }
0x115d   : > { %3000 = vmatpush3.bf16.msra.mxu1 %v3253_v2 }
0x1213   : > { %v2496_v47 = vpop.f32.mrb[80].mxu1 }
0x1214   : > { %v2497_v52 = vadd.f32 %v2496_v47, %v3968_v22  ;;  %v2498_v0 = vpop.f32.mrb[81].mxu1  ;;  %v2838_v47 = vld [vmem:[%s5060_s6] ss:$0 sm:$0xff] }
0x1215   : > { %v2499_v54 = vadd.f32 %v2498_v0, %v3972_v26  ;;  %v2500_v60 = vpop.f32.mrb[82].mxu1 }
0x1216   : > { %v2501_v63 = vadd.f32 %v2500_v60, %v3968_v22  ;;  %v2502_v12 = vpop.f32.mrb[83].mxu1  ;;  %v2515_v9 = vmax.f32 %v2497_v52, 0.0 }
0x1217   : > { %v2503_v15 = vadd.f32 %v2502_v12, %v3972_v26  ;;  %v2516_v17 = vmax.f32 %v2499_v54, 0.0 }
0x1218   : > { %v2517_v16 = vmax.f32 %v2501_v63, 0.0 }
0x1219   : > { %v2518_v58 = vmax.f32 %v2503_v15, 0.0 }
0x121a   : > { %v2523_v25 = vpack.c.bf16 %v2517_v16, %v2515_v9 }
0x121b   : > { %v2524_v42 = vpack.c.bf16 %v2518_v58, %v2516_v17  ;;  %v2506_v61 = vpop.f32.mrb[84].mxu1 }
0x121c   : > { %v2507_v21 = vadd.f32 %v2506_v61, %v3968_v22  ;;  %v2508_v29 = vpop.f32.mrb[85].mxu1 }
0x121d   : > { %v2509_v30 = vadd.f32 %v2508_v29, %v3972_v26  ;;  %v2510_v33 = vpop.f32.mrb[86].mxu1  ;;  %2559 = vmatprep.mubr.bf16.mxu0 %v2524_v42 }
0x121e   : > { %v2511_v34 = vadd.f32 %v2510_v33, %v3968_v22  ;;  %v2512_v37 = vpop.f32.mrb[87].mxu1  ;;  %2560 = vmatmul.mubr.bf16.vlgmr.msra.gmra.mrb[72].mxu0 %v2523_v25  ;;  %v2519_v28 = vmax.f32 %v2507_v21, 0.0 }
0x121f   : > { %v2513_v38 = vadd.f32 %v2512_v37, %v3972_v26  ;;  %v2520_v6 = vmax.f32 %v2509_v30, 0.0 }
0x1220   : > { %v2521_v23 = vmax.f32 %v2511_v34, 0.0 }
0x1221   : > { %v2522_v32 = vmax.f32 %v2513_v38, 0.0 }
0x1222   : > { %v2525_v35 = vpack.c.bf16 %v2521_v23, %v2519_v28 }
0x1223   : > { %v2526_v36 = vpack.c.bf16 %v2522_v32, %v2520_v6 }
0x1225   : > { %2569 = vmatprep.mubr.bf16.mxu0 %v2526_v36 }
0x1226   : > { %2570 = vmatmul.mubr.bf16.gmra.mrb[76].mxu0 %v2525_v35 }
0x12f1   : > { %v2561_v5 = vpop.f32.mrb[72].mxu0 }
0x12f2   : > { %v2562_v24 = vadd.f32 %v2561_v5, %v3968_v22  ;;  %v2563_v27 = vpop.f32.mrb[73].mxu0 }
0x12f3   : > { %v2564_v8 = vadd.f32 %v2563_v27, %v3972_v26  ;;  %v2565_v53 = vpop.f32.mrb[74].mxu0 }
0x12f4   : > { %v2566_v57 = vadd.f32 %v2565_v53, %v3968_v22  ;;  %v2567_v51 = vpop.f32.mrb[75].mxu0  ;;  %v2580_v4 = vmax.f32 %v2562_v24, 0.0 }
0x12f5   : > { %v2568_v3 = vadd.f32 %v2567_v51, %v3972_v26  ;;  %v2581_v10 = vmax.f32 %v2564_v8, 0.0 }
0x12f6   : > { %v2582_v7 = vmax.f32 %v2566_v57, 0.0 }
0x12f7   : > { %v2583_v11 = vmax.f32 %v2568_v3, 0.0 }
0x12f8   : > { %v2588_v62 = vpack.c.bf16 %v2582_v7, %v2580_v4 }
0x12f9   : > { %v2589_v55 = vpack.c.bf16 %v2583_v11, %v2581_v10  ;;  %v2571_v56 = vpop.f32.mrb[76].mxu0 }
0x12fa   : > { %v2572_v59 = vadd.f32 %v2571_v56, %v3968_v22  ;;  %v2573_v18 = vpop.f32.mrb[77].mxu0 }
0x12fb   : > { %v2574_v48 = vadd.f32 %v2573_v18, %v3972_v26  ;;  %v2575_v49 = vpop.f32.mrb[78].mxu0  ;;  %2752 = vmatprep.mubr.bf16.mxu1 %v2589_v55 }
0x12fc   : > { %v2576_v39 = vadd.f32 %v2575_v49, %v3968_v22  ;;  %v2577_v40 = vpop.f32.mrb[79].mxu0  ;;  %2753 = vmatmul.mubr.bf16.vlgmr.msra.gmra.mrb[88].mxu1 %v2588_v62  ;;  %v2584_v43 = vmax.f32 %v2572_v59, 0.0 }
0x12fd   : > { %v2578_v31 = vadd.f32 %v2577_v40, %v3972_v26  ;;  %v2585_v14 = vmax.f32 %v2574_v48, 0.0 }
0x12fe   : > { %v2586_v44 = vmax.f32 %v2576_v39, 0.0 }
0x12ff   : > { %v2587_v45 = vmax.f32 %v2578_v31, 0.0 }
0x1300   : > { %v2590_v13 = vpack.c.bf16 %v2586_v44, %v2584_v43 }
0x1301   : > { %v2591_v50 = vpack.c.bf16 %v2587_v45, %v2585_v14 }
0x1303   : > { %2760 = vmatprep.mubr.bf16.mxu1 %v2591_v50 }
0x1304   : > { %2761 = vmatmul.mubr.bf16.gmra.mrb[92].mxu1 %v2590_v13 }
0x13cf   : > { %v3001_v46 = vpop.f32.mrb[88].mxu1 }
0x13d0   : > { %v3002_v52 = vpop.f32.mrb[89].mxu1 }
0x13d1   : > { %v3003_v22 = vadd.f32 %v3002_v52, %v3001_v46  ;;  %v3004_v0 = vpop.f32.mrb[90].mxu1 }
0x13d2   : > { %v3005_v26 = vpop.f32.mrb[91].mxu1 }
0x13d3   : > { %v2755_v54 = vadd.f32 %v3003_v22, %v2838_v47  ;;  %v3006_v60 = vadd.f32 %v3005_v26, %v3004_v0 }
0x13d5   : > { %2769 = vst [vmem:[%s283_s23] sm:$0xff] %v2755_v54  ;;  %v2758_v63 = vadd.f32 %v3006_v60, %v2838_v47 }
0x13d7   : > { %2770 = vst [vmem:[%s283_s23 + $0x8] sm:$0xff] %v2758_v63  ;;  %v3007_v12 = vpop.f32.mrb[92].mxu1 }
0x13d8   : > { %v3008_v15 = vpop.f32.mrb[93].mxu1 }
0x13d9   : > { %v3009_v9 = vadd.f32 %v3008_v15, %v3007_v12  ;;  %v3010_v16 = vpop.f32.mrb[94].mxu1 }
0x13da   : > { %v3011_v17 = vpop.f32.mrb[95].mxu1 }
0x13db   : > { %v2763_v58 = vadd.f32 %v3009_v9, %v2838_v47  ;;  %v3012_v25 = vadd.f32 %v3011_v17, %v3010_v16 }
0x13dd   : > { %2771 = vst [vmem:[%s283_s23 + $0x10] sm:$0xff] %v2763_v58  ;;  %v2766_v42 = vadd.f32 %v3012_v25, %v2838_v47 }
0x13df   : > { %2772 = vst [vmem:[%s283_s23 + $0x18] sm:$0xff] %v2766_v42 }
0x13e0 PF: > { %s17_s24 = sadd.s32 1, %s3324_s24  }
0x13e1   : > { %p14_p4 = scmp.ge.s32.totalorder %s17_s24, 4  }
0x13e3   :  { %16 = sbr.rel (!%p14_p4) target bundleno = 1 (0x1), region = 78 }

</bundles_post_ra>
